<compile_context>
chip_gen: v6e
topology: v6e:2x2x1
jax: 0.10.0
libtpu: 0.0.40
codegen_flags: <defaults>
</compile_context>

<pallas_src>
import jax
import jax.numpy as jnp
from jax.experimental import pallas as pl
from jax.experimental.pallas import tpu as pltpu

HIDDEN = 32
INPUT = 2 * HIDDEN          # BatchNorm1d(hidden_size * 2) => input_size = 2*hidden
EPS = 1e-5
_SQRT1_2 = 0.7071067811865476
_NT_DIMS = (((1,), (1,)), ((), ()))          # contract last dim of both (A @ B^T)
_PREC = jax.lax.Precision.HIGHEST


def task2_kernel(x_ref, wblk_ref, bblk_ref, w2blk_ref, out_ref):
    x = x_ref[...]                                             # (TM2, 128) f32

    # Fused (BN-folded dense1 | residual@w2 + b2) matmul for two packed logical
    # rows at once: K=128, N=128 -> one full MXU tile, true-f32 passes.
    z = jnp.dot(x, wblk_ref[...],
                preferred_element_type=jnp.float32,
                precision=_PREC) + bblk_ref[...]               # (TM2, 128)

    # Lanes [0:32] / [64:96] hold the dense1 pre-activations of the even / odd
    # logical row -> exact erf GELU; lanes 32 / 96 carry the already
    # w2-projected residual (+ b2) and pass through; remaining lanes are zero.
    col = jax.lax.broadcasted_iota(jnp.int32, z.shape, 1)
    cdf = 0.5 * (1.0 + jax.lax.erf(z * _SQRT1_2))
    zg = z * jnp.where((col & 63) < HIDDEN, cdf, 1.0)

    # dropout: identity in eval mode.
    # TODO(synk): training-mode stochastic dropout / batch-stat BN not implemented.

    # dense2 as a structured 2-row NT dot: row 0 applies [w2;1] to the even
    # half, row 1 to the odd half -> lane-dense (2, TM2) output rows.
    rows = jax.lax.dot_general(w2blk_ref[...], zg, _NT_DIMS,
                               preferred_element_type=jnp.float32,
                               precision=_PREC)                # (8, TM2)
    out_ref[0] = rows[0:2, :]                                  # (2, TM2)


def fold_params(params):
    """Fold eval-mode BN into dense1 and residual Linear + b2 through dense2;
    pack block-diagonal weights for the 2-rows-per-vreg kernel."""
    gamma, beta, rmean, rvar, w1, b1, wr, br, w2, b2 = params
    D, H = w1.shape
    assert D == 2 * H

    a = gamma * jax.lax.rsqrt(rvar + EPS)                      # (1, D)
    c = beta - rmean * a                                       # (1, D)
    w1p = a.reshape(-1, 1) * w1                                # (D, H)
    b1p = b1 + jnp.dot(c, w1, precision=_PREC)                 # (1, H)
    # (x @ wr + br) @ w2 + b2 == x @ (wr @ w2) + (br @ w2 + b2)
    wres = jnp.dot(wr, w2, precision=_PREC)                    # (D, 1)
    bres = jnp.dot(br, w2, precision=_PREC) + b2               # (1, 1)

    pad = H - 1                                                # zero lanes per slot
    wrow = jnp.concatenate([w1p, wres,
                            jnp.zeros((D, pad), w1.dtype)], axis=1)   # (D, 2H)
    brow = jnp.concatenate([b1p, bres,
                            jnp.zeros((1, pad), w1.dtype)], axis=1)   # (1, 2H)

    zero_w = jnp.zeros_like(wrow)
    wblk = jnp.concatenate(
        [jnp.concatenate([wrow, zero_w], axis=1),
         jnp.concatenate([zero_w, wrow], axis=1)], axis=0)     # (2D, 2D) block-diag
    bblk = jnp.concatenate([brow, brow], axis=1)               # (1, 2D)

    vrow = jnp.concatenate([w2.reshape(1, -1),
                            jnp.ones((1, 1), w2.dtype),
                            jnp.zeros((1, pad), w2.dtype)], axis=1)   # (1, 2H)
    zero_v = jnp.zeros_like(vrow)
    w2blk = jnp.tile(
        jnp.concatenate([jnp.concatenate([vrow, zero_v], axis=1),
                         jnp.concatenate([zero_v, vrow], axis=1)], axis=0),
        (4, 1))                                                # (8, 2D) full sublanes

    return wblk, bblk, w2blk, wrow, brow, w2


def _tail_forward(x_tail, wrow, brow, w2):
    """Tiny pure-JAX epilogue for the ragged tail rows (same folded math)."""
    H = w2.shape[0]
    z = jnp.dot(x_tail, wrow[:, :H + 1], precision=_PREC) + brow[:, :H + 1]
    h = z[:, :H]
    g = 0.5 * h * (1.0 + jax.lax.erf(h * _SQRT1_2))
    return jnp.dot(g, w2, precision=_PREC) + z[:, H:H + 1]     # (n, 1)


def task2_forward(x, params, *, tile_m=4096):
    """x: (B, T, INPUT) float32 -> (B, T, 1) float32."""
    B, T, D = x.shape
    assert D == INPUT
    N = B * T

    wblk, bblk, w2blk, wrow, brow, w2 = fold_params(params)

    x2d = x.reshape(N, D)
    n_pack = (N // 2) * 2               # logical rows that can be row-packed
    n2 = n_pack // 2                    # physical (packed) rows

    # Physical-row tile (multiple of 128); clamp so the "parallel" grid keeps
    # >= 2 steps when the data allows it (v7x has 2 TensorCores).
    tm2 = max(128, (min(tile_m, 4096) // 2) // 128 * 128)
    if n2 >= 256:
        tm2 = min(tm2, max(128, (n2 // 2) // 128 * 128))
    num_tiles = n2 // tm2
    n_main = num_tiles * tm2 * 2        # logical rows handled by the kernel

    pieces = []
    if num_tiles > 0:
        # Contiguous (N, D) -> (N/2, 2D) view: two logical rows per physical
        # row (free bitcast reshape when N is even; no whole-array pad).
        xp = (x2d if n_pack == N else x2d[:n_pack]).reshape(n2, 2 * D)
        out3 = pl.pallas_call(
            task2_kernel,
            out_shape=jax.ShapeDtypeStruct((num_tiles, 2, tm2), jnp.float32),
            grid_spec=pltpu.PrefetchScalarGridSpec(
                num_scalar_prefetch=0,
                grid=(num_tiles,),
                in_specs=[
                    pl.BlockSpec((tm2, 2 * D), lambda i: (i, 0)),    # packed rows
                    pl.BlockSpec((2 * D, 2 * D), lambda i: (0, 0)),  # block-diag W
                    pl.BlockSpec((1, 2 * D), lambda i: (0, 0)),      # packed bias
                    pl.BlockSpec((8, 2 * D), lambda i: (0, 0)),      # structured w2
                ],
                out_specs=pl.BlockSpec((1, 2, tm2), lambda i: (i, 0, 0)),
            ),
            compiler_params=pltpu.CompilerParams(
                dimension_semantics=("parallel",)),
        )(xp, wblk, bblk, w2blk)
        # (tiles, 2, tm2): [i, 0, j] = even logical row, [i, 1, j] = odd ->
        # interleave back to logical order (tiny N-sized transpose).
        pieces.append(jnp.transpose(out3, (0, 2, 1)).reshape(-1))

    if n_main < N:
        # Ragged tail (< one tile, plus a possible odd row): pure-JAX epilogue
        # instead of padding/copying the whole input.
        pieces.append(_tail_forward(x2d[n_main:], wrow, brow, w2).reshape(-1))

    out_flat = pieces[0] if len(pieces) == 1 else jnp.concatenate(pieces)
    return out_flat.reshape(B, T, 1)


def init_params(key, input_size=INPUT, hidden_size=HIDDEN):
    ks = jax.random.split(key, 10)
    gamma = jax.random.uniform(ks[0], (1, input_size), jnp.float32, 0.5, 1.5)
    beta = 0.1 * jax.random.normal(ks[1], (1, input_size), jnp.float32)
    rmean = 0.1 * jax.random.normal(ks[2], (1, input_size), jnp.float32)
    rvar = jax.random.uniform(ks[3], (1, input_size), jnp.float32, 0.5, 1.5)
    # Linear weights stored pre-transposed (in_features, out_features).
    w1 = 0.1 * jax.random.normal(ks[4], (input_size, hidden_size), jnp.float32)
    b1 = 0.1 * jax.random.normal(ks[5], (1, hidden_size), jnp.float32)
    wr = 0.1 * jax.random.normal(ks[6], (input_size, hidden_size), jnp.float32)
    br = 0.1 * jax.random.normal(ks[7], (1, hidden_size), jnp.float32)
    w2 = 0.1 * jax.random.normal(ks[8], (hidden_size, 1), jnp.float32)
    b2 = 0.1 * jax.random.normal(ks[9], (1, 1), jnp.float32)
    return (gamma, beta, rmean, rvar, w1, b1, wr, br, w2, b2)


def reference_forward(x, params):
    """Pure-JAX reference of the eval-mode PyTorch forward (unfused)."""
    gamma, beta, rmean, rvar, w1, b1, wr, br, w2, b2 = params
    xn = (x - rmean) / jnp.sqrt(rvar + EPS) * gamma + beta
    h = jnp.einsum("btd,dh->bth", xn, w1, precision=_PREC) + b1
    g = 0.5 * h * (1.0 + jax.lax.erf(h * _SQRT1_2))
    r = jnp.einsum("btd,dh->bth", x, wr, precision=_PREC) + br
    y = g + r
    return jnp.einsum("bth,ho->bto", y, w2, precision=_PREC) + b2


if __name__ == "__main__":
    key = jax.random.PRNGKey(0)
    kx, kp = jax.random.split(key)

    # N = 2080 logical rows -> 2 grid steps of 512 packed rows (2048 logical)
    # on the kernel path + a 32-row pure-JAX tail; no padding anywhere.
    B, T = 4, 520
    x = jax.random.normal(kx, (B, T, INPUT), jnp.float32)
    params = init_params(kp)

    out = task2_forward(x, params)
    out = jax.block_until_ready(out)

    ref = reference_forward(x, params)
    assert out.shape == (B, T, 1)
    err = float(jnp.max(jnp.abs(out - ref)))
    assert jnp.allclose(out, ref, atol=2e-4, rtol=2e-4), err
    print("KERNEL_OK")
</pallas_src>

<mosaic_0001>
module attributes {stable_mosaic.version = 11 : i64} {
  func.func @task2_kernel(%arg0: i32, %arg1: memref<512x128xf32, #tpu.memory_space<vmem>>, %arg2: memref<128x128xf32, #tpu.memory_space<vmem>>, %arg3: memref<1x128xf32, #tpu.memory_space<vmem>>, %arg4: memref<8x128xf32, #tpu.memory_space<vmem>>, %arg5: memref<1x2x512xf32, #tpu.memory_space<vmem>>) attributes {dimension_semantics = [#tpu.dimension_semantics<parallel>], iteration_bounds = array<i64: 2>, scalar_prefetch = 0 : i64, scratch_operands = 0 : i64, tpu.core_type = #tpu.core_type<tc>, window_params = [{transform_indices = @transform_0, window_bounds = array<i64: 512, 128>}, {pipeline_mode = #tpu.pipeline_mode<synchronous>, transform_indices = @transform_1, window_bounds = array<i64: 128, 128>}, {pipeline_mode = #tpu.pipeline_mode<synchronous>, transform_indices = @transform_2, window_bounds = array<i64: 1, 128>}, {pipeline_mode = #tpu.pipeline_mode<synchronous>, transform_indices = @transform_3, window_bounds = array<i64: 8, 128>}, {transform_indices = @transform_4, window_bounds = array<i64: 1, 2, 512>}]} {
    %c0 = arith.constant 0 : index
    %c0_0 = arith.constant 0 : index
    %0 = vector.load %arg1[%c0, %c0_0] : memref<512x128xf32, #tpu.memory_space<vmem>>, vector<512x128xf32>
    %c0_1 = arith.constant 0 : index
    %c0_2 = arith.constant 0 : index
    %1 = vector.load %arg2[%c0_1, %c0_2] : memref<128x128xf32, #tpu.memory_space<vmem>>, vector<128x128xf32>
    %cst = arith.constant dense<0.000000e+00> : vector<512x128xf32>
    %2 = tpu.matmul %0, %1, %cst {dimension_numbers = #tpu.dot_dimension_numbers<[1], [0], [0], [1], [0, 0, 1, 1], [], []>, precision = #tpu.contract_precision<fp32>} : vector<512x128xf32>, vector<128x128xf32>, vector<512x128xf32> -> vector<512x128xf32>
    %c0_3 = arith.constant 0 : index
    %c0_4 = arith.constant 0 : index
    %3 = vector.load %arg3[%c0_3, %c0_4] : memref<1x128xf32, #tpu.memory_space<vmem>>, vector<1x128xf32>
    %4 = vector.broadcast %3 : vector<1x128xf32> to vector<512x128xf32>
    %5 = arith.addf %2, %4 : vector<512x128xf32>
    %6 = tpu.iota {dimensions = array<i32: 1>} : vector<512x128xi32>
    %cst_5 = arith.constant 0.707106769 : f32
    %7 = vector.broadcast %cst_5 : f32 to vector<512x128xf32>
    %8 = arith.mulf %5, %7 : vector<512x128xf32>
    %9 = math.erf %8 : vector<512x128xf32>
    %cst_6 = arith.constant 1.000000e+00 : f32
    %10 = vector.broadcast %cst_6 : f32 to vector<512x128xf32>
    %11 = arith.addf %10, %9 : vector<512x128xf32>
    %cst_7 = arith.constant 5.000000e-01 : f32
    %12 = vector.broadcast %cst_7 : f32 to vector<512x128xf32>
    %13 = arith.mulf %12, %11 : vector<512x128xf32>
    %c63_i32 = arith.constant 63 : i32
    %14 = vector.broadcast %c63_i32 : i32 to vector<512x128xi32>
    %15 = arith.andi %6, %14 : vector<512x128xi32>
    %c32_i32 = arith.constant 32 : i32
    %16 = vector.broadcast %c32_i32 : i32 to vector<512x128xi32>
    %17 = arith.cmpi slt, %15, %16 : vector<512x128xi32>
    %cst_8 = arith.constant 1.000000e+00 : f32
    %18 = vector.broadcast %cst_8 : f32 to vector<512x128xf32>
    %19 = arith.select %17, %13, %18 : vector<512x128xi1>, vector<512x128xf32>
    %20 = arith.mulf %5, %19 : vector<512x128xf32>
    %c0_9 = arith.constant 0 : index
    %c0_10 = arith.constant 0 : index
    %21 = vector.load %arg4[%c0_9, %c0_10] : memref<8x128xf32, #tpu.memory_space<vmem>>, vector<8x128xf32>
    %cst_11 = arith.constant dense<0.000000e+00> : vector<8x512xf32>
    %22 = tpu.matmul %21, %20, %cst_11 {dimension_numbers = #tpu.dot_dimension_numbers<[1], [1], [0], [0], [0, 0, 1, 0], [], []>, precision = #tpu.contract_precision<fp32>} : vector<8x128xf32>, vector<512x128xf32>, vector<8x512xf32> -> vector<8x512xf32>
    %23 = vector.extract_strided_slice %22 {offsets = [0, 0], sizes = [2, 512], strides = [1, 1]} : vector<8x512xf32> to vector<2x512xf32>
    %c0_12 = arith.constant 0 : index
    %c0_13 = arith.constant 0 : index
    %c0_14 = arith.constant 0 : index
    %24 = vector.load %arg5[%c0_12, %c0_13, %c0_14] : memref<1x2x512xf32, #tpu.memory_space<vmem>>, vector<1x2x512xf32>
    %25 = vector.shape_cast %24 : vector<1x2x512xf32> to vector<2x512xf32>
    %26 = vector.shape_cast %23 : vector<2x512xf32> to vector<1x2x512xf32>
    tpu.vector_store %arg5[%c0_12, %c0_13, %c0_14], %26 {strides = array<i32>} : memref<1x2x512xf32, #tpu.memory_space<vmem>>, vector<1x2x512xf32>,
    return
  }
  func.func @transform_0(%arg0: i32) -> (i32, i32) {
    %c0_i32 = arith.constant 0 : i32
    %c0_i32_0 = arith.constant 0 : i32
    return %arg0, %c0_i32 : i32, i32
  }
  func.func @transform_1(%arg0: i32) -> (i32, i32) {
    %c0_i32 = arith.constant 0 : i32
    %c0_i32_0 = arith.constant 0 : i32
    %c0_i32_1 = arith.constant 0 : i32
    return %c0_i32, %c0_i32_0 : i32, i32
  }
  func.func @transform_2(%arg0: i32) -> (i32, i32) {
    %c0_i32 = arith.constant 0 : i32
    %c0_i32_0 = arith.constant 0 : i32
    %c0_i32_1 = arith.constant 0 : i32
    return %c0_i32, %c0_i32_0 : i32, i32
  }
  func.func @transform_3(%arg0: i32) -> (i32, i32) {
    %c0_i32 = arith.constant 0 : i32
    %c0_i32_0 = arith.constant 0 : i32
    %c0_i32_1 = arith.constant 0 : i32
    return %c0_i32, %c0_i32_0 : i32, i32
  }
  func.func @transform_4(%arg0: i32) -> (i32, i32, i32) {
    %c0_i32 = arith.constant 0 : i32
    %c0_i32_0 = arith.constant 0 : i32
    %c0_i32_1 = arith.constant 0 : i32
    return %arg0, %c0_i32, %c0_i32_0 : i32, i32, i32
  }
}

</mosaic_0001>

<bundles_post_ra>
// kernel: tpu_custom_call.1
= control target key start
LH: loop header
LB: loop body
LE: loop exit
PB: predicated region body
PF: predicated region fallthrough
CT: control target
= control target key end

     0   :  { %9 = vsyncpa [#allocation3], 0  ;;  %s11830_s0 = inlined_call_operand.hbm [shape: f32[1040,128], index: 0, kind: input, shape index: {}]   ;;  %s11831_s1 = inlined_call_operand.hbm [shape: f32[128,128], index: 1, kind: input, shape index: {}]   ;;  %s11832_s2 = inlined_call_operand.vmem [shape: f32[1,128], index: 2, kind: input, shape index: {}]   ;;  %s11833_s3 = inlined_call_operand.hbm [shape: f32[8,128], index: 3, kind: input, shape index: {}]   ;;  %s11834_s4 = inlined_call_operand.hbm [shape: f32[2,2,512], index: 4, kind: output, shape index: {}]  }
   0x1   :  { %11 = vsyncpa [#allocation3 + $0x1], 0 }
   0x2   :  { %12 = vsyncpa [#allocation6], 0 }
   0x3   :  { %13 = vsyncpa [#allocation4], 0 }
   0x4   :  { %15 = vsyncpa [#allocation4 + $0x1], 0  ;;  %s7974_s15 = smov 0   ;;  %s7976_s16 = smov 0  }
   0x5   :  { %s7978_s17 = smov 0   ;;  %s7980_s18 = smov 0  }
   0x6 LB: > { %s7995_s19 = sadd.s32 4294967295, %s7938_s18   ;;  %s5917_s20 = sadd.s32 4294967294, %s7938_s18   ;;  %s7938_s18 = sphi %s7980_s18, %s13059_s18   ;;  %s7934_s17 = sphi %s7978_s17, %s13058_s17   ;;  %s7930_s16 = sphi %s7976_s16, %s13057_s16   ;;  %s7926_s15 = sphi %s7974_s15, %s13056_s15  }
   0x7   : > { %s7999_s21 = sadd.s32 1, %s7938_s18   ;;  %s28_s22 = sadd.s32 1, %s7934_s17 }
   0x8   : > { %s25_s23 = ssub.s32 %s7938_s18, %s7999_s21  ;;  %p35_p0 = scmp.ne.s32.totalorder %s7934_s17, %s7930_s16 }
   0x9   : > { %p26_p1 = scmp.eq.s32.totalorder %s25_s23, 0  ;;  %p36_p2 = scmp.eq.s32.totalorder %s7938_s18, 0 }
   0xa   : > { %p41_p3 = scmp.ne.s32.totalorder %s7930_s16, %s7926_s15  ;;  %p11835_p4 = scmp.eq.s32.totalorder %s7995_s19, 0 }
   0xb   : > { %s8011_s24 = scalar_select %p26_p1, %s7934_s17, %s28_s22  }
   0xc   : > { %p8013_p5 = por %p36_p2, %p35_p0  ;;  %p8019_p6 = por %p11835_p4, %p41_p3 }
   0xd   : > { %p128_p7 = scmp.eq.s32.totalorder %s7995_s19, 1  ;;  %p134_p8 = scmp.eq.s32.totalorder %s5917_s20, 1 }
   0xe   : > { %s12225_s26 = scalar_select %p8019_p6, 1, 0 }
   0xf   : > { %p5918_p9 = scmp.ge.s32.totalorder %s7938_s18, 1  ;;  %p141_p10 = scmp.lt.s32.totalorder %s7938_s18, 3 }
  0x10   : > { %p8026_p11 = por %p128_p7, %p35_p0  ;;  %p8030_p12 = por %p134_p8, %p41_p3 }
  0x11   : > { %p8034_p13 = pnand %p5918_p9, %p141_p10  ;;  %s7940_s30 = smov [#allocation5]  }
  0x12   : > { %s12226_s27 = scalar_select %p8026_p11, 1, 0 }
  0x13   : > { %s12227_s28 = scalar_select %p8030_p12, 1, 0 }
  0x14   : > { %p7609_p1 = pneg %p8034_p13  ;;  %s153_s5 = sshll.u32 %s7940_s30, 4  ;;  %s154_s5 = int_to_ptr.vmem [resolvable:$true] %s153_s5 }
  0x15   : > { %s7941_s7 = smov [#allocation7]   ;;  %s7803_s9 = scalar_lea.vmem %s154_s5, 2048 }
  0x16   : > { %p8042_p2 = pnand %p7609_p1, %p11835_p4  ;;  %s170_s8 = sshll.u32 %s7941_s7, 4  ;;  %s171_s8 = int_to_ptr.vmem [resolvable:$true] %s170_s8 }
  0x17   : > { %p7804_p3 = scmp.ne.s32.totalorder %s154_s5, %s7803_s9  ;;  %p7811_p9 = scmp.lt.s32.totalorder %s154_s5, %s154_s5 }
  0x18   : > { %p7794_p0 = pneg %p8042_p2  ;;  %p7812_p10 = scmp.lt.s32.totalorder %s7803_s9, %s7803_s9 }
  0x1a   : > { %p7806_p7 = pnand %p7804_p3, %p7794_p0  ;;  %p7813_p12 = por %p7812_p10, %p7811_p9 }
  0x1c   : > { %p7807_p8 = pneg %p7806_p7 }
  0x1e   : > { %p7814_p1 = pnand %p7813_p12, %p7807_p8 }
  0x20   : > { %7817 = shalt.err (!%p7814_p1)
}
  0x21   : > { %s7942_s10 = smov 128   ;;  %s7943_s11 = smov 8  }
  0x22   : > { %7612 = dma.hbm_to_vmem [thread:$0]  (!%p8042_p2), %s11831_s1, 2048, %s154_s5, [#allocation6], %s7942_s10, %s7942_s10, %s7943_s11  }
  0x23   : > { %s7829_s14 = scalar_lea.vmem %s171_s8, 128  ;;  %p7837_p11 = scmp.lt.s32.totalorder %s171_s8, %s171_s8 }
  0x24   : > { %p7830_p4 = scmp.ne.s32.totalorder %s171_s8, %s7829_s14  ;;  %p7838_p6 = scmp.lt.s32.totalorder %s7829_s14, %s7829_s14 }
  0x26   : > { %p7832_p3 = pnand %p7830_p4, %p7794_p0  ;;  %p7839_p9 = por %p7838_p6, %p7837_p11 }
  0x28   : > { %p7833_p7 = pneg %p7832_p3 }
  0x2a   : > { %p7840_p12 = pnand %p7839_p9, %p7833_p7 }
  0x2c   : > { %7843 = shalt.err (!%p7840_p12)
}
  0x2d   : > { %7615 = dma.hbm_to_vmem [thread:$0]  (!%p8042_p2), %s11833_s3, 128, %s171_s8, [#allocation6]  }
  0x2e   : > { %p5921_p8 = scmp.ge.s32.totalorder %s7938_s18, 2 }
  0x30   : > { %177 = sbr.rel (%p5921_p8) target bundleno = 85 (0x55), region = 28 }
  0x35   : > { %180 = sbr.rel (!%p8013_p5) target bundleno = 85 (0x55), region = 32  ;;  %s181_s23 = sand.u32 (%p8013_p5), 1, %s7934_s17  }
  0x36   : > { %s5923_s30 = sshll.u32 (%p8013_p5), %s7938_s18, 6  ;;  %s5922_s5 = sshll.u32 (%p8013_p5), %s181_s23, 9 }
  0x37   : > { %s187_s7 = ssub.s32 (%p8013_p5), 130, %s5923_s30  ;;  %s8074_s9 = scalar_lea.sflag (%p8013_p5), [#allocation3], %s181_s23 }
  0x38   : > { %p188_p4 = scmp.lt.s32.totalorder (%p8013_p5), %s187_s7, 64  ;;  %s185_s10 = scalar_lea.vmem (%p8013_p5), [#allocation2], %s5922_s5 }
  0x3a   : > { %s13061_s7 = smov (!%p188_p4, %s187_s7), 64 }
  0x3b   : > { %s8071_s6 = sshll.u32 %s13061_s7, 7 }
  0x3c   : > { %s192_s8 = ssub.s32 8192, %s8071_s6 }
  0x3d   : > { %193 = vsyncadd %s8074_s9, %s192_s8  ;;  %p5925_p5 = scmp.ne.s32.totalorder %s8071_s6, 0  ;;  %s5940_s25 = sshll.u32 %s7938_s18, 13 }
  0x3e   : > { %s8082_s13 = scalar_lea.hbm %s11830_s0, %s5940_s25  ;;  %s198_s14 = sshll.u32 %s185_s10, 4  ;;  %s8084_s14 = int_to_ptr.vmem [resolvable:$true] %s198_s14 }
  0x3f   : > { %s7844_s20 = scalar_lea.hbm %s8082_s13, %s8071_s6  ;;  %s7848_s30 = scalar_lea.hbm %s11830_s0, 16640 }
  0x40   : > { %p7845_p6 = scmp.ne.s32.totalorder %s8082_s13, %s7844_s20  ;;  %p7849_p0 = scmp.lt.s32.totalorder %s8082_s13, %s11830_s0 }
  0x41   : > { %p7850_p10 = scmp.lt.s32.totalorder %s7848_s30, %s7844_s20 }
  0x42   : > { %p7846_p11 = pnand %p7845_p6, %p5925_p5 }
  0x43   : > { %p7851_p1 = por %p7850_p10, %p7849_p0 }
  0x44   : > { %p7847_p2 = pneg %p7846_p11 }
  0x46   : > { %p7852_p3 = pnand %p7851_p1, %p7847_p2 }
  0x48   : > { %7855 = shalt.err (!%p7852_p3)
}
  0x49   : > { %s7856_s8 = scalar_lea.vmem %s8084_s14, %s8071_s6  ;;  %s7944_s10 = smov [#allocation2]  }
  0x4a   : > { %p7857_p7 = scmp.ne.s32.totalorder %s8084_s14, %s7856_s8  ;;  %s7860_s25 = sshll.u32 %s7944_s10, 4  ;;  %s7861_s25 = int_to_ptr.vmem [resolvable:$false] %s7860_s25 }
  0x4b   : > { %s7862_s11 = scalar_lea.vmem %s7861_s25, 16384  ;;  %p7863_p4 = scmp.lt.s32.totalorder %s8084_s14, %s7861_s25 }
  0x4c   : > { %p7858_p9 = pnand %p7857_p7, %p5925_p5  ;;  %p7864_p6 = scmp.lt.s32.totalorder %s7862_s11, %s7856_s8 }
  0x4e   : > { %p7859_p12 = pneg %p7858_p9  ;;  %p7865_p11 = por %p7864_p6, %p7863_p4 }
  0x50   : > { %p7866_p0 = pnand %p7865_p11, %p7859_p12 }
  0x52   : > { %7869 = shalt.err (!%p7866_p0)
}
  0x53   : > { %s7945_s12 = smov 128   ;;  %s7946_s20 = smov 8  }
  0x54   : > { %204 = dma.hbm_to_vmem [thread:$0]  (%p5925_p5), %s8082_s13, %s8071_s6, %s8084_s14, %s8074_s9, %s7945_s12, %s7945_s12, %s7946_s20  }
  0x55 PF: > { %210 = sbr.rel (%p8034_p13) target bundleno = 1334 (0x536), region = 36 }
  0x5a   : > { %s8113_s22 = sand.u32 1, %s7930_s16   ;;  %p12230_p2 = scmp.ne.s32.totalorder %s12225_s26, 0 }
  0x5b   : > { %s5930_s23 = sshll.u32 %s8113_s22, 9  ;;  %s213_s30 = scalar_lea.sflag [#allocation3], %s8113_s22 }
  0x5c   : > { %s8117_s5 = scalar_lea.vmem [#allocation2], %s5930_s23 }
  0x5d   : > { %7913 = dma.done.wait (%p12230_p2), %s213_s30, 8192  }
  0x5e   : > { %7915 = vsyncadd (%p12230_p2), %s213_s30, 4294959104  ;;  %p12231_p5 = scmp.eq.s32.totalorder %s7995_s19, 0 }
  0x60   : > { %7917 = dma.done.wait (%p12231_p5), [#allocation6], 2176   ;;  %p12232_p13 = pmov %p12231_p5 }
  0x61   : > { %v333_v0 = vld [vmem:[#allocation5 + $0x78] sm:$0xff]  ;;  %v332_v1 = vld [vmem:[#allocation5 + $0x70] sm:$0xff]  ;;  %v331_v2 = vld [vmem:[#allocation5 + $0x68] sm:$0xff]  ;;  %s5933_s6 = sshll.u32 %s8113_s22, 3  ;;  %s5941_s9 = sshll.u32 %s7995_s19, 7 }
  0x62   : > { %7919 = vsyncadd (%p12232_p13), [#allocation6], 4294965120  ;;  %v8127_v3 = vand.u32 4294901760, %v333_v0  ;;  %v8129_v4 = vand.u32 4294901760, %v332_v1  ;;  %v8131_v5 = vand.u32 4294901760, %v331_v2  ;;  %v330_v6 = vld [vmem:[#allocation5 + $0x60] sm:$0xff]  ;;  %s5826_s10 = scalar_lea.hbm %s11834_s4, %s5941_s9 }
  0x63   : > { %v329_v7 = vld [vmem:[#allocation5 + $0x58] sm:$0xff]  ;;  %v328_v8 = vld [vmem:[#allocation5 + $0x50] sm:$0xff]  ;;  %v8133_v9 = vand.u32 4294901760, %v330_v6  ;;  %v327_v12 = vld [vmem:[#allocation5 + $0x48] sm:$0xff]  ;;  %s248_s13 = scalar_lea.vmem [#allocation8], %s5933_s6  ;;  %s5814_s25 = scalar_lea.sflag [#allocation4], %s8113_s22 }
  0x64   : > { %v8135_v10 = vand.u32 4294901760, %v329_v7  ;;  %v8137_v11 = vand.u32 4294901760, %v328_v8  ;;  %v326_v13 = vld [vmem:[#allocation5 + $0x40] sm:$0xff]  ;;  %6830 = vmatprep.subr.mxu0 %v8127_v3  ;;  %v8141_v14 = vsub.f32 %v333_v0, %v8127_v3  ;;  %v8144_v15 = vsub.f32 %v332_v1, %v8129_v4  ;;  %v325_v18 = vld [vmem:[#allocation5 + $0x38] sm:$0xff]  ;;  %v324_v25 = vld [vmem:[#allocation5 + $0x30] sm:$0xff]  ;;  %s5828_s14 = sshll.u32 %s248_s13, 4  ;;  %s5829_s14 = int_to_ptr.vmem [resolvable:$true] %s5828_s14 }
  0x65   : > { %v8146_v16 = vand.u32 4294901760, %v327_v12  ;;  %v8149_v17 = vsub.f32 %v331_v2, %v8131_v5  ;;  %6831 = vmatpush3.msra.mxu0 %v8127_v3  ;;  %v8153_v19 = vsub.f32 %v330_v6, %v8133_v9  ;;  %v8168_v24 = vand.u32 4294901760, %v326_v13  ;;  %v323_v35 = vld [vmem:[#allocation5 + $0x28] sm:$0xff]  ;;  %v322_v40 = vld [vmem:[#allocation5 + $0x20] sm:$0xff]  ;;  %v321_v41 = vld [vmem:[#allocation5 + $0x18] sm:$0xff]  ;;  %s7870_s11 = scalar_lea.vmem %s5829_s14, 128 }
  0x66   : > { %v8156_v20 = vsub.f32 %v329_v7, %v8135_v10  ;;  %6832 = vmatprep.subr.mxu0 %v8129_v4  ;;  %v8160_v21 = vand.u32 4294901760, %v8141_v14  ;;  %v8163_v22 = vand.u32 4294901760, %v8144_v15  ;;  %v8174_v27 = vand.u32 4294901760, %v325_v18  ;;  %v254_v48 = vld [vmem:[%s8117_s5] sm:$0xff]  ;;  %v255_v52 = vld [vmem:[%s8117_s5 + $0x8] sm:$0xff]  ;;  %v320_v58 = vld [vmem:[#allocation5 + $0x10] sm:$0xff]  ;;  %p7871_p10 = scmp.ne.s32.totalorder %s5829_s14, %s7870_s11 }
  0x67   : > { %v8166_v23 = vand.u32 4294901760, %v8149_v17  ;;  %6833 = vmatpush3.msra.mxu0 %v8129_v4  ;;  %v8172_v26 = vand.u32 4294901760, %v8153_v19  ;;  %v8180_v29 = vsub.f32 %v328_v8, %v8137_v11  ;;  %v8190_v33 = vsub.f32 %v327_v12, %v8146_v16  ;;  %v319_v62 = vld [vmem:[#allocation5 + $0x8] sm:$0xff]  ;;  %v256_v6 = vld [vmem:[%s8117_s5 + $0x10] sm:$0xff]  ;;  %p13054_p1 = scmp.ne.s32.totalorder %s12226_s27, 0  ;;  %s7948_s12 = smov [#allocation8]  }
  0x68   : > { %12233 = vst [vmem:[#allocation12_spill] sm:$0xff] %v8160_v21  ;;  %12234 = vst [vmem:[#allocation13_spill] sm:$0xff] %v8163_v22  ;;  %v8177_v28 = vand.u32 4294901760, %v8156_v20  ;;  %6834 = vmatprep.subr.mxu0 %v8131_v5  ;;  %v1066_v30 = vsub.f32 %v8141_v14, %v8160_v21  ;;  %v1073_v31 = vsub.f32 %v8144_v15, %v8163_v22  ;;  %v8193_v34 = vand.u32 4294901760, %v324_v25  ;;  %v263_v21 = vld [vmem:[%s8117_s5 + $0x48] sm:$0xff]  ;;  %s7874_s20 = sshll.u32 %s7948_s12, 4  ;;  %s7875_s20 = int_to_ptr.vmem [resolvable:$false] %s7874_s20 }
  0x69   : > { %12235 = vst [vmem:[#allocation14_spill] sm:$0xff] %v8166_v23  ;;  %12236 = vst [vmem:[#allocation15_spill] sm:$0xff] %v8172_v26  ;;  %v1080_v32 = vsub.f32 %v8149_v17, %v8166_v23  ;;  %6835 = vmatpush3.msra.mxu0 %v8131_v5  ;;  %v1087_v38 = vsub.f32 %v8153_v19, %v8172_v26  ;;  %v8199_v39 = vand.u32 4294901760, %v8180_v29  ;;  %v8205_v43 = vand.u32 4294901760, %v8190_v33  ;;  %p7872_p3 = pnand %p7871_p10, %p13054_p1  ;;  %s7876_s19 = scalar_lea.vmem %s7875_s20, 256 }
  0x6a   : > { %12237 = vst [vmem:[#allocation16_spill] sm:$0xff] %v8177_v28  ;;  %6836 = vmatprep.subr.mxu0 %v8133_v9  ;;  %v1067_v36 = vand.u32 4294901760, %v1066_v30  ;;  %v1074_v37 = vand.u32 4294901760, %v1073_v31  ;;  %v1094_v42 = vsub.f32 %v8156_v20, %v8177_v28  ;;  %v8208_v44 = vsub.f32 %v326_v13, %v8168_v24  ;;  %p7877_p9 = scmp.lt.s32.totalorder %s5829_s14, %s7875_s20  ;;  %p7878_p12 = scmp.lt.s32.totalorder %s7876_s19, %s7870_s11 }
  0x6b   : > { %12238 = vst [vmem:[#allocation17_spill] sm:$0xff] %v8199_v39  ;;  %6837 = vmatpush3.msra.mxu0 %v8133_v9  ;;  %12239 = vst [vmem:[#allocation18_spill] sm:$0xff] %v8205_v43  ;;  %v1081_v45 = vand.u32 4294901760, %v1080_v32  ;;  %v8211_v46 = vand.u32 4294901760, %v323_v35  ;;  %v8214_v47 = vsub.f32 %v325_v18, %v8174_v27  ;;  %v8218_v49 = vand.u32 4294901760, %v322_v40  ;;  %v257_v18 = vld [vmem:[%s8117_s5 + $0x18] sm:$0xff]  ;;  %p7873_p7 = pneg %p7872_p3 }
  0x6c   : > { %6838 = vmatprep.subr.mxu0 %v8135_v10  ;;  %6958 = vmatprep.subr.mxu1 %v1067_v36  ;;  %v8220_v50 = vand.u32 4294901760, %v321_v41  ;;  %v8223_v51 = vsub.f32 %v324_v25, %v8193_v34  ;;  %v1088_v53 = vand.u32 4294901760, %v1087_v38  ;;  %v1101_v54 = vsub.f32 %v8180_v29, %v8199_v39  ;;  %p7879_p4 = por %p7878_p12, %p7877_p9 }
  0x6d   : > { %6839 = vmatpush3.msra.mxu0 %v8135_v10  ;;  %6959 = vmatpush3.msra.mxu1 %v1067_v36  ;;  %v8230_v55 = vand.u32 4294901760, %v8208_v44  ;;  %v1095_v56 = vand.u32 4294901760, %v1094_v42  ;;  %v1108_v57 = vsub.f32 %v8190_v33, %v8205_v43  ;;  %v8235_v59 = vand.u32 4294901760, %v254_v48 }
  0x6e   : > { %6840 = vmatprep.subr.mxu0 %v8137_v11  ;;  %6960 = vmatprep.subr.mxu1 %v1074_v37  ;;  %v8239_v60 = vand.u32 4294901760, %v8214_v47  ;;  %v8242_v61 = vand.u32 4294901760, %v8223_v51  ;;  %v8245_v63 = vsub.f32 %v323_v35, %v8211_v46  ;;  %v8247_v0 = vand.u32 4294901760, %v255_v52  ;;  %p7880_p6 = pnand %p7879_p4, %p7873_p7 }
  0x6f   : > { %12240 = vst [vmem:[#allocation19_spill] sm:$0xff] %v8230_v55  ;;  %6841 = vmatpush3.msra.mxu0 %v8137_v11  ;;  %6961 = vmatpush3.msra.mxu1 %v1074_v37  ;;  %12241 = vst [vmem:[#allocation20_spill] sm:$0xff] %v8235_v59  ;;  %v8251_v1 = vsub.f32 %v322_v40, %v8218_v49  ;;  %v8254_v2 = vsub.f32 %v321_v41, %v8220_v50  ;;  %v1102_v7 = vand.u32 4294901760, %v1101_v54  ;;  %v318_v37 = vld [vmem:[#allocation5] sm:$0xff] }
  0x70   : > { %6842 = vmatprep.subr.mxu0 %v8146_v16  ;;  %6962 = vmatprep.subr.mxu1 %v1081_v45  ;;  %12242 = vst [vmem:[#allocation21_spill] sm:$0xff] %v8239_v60  ;;  %12243 = vst [vmem:[#allocation22_spill] sm:$0xff] %v8242_v61  ;;  %v1115_v8 = vsub.f32 %v8208_v44, %v8230_v55  ;;  %v8260_v12 = vand.u32 4294901760, %v320_v58  ;;  %v8263_v13 = vsub.f32 %v254_v48, %v8235_v59 }
  0x71   : > { %12244 = vst [vmem:[#allocation23_spill] sm:$0xff] %v8247_v0  ;;  %6843 = vmatpush3.msra.mxu0 %v8146_v16  ;;  %6963 = vmatpush3.msra.mxu1 %v1081_v45  ;;  %12245 = vst [vmem:[#allocation24_spill] sm:$0xff] %v8254_v2  ;;  %v1109_v25 = vand.u32 4294901760, %v1108_v57  ;;  %v8267_v30 = vand.u32 4294901760, %v319_v62  ;;  %v8270_v31 = vsub.f32 %v255_v52, %v8247_v0  ;;  %v8278_v36 = vand.u32 4294901760, %v8245_v63  ;;  %v258_v45 = vld [vmem:[%s8117_s5 + $0x20] sm:$0xff] }
  0x72   : > { %6844 = vmatprep.subr.mxu0 %v8168_v24  ;;  %6964 = vmatprep.subr.mxu1 %v1088_v53  ;;  %12246 = vst [vmem:[#allocation25_spill] sm:$0xff] %v8260_v12  ;;  %12247 = vst [vmem:[#allocation26_spill] sm:$0xff] %v8263_v13  ;;  %v1122_v32 = vsub.f32 %v8214_v47, %v8239_v60  ;;  %v1129_v35 = vsub.f32 %v8223_v51, %v8242_v61  ;;  %v8280_v38 = vand.u32 4294901760, %v256_v6 }
  0x73   : > { %6845 = vmatpush3.msra.mxu0 %v8168_v24  ;;  %6965 = vmatpush3.msra.mxu1 %v1088_v53  ;;  %12248 = vst [vmem:[#allocation27_spill] sm:$0xff] %v8267_v30  ;;  %12249 = vst [vmem:[#allocation28_spill] sm:$0xff] %v8270_v31  ;;  %v8284_v40 = vand.u32 4294901760, %v8251_v1  ;;  %v8287_v41 = vand.u32 4294901760, %v8254_v2  ;;  %v8289_v42 = vand.u32 4294901760, %v257_v18  ;;  %v1116_v48 = vand.u32 4294901760, %v1115_v8 }
  0x74   : > { %6846 = vmatprep.subr.mxu0 %v8174_v27  ;;  %6966 = vmatprep.subr.mxu1 %v1095_v56  ;;  %12250 = vst [vmem:[#allocation29_spill] sm:$0xff] %v8278_v36  ;;  %12251 = vst [vmem:[#allocation30_spill] sm:$0xff] %v8280_v38  ;;  %v8295_v53 = vsub.f32 %v320_v58, %v8260_v12  ;;  %v8298_v54 = vsub.f32 %v256_v6, %v8280_v38  ;;  %v8302_v57 = vand.u32 4294901760, %v318_v37  ;;  %v260_v58 = vld [vmem:[%s8117_s5 + $0x30] sm:$0xff] }
  0x75   : > { %6847 = vmatpush3.msra.mxu0 %v8174_v27  ;;  %6967 = vmatpush3.msra.mxu1 %v1095_v56  ;;  %12252 = vst [vmem:[#allocation31_spill] sm:$0xff] %v8284_v40  ;;  %12253 = vst [vmem:[#allocation32_spill] sm:$0xff] %v8287_v41  ;;  %v259_v56 = vld [vmem:[%s8117_s5 + $0x28] sm:$0xff]  ;;  %v8306_v60 = vsub.f32 %v257_v18, %v8289_v42  ;;  %v8309_v8 = vsub.f32 %v319_v62, %v8267_v30  ;;  %v1123_v6 = vand.u32 4294901760, %v1122_v32  ;;  %v261_v32 = vld [vmem:[%s8117_s5 + $0x38] sm:$0xff] }
  0x76   : > { %12254 = vst [vmem:[#allocation33_spill] sm:$0xff] %v8289_v42  ;;  %6848 = vmatprep.subr.mxu0 %v8193_v34  ;;  %6968 = vmatprep.subr.mxu1 %v1102_v7  ;;  %12255 = vst [vmem:[#allocation34_spill] sm:$0xff] %v8295_v53  ;;  %v1130_v52 = vand.u32 4294901760, %v1129_v35  ;;  %v8315_v55 = vand.u32 4294901760, %v258_v45  ;;  %v1143_v18 = vsub.f32 %v8251_v1, %v8284_v40  ;;  %v8323_v43 = vand.u32 4294901760, %v259_v56 }
  0x77   : > { %12256 = vst [vmem:[#allocation35_spill] sm:$0xff] %v8298_v54  ;;  %6849 = vmatpush3.msra.mxu0 %v8193_v34  ;;  %6969 = vmatpush3.msra.mxu1 %v1102_v7  ;;  %12257 = vst [vmem:[#allocation36_spill] sm:$0xff] %v8302_v57  ;;  %v1136_v7 = vsub.f32 %v8245_v63, %v8278_v36  ;;  %v1150_v62 = vsub.f32 %v8254_v2, %v8287_v41  ;;  %v12262_v35 = vand.u32 4294901760, %v8263_v13 }
  0x78   : > { %12258 = vst [vmem:[#allocation37_spill] sm:$0xff] %v8306_v60  ;;  %12259 = vst [vmem:[#allocation38_spill] sm:$0xff] %v8309_v8  ;;  %6850 = vmatprep.subr.mxu0 %v8211_v46  ;;  %6970 = vmatprep.subr.mxu1 %v1109_v25  ;;  %v8334_v40 = vsub.f32 %v258_v45, %v8315_v55  ;;  %v8336_v41 = vand.u32 4294901760, %v260_v58  ;;  %v12266_v61 = vand.u32 4294901760, %v8270_v31  ;;  %v262_v45 = vld [vmem:[%s8117_s5 + $0x40] sm:$0xff]  ;;  %v8354_v22 = vand.u32 4294901760, %v261_v32 }
  0x79   : > { %12260 = vst [vmem:[#allocation39_spill] sm:$0xff] %v8315_v55  ;;  %6851 = vmatpush3.msra.mxu0 %v8211_v46  ;;  %6971 = vmatpush3.msra.mxu1 %v1109_v25  ;;  %12261 = vst [vmem:[#allocation40_spill] sm:$0xff] %v8323_v43  ;;  %v425_v36 = vsub.f32 %v8263_v13, %v12262_v35  ;;  %v8331_v25 = vand.u32 4294901760, %v8295_v53  ;;  %v8344_v35 = vand.u32 4294901760, %v8309_v8  ;;  %v1137_v23 = vand.u32 4294901760, %v1136_v7  ;;  %v264_v7 = vld [vmem:[%s8117_s5 + $0x50] sm:$0xff] }
  0x7a   : > { %6852 = vmatprep.subr.mxu0 %v8218_v49  ;;  %6972 = vmatprep.subr.mxu1 %v1116_v48  ;;  %12264 = vst [vmem:[#allocation42_spill] sm:$0xff] %v8334_v40  ;;  %12265 = vst [vmem:[#allocation43_spill] sm:$0xff] %v8336_v41  ;;  %v435_v39 = vsub.f32 %v8270_v31, %v12266_v61  ;;  %v8347_v26 = vsub.f32 %v318_v37, %v8302_v57  ;;  %v1144_v61 = vand.u32 4294901760, %v1143_v18 }
  0x7b   : > { %12263 = vst [vmem:[#allocation41_spill] sm:$0xff] %v8331_v25  ;;  %6853 = vmatpush3.msra.mxu0 %v8218_v49  ;;  %6973 = vmatpush3.msra.mxu1 %v1116_v48  ;;  %12267 = vst [vmem:[#allocation44_spill] sm:$0xff] %v8344_v35  ;;  %v8352_v48 = vsub.f32 %v259_v56, %v8323_v43  ;;  %v12269_v28 = vand.u32 4294901760, %v8298_v54  ;;  %v8362_v13 = vsub.f32 %v260_v58, %v8336_v41 }
  0x7c   : > { %6854 = vmatprep.subr.mxu0 %v8220_v50  ;;  %6974 = vmatprep.subr.mxu1 %v1123_v6  ;;  %12268 = vst [vmem:[#allocation45_spill] sm:$0xff] %v8354_v22  ;;  %v426_v56 = vand.u32 4294901760, %v425_v36  ;;  %v1151_v2 = vand.u32 4294901760, %v1150_v62  ;;  %v8369_v18 = vand.u32 4294901760, %v262_v45  ;;  %v12272_v58 = vand.u32 4294901760, %v8306_v60 }
  0x7d   : > { %6855 = vmatpush3.msra.mxu0 %v8220_v50  ;;  %6975 = vmatpush3.msra.mxu1 %v1123_v6  ;;  %v445_v31 = vsub.f32 %v8298_v54, %v12269_v28  ;;  %12270 = vst [vmem:[#allocation46_spill] sm:$0xff] %v8362_v13  ;;  %v1157_v6 = vsub.f32 %v8295_v53, %v8331_v25  ;;  %v436_v28 = vand.u32 4294901760, %v435_v39  ;;  %v8378_v36 = vand.u32 4294901760, %v8347_v26  ;;  %v266_v53 = vld [vmem:[%s8117_s5 + $0x60] sm:$0xff] }
  0x7e   : > { %6856 = vmatprep.subr.mxu0 %v8260_v12  ;;  %6976 = vmatprep.subr.mxu1 %v1130_v52  ;;  %12271 = vst [vmem:[#allocation47_spill] sm:$0xff] %v8369_v18  ;;  %v455_v37 = vsub.f32 %v8306_v60, %v12272_v58  ;;  %v1164_v54 = vsub.f32 %v8309_v8, %v8344_v35  ;;  %v8385_v39 = vand.u32 4294901760, %v263_v21  ;;  %v265_v58 = vld [vmem:[%s8117_s5 + $0x58] sm:$0xff]  ;;  %v12276_v60 = vand.u32 4294901760, %v8334_v40 }
  0x7f   : > { %6857 = vmatpush3.msra.mxu0 %v8260_v12  ;;  %6977 = vmatpush3.msra.mxu1 %v1130_v52  ;;  %12273 = vst [vmem:[#allocation48_spill] sm:$0xff] %v8378_v36  ;;  %v8383_v25 = vsub.f32 %v261_v32, %v8354_v22  ;;  %v8387_v52 = vand.u32 4294901760, %v264_v7  ;;  %v446_v35 = vand.u32 4294901760, %v445_v31  ;;  %v8396_v62 = vsub.f32 %v262_v45, %v8369_v18 }
  0x80   : > { %6858 = vmatprep.subr.mxu0 %v8267_v30  ;;  %6978 = vmatprep.subr.mxu1 %v1137_v23  ;;  %12274 = vst [vmem:[#allocation49_spill] sm:$0xff] %v8385_v39  ;;  %v465_v8 = vsub.f32 %v8334_v40, %v12276_v60  ;;  %v1158_v32 = vand.u32 4294901760, %v1157_v6  ;;  %v1165_v31 = vand.u32 4294901760, %v1164_v54  ;;  %v8403_v60 = vand.u32 4294901760, %v265_v58  ;;  %v267_v54 = vld [vmem:[%s8117_s5 + $0x68] sm:$0xff] }
  0x81   : > { %12275 = vst [vmem:[#allocation50_spill] sm:$0xff] %v8387_v52  ;;  %6859 = vmatpush3.msra.mxu0 %v8267_v30  ;;  %6979 = vmatpush3.msra.mxu1 %v1137_v23  ;;  %v456_v23 = vand.u32 4294901760, %v455_v37  ;;  %v1171_v30 = vsub.f32 %v8347_v26, %v8378_v36  ;;  %v12278_v45 = vand.u32 4294901760, %v8352_v48  ;;  %v11896_v6 = vand.u32 4294901760, %v8383_v25 }
  0x82   : > { %6860 = vmatprep.subr.mxu0 %v8302_v57  ;;  %6980 = vmatprep.subr.mxu1 %v1144_v61  ;;  %12277 = vst [vmem:[#allocation51_spill] sm:$0xff] %v8403_v60  ;;  %v8410_v40 = vsub.f32 %v263_v21, %v8385_v39  ;;  %v8413_v37 = vsub.f32 %v264_v7, %v8387_v52  ;;  %v12279_v36 = vand.u32 4294901760, %v8362_v13  ;;  %v268_v21 = vld [vmem:[%s8117_s5 + $0x70] sm:$0xff] }
  0x83   : > { %6861 = vmatpush3.msra.mxu0 %v8302_v57  ;;  %6862 = vmatprep.mubr.f32.mxu0 %v426_v56  ;;  %v475_v12 = vsub.f32 %v8352_v48, %v12278_v45  ;;  %v466_v56 = vand.u32 4294901760, %v465_v8  ;;  %v8420_v57 = vand.u32 4294901760, %v266_v53  ;;  %v1172_v45 = vand.u32 4294901760, %v1171_v30 }
  0x84   : > { %6981 = vmatpush3.msra.mxu1 %v1144_v61  ;;  %6863 = vmatmul.mubr.f32.vlgmr.msra.gmra.mxu0 %v436_v28  ;;  %v485_v61 = vsub.f32 %v8362_v13, %v12279_v36  ;;  %v11897_v28 = vand.u32 4294901760, %v8396_v62  ;;  %v8425_v7 = vsub.f32 %v265_v58, %v8403_v60  ;;  %v11898_v36 = vand.u32 4294901760, %v8410_v40 }
  0x85   : > { %6982 = vmatprep.subr.mxu1 %v1151_v2  ;;  %6865 = vmatprep.mubr.f32.mxu0 %v446_v35  ;;  %12280 = vst [vmem:[#allocation52_spill] sm:$0xff] %v8420_v57  ;;  %v8427_v35 = vand.u32 4294901760, %v267_v54  ;;  %v476_v8 = vand.u32 4294901760, %v475_v12  ;;  %v11899_v30 = vand.u32 4294901760, %v8413_v37  ;;  %v8439_v13 = vsub.f32 %v266_v53, %v8420_v57  ;;  %v269_v12 = vld [vmem:[%s8117_s5 + $0x78] sm:$0xff] }
  0x86   : > { %6983 = vmatpush3.msra.mxu1 %v1151_v2  ;;  %6990 = vmatprep.mubr.f32.mxu1 %v8235_v59  ;;  %12281 = vst [vmem:[#allocation53_spill] sm:$0xff] %v8425_v7  ;;  %v495_v2 = vsub.f32 %v8383_v25, %v11896_v6  ;;  %v486_v58 = vand.u32 4294901760, %v485_v61  ;;  %v505_v59 = vsub.f32 %v8396_v62, %v11897_v28  ;;  %v11904_v6 = vand.u32 4294901760, %v8425_v7 }
  0x87   : > { %6984 = vmatprep.subr.mxu1 %v1158_v32  ;;  %12282 = vst [vmem:[#allocation54_spill] sm:$0xff] %v8427_v35  ;;  %7086 = vmatprep.subr.mxu0 %v8141_v14  ;;  %v8457_v61 = vand.u32 4294901760, %v269_v12 }
  0x88   : > { %6985 = vmatpush3.msra.mxu1 %v1158_v32  ;;  %6866 = vmatmul.mubr.f32.gmra.mxu0 %v456_v23  ;;  %v8441_v32 = vand.u32 4294901760, %v268_v21  ;;  %v270_v23 = vld [vmem:[%s8117_s5 + $0x80] sm:$0xff]  ;;  %v496_v53 = vand.u32 4294901760, %v495_v2  ;;  %v271_v2 = vld [vmem:[%s8117_s5 + $0x88] sm:$0xff] }
  0x89   : > { %6986 = vmatprep.subr.mxu1 %v1165_v31  ;;  %6868 = vmatprep.mubr.f32.mxu0 %v466_v56  ;;  %v8448_v56 = vsub.f32 %v267_v54, %v8427_v35  ;;  %12285 = vst [vmem:[#allocation57_spill] sm:$0xff] %v8457_v61  ;;  %v506_v54 = vand.u32 4294901760, %v505_v59  ;;  %v8479_v28 = vand.u32 4294901760, %v271_v2  ;;  %v12290_v59 = vand.u32 4294901760, %v8439_v13 }
  0x8a   : > { %12283 = vst [vmem:[#allocation55_spill] sm:$0xff] %v8441_v32  ;;  %6987 = vmatpush3.msra.mxu1 %v1165_v31  ;;  %7087 = vmatpush3.msra.mxu0 %v8141_v14  ;;  %v515_v31 = vsub.f32 %v8410_v40, %v11898_v36  ;;  %v525_v14 = vsub.f32 %v8413_v37, %v11899_v30  ;;  %v272_v36 = vld [vmem:[%s8117_s5 + $0x90] sm:$0xff] }
  0x8b   : > { %6988 = vmatprep.subr.mxu1 %v1172_v45  ;;  %12284 = vst [vmem:[#allocation56_spill] sm:$0xff] %v8448_v56  ;;  %7088 = vmatprep.subr.mxu0 %v8144_v15  ;;  %v535_v30 = vsub.f32 %v8425_v7, %v11904_v6  ;;  %12288 = vst [vmem:[#allocation60_spill] sm:$0xff] %v8479_v28  ;;  %v12292_v7 = vand.u32 4294901760, %v8448_v56 }
  0x8c   : > { %6989 = vmatpush3.msra.mxu1 %v1172_v45  ;;  %6869 = vmatmul.mubr.f32.gmra.mxu0 %v476_v8  ;;  %v8462_v45 = vsub.f32 %v268_v21, %v8441_v32  ;;  %v8464_v8 = vand.u32 4294901760, %v270_v23  ;;  %v516_v21 = vand.u32 4294901760, %v515_v31  ;;  %v526_v6 = vand.u32 4294901760, %v525_v14  ;;  %v274_v31 = vld [vmem:[%s8117_s5 + $0xa0] sm:$0xff] }
  0x8d   : > { %6991 = vmatmul.mubr.f32.vlgmr.msra.gmra.mxu1 %v8247_v0  ;;  %6871 = vmatprep.mubr.f32.mxu0 %v486_v58  ;;  %v8477_v58 = vsub.f32 %v269_v12, %v8457_v61  ;;  %v273_v0 = vld [vmem:[%s8117_s5 + $0x98] sm:$0xff] }
  0x8e   : > { %12286 = vst [vmem:[#allocation58_spill] sm:$0xff] %v8462_v45  ;;  %12287 = vst [vmem:[#allocation59_spill] sm:$0xff] %v8464_v8  ;;  %6993 = vmatprep.mubr.f32.mxu1 %v8280_v38  ;;  %7214 = vmatprep.subr.mxu1 %v8127_v3  ;;  %v8481_v38 = vand.u32 4294901760, %v272_v36  ;;  %v8491_v12 = vsub.f32 %v270_v23, %v8464_v8  ;;  %v8499_v14 = vand.u32 4294901760, %v273_v0  ;;  %v536_v23 = vand.u32 4294901760, %v535_v30  ;;  %v278_v30 = vld [vmem:[%s8117_s5 + $0xc0] sm:$0xff] }
  0x8f   : > { %7215 = vmatpush3.msra.mxu1 %v8127_v3  ;;  %7089 = vmatpush3.msra.mxu0 %v8144_v15  ;;  %v545_v15 = vsub.f32 %v8439_v13, %v12290_v59  ;;  %v8505_v59 = vsub.f32 %v271_v2, %v8479_v28  ;;  %v275_v2 = vld [vmem:[%s8117_s5 + $0xa8] sm:$0xff] }
  0x90   : > { %6872 = vmatmul.mubr.f32.gmra.mxu0 %v496_v53  ;;  %12289 = vst [vmem:[#allocation61_spill] sm:$0xff] %v8481_v38  ;;  %7216 = vmatprep.subr.mxu1 %v8129_v4  ;;  %12291 = vst [vmem:[#allocation62_spill] sm:$0xff] %v8491_v12  ;;  %v8508_v53 = vsub.f32 %v272_v36, %v8481_v38  ;;  %v276_v36 = vld [vmem:[%s8117_s5 + $0xb0] sm:$0xff] }
  0x91   : > { %6994 = vmatmul.mubr.f32.gmra.mxu1 %v8289_v42  ;;  %6874 = vmatprep.mubr.f32.mxu0 %v506_v54  ;;  %v555_v42 = vsub.f32 %v8448_v56, %v12292_v7  ;;  %12293 = vst [vmem:[#allocation63_spill] sm:$0xff] %v8499_v14  ;;  %12294 = vst [vmem:[#allocation64_spill] sm:$0xff] %v8505_v59  ;;  %v546_v7 = vand.u32 4294901760, %v545_v15 }
  0x92   : > { %6996 = vmatprep.mubr.f32.mxu1 %v8315_v55  ;;  %7217 = vmatpush3.msra.mxu1 %v8129_v4  ;;  %v12295_v55 = vand.u32 4294901760, %v8462_v45 }
  0x93   : > { %7090 = vmatprep.subr.mxu0 %v8149_v17  ;;  %7218 = vmatprep.subr.mxu1 %v8131_v5  ;;  %v556_v54 = vand.u32 4294901760, %v555_v42  ;;  %v12300_v42 = vand.u32 4294901760, %v8491_v12 }
  0x94   : > { %6875 = vmatmul.mubr.f32.gmra.mxu0 %v516_v21  ;;  %7219 = vmatpush3.msra.mxu1 %v8131_v5  ;;  %v565_v56 = vsub.f32 %v8462_v45, %v12295_v55  ;;  %v8516_v21 = vand.u32 4294901760, %v274_v31  ;;  %v12298_v55 = vand.u32 4294901760, %v8477_v58 }
  0x95   : > { %6997 = vmatmul.mubr.f32.gmra.mxu1 %v8323_v43  ;;  %6877 = vmatprep.mubr.f32.mxu0 %v526_v6  ;;  %v8523_v43 = vsub.f32 %v273_v0, %v8499_v14 }
  0x96   : > { %12296 = vst [vmem:[#allocation65_spill] sm:$0xff] %v8516_v21  ;;  %6999 = vmatprep.mubr.f32.mxu1 %v8336_v41  ;;  %7091 = vmatpush3.msra.mxu0 %v8149_v17  ;;  %v575_v6 = vsub.f32 %v8477_v58, %v12298_v55  ;;  %v8532_v41 = vand.u32 4294901760, %v275_v2  ;;  %v277_v17 = vld [vmem:[%s8117_s5 + $0xb8] sm:$0xff]  ;;  %v566_v0 = vand.u32 4294901760, %v565_v56  ;;  %v8541_v45 = vsub.f32 %v274_v31, %v8516_v21 }
  0x97   : > { %12297 = vst [vmem:[#allocation66_spill] sm:$0xff] %v8523_v43  ;;  %7092 = vmatprep.subr.mxu0 %v8153_v19  ;;  %7220 = vmatprep.subr.mxu1 %v8133_v9  ;;  %v8543_v55 = vand.u32 4294901760, %v276_v36  ;;  %v12303_v31 = vand.u32 4294901760, %v8505_v59 }
  0x98   : > { %6878 = vmatmul.mubr.f32.gmra.mxu0 %v536_v23  ;;  %12299 = vst [vmem:[#allocation67_spill] sm:$0xff] %v8532_v41  ;;  %7221 = vmatpush3.msra.mxu1 %v8133_v9  ;;  %v585_v23 = vsub.f32 %v8491_v12, %v12300_v42  ;;  %v576_v56 = vand.u32 4294901760, %v575_v6  ;;  %v12304_v42 = vand.u32 4294901760, %v8508_v53  ;;  %v8560_v15 = vsub.f32 %v275_v2, %v8532_v41  ;;  %v280_v12 = vld [vmem:[%s8117_s5 + $0xd0] sm:$0xff] }
  0x99   : > { %7000 = vmatmul.mubr.f32.gmra.mxu1 %v8354_v22  ;;  %6880 = vmatprep.mubr.f32.mxu0 %v546_v7  ;;  %12301 = vst [vmem:[#allocation68_spill] sm:$0xff] %v8543_v55  ;;  %v8549_v22 = vand.u32 4294901760, %v277_v17  ;;  %v595_v7 = vsub.f32 %v8505_v59, %v12303_v31  ;;  %v8566_v6 = vsub.f32 %v276_v36, %v8543_v55  ;;  %v8568_v31 = vand.u32 4294901760, %v278_v30  ;;  %v279_v59 = vld [vmem:[%s8117_s5 + $0xc8] sm:$0xff] }
  0x9a   : > { %7002 = vmatprep.mubr.f32.mxu1 %v8369_v18  ;;  %7093 = vmatpush3.msra.mxu0 %v8153_v19  ;;  %v605_v19 = vsub.f32 %v8508_v53, %v12304_v42  ;;  %v586_v18 = vand.u32 4294901760, %v585_v23  ;;  %v12306_v2 = vand.u32 4294901760, %v8523_v43  ;;  %v282_v23 = vld [vmem:[%s8117_s5 + $0xe0] sm:$0xff] }
  0x9b   : > { %12302 = vst [vmem:[#allocation69_spill] sm:$0xff] %v8549_v22  ;;  %7094 = vmatprep.subr.mxu0 %v8156_v20  ;;  %7222 = vmatprep.subr.mxu1 %v8135_v10  ;;  %12305 = vst [vmem:[#allocation70_spill] sm:$0xff] %v8568_v31  ;;  %v596_v36 = vand.u32 4294901760, %v595_v7  ;;  %v8595_v7 = vsub.f32 %v278_v30, %v8568_v31  ;;  %v12312_v30 = vand.u32 4294901760, %v8560_v15 }
  0x9c   : > { %6881 = vmatmul.mubr.f32.gmra.mxu0 %v556_v54  ;;  %7223 = vmatpush3.msra.mxu1 %v8135_v10  ;;  %v615_v42 = vsub.f32 %v8523_v43, %v12306_v2  ;;  %v8583_v54 = vand.u32 4294901760, %v279_v59  ;;  %v12310_v2 = vand.u32 4294901760, %v8541_v45 }
  0x9d   : > { %7003 = vmatmul.mubr.f32.gmra.mxu1 %v8385_v39  ;;  %6883 = vmatprep.mubr.f32.mxu0 %v566_v0  ;;  %v8578_v0 = vsub.f32 %v277_v17, %v8549_v22  ;;  %v606_v17 = vand.u32 4294901760, %v605_v19  ;;  %v635_v19 = vsub.f32 %v8560_v15, %v12312_v30  ;;  %v283_v30 = vld [vmem:[%s8117_s5 + $0xe8] sm:$0xff] }
  0x9e   : > { %7005 = vmatprep.mubr.f32.mxu1 %v8387_v52  ;;  %7095 = vmatpush3.msra.mxu0 %v8156_v20  ;;  %12308 = vst [vmem:[#allocation72_spill] sm:$0xff] %v8583_v54  ;;  %v8585_v52 = vand.u32 4294901760, %v280_v12  ;;  %v281_v20 = vld [vmem:[%s8117_s5 + $0xd8] sm:$0xff]  ;;  %v625_v39 = vsub.f32 %v8541_v45, %v12310_v2  ;;  %v8609_v2 = vsub.f32 %v279_v59, %v8583_v54  ;;  %v284_v59 = vld [vmem:[%s8117_s5 + $0xf0] sm:$0xff] }
  0x9f   : > { %12307 = vst [vmem:[#allocation71_spill] sm:$0xff] %v8578_v0  ;;  %7096 = vmatprep.subr.mxu0 %v8180_v29  ;;  %7224 = vmatprep.subr.mxu1 %v8137_v11 }
  0xa0   : > { %6884 = vmatmul.mubr.f32.gmra.mxu0 %v576_v56  ;;  %12309 = vst [vmem:[#allocation73_spill] sm:$0xff] %v8585_v52  ;;  %7225 = vmatpush3.msra.mxu1 %v8137_v11  ;;  %v11939_v56 = vand.u32 4294901760, %v8566_v6  ;;  %12313 = vst [vmem:[#allocation75_spill] sm:$0xff] %v8609_v2  ;;  %v626_v43 = vand.u32 4294901760, %v625_v39 }
  0xa1   : > { %7006 = vmatmul.mubr.f32.gmra.mxu1 %v8403_v60  ;;  %6886 = vmatprep.mubr.f32.mxu0 %v586_v18  ;;  %v8601_v60 = vand.u32 4294901760, %v281_v20  ;;  %v616_v18 = vand.u32 4294901760, %v615_v42 }
  0xa2   : > { %7008 = vmatprep.mubr.f32.mxu1 %v8420_v57  ;;  %7097 = vmatpush3.msra.mxu0 %v8180_v29  ;;  %v8612_v29 = vsub.f32 %v280_v12, %v8585_v52  ;;  %v645_v42 = vsub.f32 %v8566_v6, %v11939_v56  ;;  %v8620_v57 = vand.u32 4294901760, %v282_v23  ;;  %v12316_v12 = vand.u32 4294901760, %v8578_v0  ;;  %v285_v56 = vld [vmem:[%s8117_s5 + $0xf8] sm:$0xff] }
  0xa3   : > { %12311 = vst [vmem:[#allocation74_spill] sm:$0xff] %v8601_v60  ;;  %7098 = vmatprep.subr.mxu0 %v8190_v33  ;;  %7226 = vmatprep.subr.mxu1 %v8146_v16  ;;  %v8630_v39 = vsub.f32 %v281_v20, %v8601_v60 }
  0xa4   : > { %6887 = vmatmul.mubr.f32.gmra.mxu0 %v596_v36  ;;  %12314 = vst [vmem:[#allocation76_spill] sm:$0xff] %v8612_v29  ;;  %7227 = vmatpush3.msra.mxu1 %v8146_v16  ;;  %12315 = vst [vmem:[#allocation77_spill] sm:$0xff] %v8620_v57  ;;  %v646_v20 = vand.u32 4294901760, %v645_v42  ;;  %v286_v36 = vld [vmem:[%s8117_s5 + $0x100] sm:$0xff] }
  0xa5   : > { %7009 = vmatmul.mubr.f32.gmra.mxu1 %v8427_v35  ;;  %6889 = vmatprep.mubr.f32.mxu0 %v606_v17  ;;  %v655_v35 = vsub.f32 %v8578_v0, %v12316_v12  ;;  %12317 = vst [vmem:[#allocation78_spill] sm:$0xff] %v8630_v39  ;;  %v636_v17 = vand.u32 4294901760, %v635_v19  ;;  %v12319_v12 = vand.u32 4294901760, %v8595_v7  ;;  %v8646_v19 = vand.u32 4294901760, %v284_v59 }
  0xa6   : > { %7011 = vmatprep.mubr.f32.mxu1 %v8441_v32  ;;  %7099 = vmatpush3.msra.mxu0 %v8190_v33  ;;  %v8636_v33 = vand.u32 4294901760, %v283_v30 }
  0xa7   : > { %7100 = vmatprep.subr.mxu0 %v8208_v44  ;;  %7228 = vmatprep.subr.mxu1 %v8168_v24  ;;  %v665_v32 = vsub.f32 %v8595_v7, %v12319_v12  ;;  %12320 = vst [vmem:[#allocation80_spill] sm:$0xff] %v8646_v19  ;;  %v656_v0 = vand.u32 4294901760, %v655_v35  ;;  %v12322_v12 = vand.u32 4294901760, %v8612_v29  ;;  %v287_v35 = vld [vmem:[%s8117_s5 + $0x108] sm:$0xff] }
  0xa8   : > { %6890 = vmatmul.mubr.f32.gmra.mxu0 %v616_v18  ;;  %12318 = vst [vmem:[#allocation79_spill] sm:$0xff] %v8636_v33  ;;  %7229 = vmatpush3.msra.mxu1 %v8168_v24  ;;  %v8644_v18 = vsub.f32 %v282_v23, %v8620_v57  ;;  %v12321_v23 = vand.u32 4294901760, %v8609_v2 }
  0xa9   : > { %7012 = vmatmul.mubr.f32.gmra.mxu1 %v8457_v61  ;;  %6892 = vmatprep.mubr.f32.mxu0 %v626_v43  ;;  %v8662_v61 = vsub.f32 %v283_v30, %v8636_v33  ;;  %v12327_v30 = vand.u32 4294901760, %v8630_v39 }
  0xaa   : > { %7014 = vmatprep.mubr.f32.mxu1 %v8464_v8  ;;  %7101 = vmatpush3.msra.mxu0 %v8208_v44  ;;  %v675_v42 = vsub.f32 %v8609_v2, %v12321_v23  ;;  %v685_v8 = vsub.f32 %v8612_v29, %v12322_v12  ;;  %v8664_v44 = vand.u32 4294901760, %v285_v56  ;;  %v8671_v23 = vsub.f32 %v284_v59, %v8646_v19  ;;  %v288_v12 = vld [vmem:[%s8117_s5 + $0x110] sm:$0xff] }
  0xab   : > { %7102 = vmatprep.subr.mxu0 %v8214_v47  ;;  %7230 = vmatprep.subr.mxu1 %v8174_v27  ;;  %12323 = vst [vmem:[#allocation81_spill] sm:$0xff] %v8662_v61  ;;  %v8673_v2 = vand.u32 4294901760, %v286_v36  ;;  %v695_v29 = vsub.f32 %v8630_v39, %v12327_v30  ;;  %v8689_v43 = vand.u32 4294901760, %v288_v12 }
  0xac   : > { %6893 = vmatmul.mubr.f32.gmra.mxu0 %v636_v17  ;;  %12324 = vst [vmem:[#allocation82_spill] sm:$0xff] %v8664_v44  ;;  %7231 = vmatpush3.msra.mxu1 %v8174_v27  ;;  %v666_v17 = vand.u32 4294901760, %v665_v32  ;;  %12325 = vst [vmem:[#allocation83_spill] sm:$0xff] %v8671_v23  ;;  %v676_v32 = vand.u32 4294901760, %v675_v42  ;;  %v686_v30 = vand.u32 4294901760, %v685_v8  ;;  %v12335_v8 = vand.u32 4294901760, %v8662_v61 }
  0xad   : > { %7015 = vmatmul.mubr.f32.gmra.mxu1 %v8479_v28  ;;  %6895 = vmatprep.mubr.f32.mxu0 %v646_v20  ;;  %12326 = vst [vmem:[#allocation84_spill] sm:$0xff] %v8673_v2  ;;  %v8681_v28 = vand.u32 4294901760, %v287_v35  ;;  %v8687_v20 = vsub.f32 %v285_v56, %v8664_v44  ;;  %12330 = vst [vmem:[#allocation87_spill] sm:$0xff] %v8689_v43  ;;  %v8699_v42 = vsub.f32 %v286_v36, %v8673_v2  ;;  %v290_v56 = vld [vmem:[%s8117_s5 + $0x120] sm:$0xff] }
  0xae   : > { %7017 = vmatprep.mubr.f32.mxu1 %v8481_v38  ;;  %7103 = vmatpush3.msra.mxu0 %v8214_v47  ;;  %v289_v47 = vld [vmem:[%s8117_s5 + $0x118] sm:$0xff]  ;;  %v12331_v38 = vand.u32 4294901760, %v8644_v18  ;;  %v715_v36 = vsub.f32 %v8662_v61, %v12335_v8  ;;  %v291_v8 = vld [vmem:[%s8117_s5 + $0x128] sm:$0xff] }
  0xaf   : > { %12328 = vst [vmem:[#allocation85_spill] sm:$0xff] %v8681_v28  ;;  %7104 = vmatprep.subr.mxu0 %v8223_v51  ;;  %7232 = vmatprep.subr.mxu1 %v8193_v34  ;;  %12329 = vst [vmem:[#allocation86_spill] sm:$0xff] %v8687_v20  ;;  %v8705_v59 = vsub.f32 %v287_v35, %v8681_v28 }
  0xb0   : > { %6896 = vmatmul.mubr.f32.gmra.mxu0 %v656_v0  ;;  %7233 = vmatpush3.msra.mxu1 %v8193_v34  ;;  %v705_v39 = vsub.f32 %v8644_v18, %v12331_v38  ;;  %12332 = vst [vmem:[#allocation88_spill] sm:$0xff] %v8699_v42  ;;  %v696_v38 = vand.u32 4294901760, %v695_v29  ;;  %v292_v0 = vld [vmem:[%s8117_s5 + $0x130] sm:$0xff] }
  0xb1   : > { %7018 = vmatmul.mubr.f32.gmra.mxu1 %v8499_v14  ;;  %6898 = vmatprep.mubr.f32.mxu0 %v666_v17  ;;  %12333 = vst [vmem:[#allocation89_spill] sm:$0xff] %v8705_v59  ;;  %v8707_v17 = vand.u32 4294901760, %v289_v47  ;;  %v8724_v14 = vand.u32 4294901760, %v290_v56 }
  0xb2   : > { %7020 = vmatprep.mubr.f32.mxu1 %v8516_v21  ;;  %7105 = vmatpush3.msra.mxu0 %v8223_v51  ;;  %v8716_v51 = vsub.f32 %v288_v12, %v8689_v43  ;;  %v706_v35 = vand.u32 4294901760, %v705_v39  ;;  %v12337_v21 = vand.u32 4294901760, %v8671_v23  ;;  %v12340_v39 = vand.u32 4294901760, %v8687_v20 }
  0xb3   : > { %12334 = vst [vmem:[#allocation90_spill] sm:$0xff] %v8707_v17  ;;  %7106 = vmatprep.subr.mxu0 %v8245_v63  ;;  %7234 = vmatprep.subr.mxu1 %v8211_v46  ;;  %12338 = vst [vmem:[#allocation92_spill] sm:$0xff] %v8724_v14  ;;  %v12342_v12 = vand.u32 4294901760, %v8699_v42 }
  0xb4   : > { %6899 = vmatmul.mubr.f32.gmra.mxu0 %v676_v32  ;;  %12336 = vst [vmem:[#allocation91_spill] sm:$0xff] %v8716_v51  ;;  %7235 = vmatpush3.msra.mxu1 %v8211_v46  ;;  %v725_v32 = vsub.f32 %v8671_v23, %v12337_v21  ;;  %v716_v21 = vand.u32 4294901760, %v715_v36  ;;  %v735_v29 = vsub.f32 %v8687_v20, %v12340_v39  ;;  %v8750_v36 = vand.u32 4294901760, %v292_v0  ;;  %v293_v39 = vld [vmem:[%s8117_s5 + $0x138] sm:$0xff] }
  0xb5   : > { %7021 = vmatmul.mubr.f32.gmra.mxu1 %v8532_v41  ;;  %6901 = vmatprep.mubr.f32.mxu0 %v686_v30  ;;  %v8732_v30 = vsub.f32 %v289_v47, %v8707_v17  ;;  %v745_v41 = vsub.f32 %v8699_v42, %v12342_v12  ;;  %v12345_v20 = vand.u32 4294901760, %v8705_v59  ;;  %v12347_v12 = vand.u32 4294901760, %v8716_v51 }
  0xb6   : > { %7023 = vmatprep.mubr.f32.mxu1 %v8543_v55  ;;  %7107 = vmatpush3.msra.mxu0 %v8245_v63  ;;  %v8740_v63 = vand.u32 4294901760, %v291_v8  ;;  %v726_v47 = vand.u32 4294901760, %v725_v32  ;;  %12344 = vst [vmem:[#allocation96_spill] sm:$0xff] %v8750_v36  ;;  %v294_v55 = vld [vmem:[%s8117_s5 + $0x140] sm:$0xff]  ;;  %v8768_v42 = vand.u32 4294901760, %v293_v39 }
  0xb7   : > { %12339 = vst [vmem:[#allocation93_spill] sm:$0xff] %v8732_v30  ;;  %7108 = vmatprep.subr.mxu0 %v8251_v1  ;;  %7236 = vmatprep.subr.mxu1 %v8218_v49  ;;  %v12354_v32 = vld [vmem:[#allocation25_spill] sm:$0xff] }
  0xb8   : > { %6902 = vmatmul.mubr.f32.gmra.mxu0 %v696_v38  ;;  %12341 = vst [vmem:[#allocation94_spill] sm:$0xff] %v8740_v63  ;;  %7237 = vmatpush3.msra.mxu1 %v8218_v49  ;;  %v8748_v38 = vsub.f32 %v290_v56, %v8724_v14  ;;  %v736_v56 = vand.u32 4294901760, %v735_v29  ;;  %12349 = vst [vmem:[#allocation97_spill] sm:$0xff] %v8768_v42  ;;  %v8774_v29 = vsub.f32 %v292_v0, %v8750_v36 }
  0xb9   : > { %7024 = vmatmul.mubr.f32.gmra.mxu1 %v8549_v22  ;;  %6904 = vmatprep.mubr.f32.mxu0 %v706_v35  ;;  %v755_v35 = vsub.f32 %v8705_v59, %v12345_v20  ;;  %v12346_v22 = vld [vmem:[#allocation24_spill] sm:$0xff]  ;;  %v746_v20 = vand.u32 4294901760, %v745_v41  ;;  %v12352_v59 = vand.u32 4294901760, %v8732_v30  ;;  %v12353_v41 = vld [vmem:[#allocation34_spill] sm:$0xff]  ;;  %v8789_v23 = vsub.f32 %v293_v39, %v8768_v42 }
  0xba   : > { %12343 = vst [vmem:[#allocation95_spill] sm:$0xff] %v8748_v38  ;;  %7026 = vmatprep.mubr.f32.mxu1 %v8568_v31  ;;  %7109 = vmatpush3.msra.mxu0 %v8251_v1  ;;  %v765_v31 = vsub.f32 %v8716_v51, %v12347_v12  ;;  %v8766_v1 = vsub.f32 %v291_v8, %v8740_v63  ;;  %12350 = vst [vmem:[#allocation98_spill] sm:$0xff] %v8774_v29  ;;  %v295_v12 = vld [vmem:[%s8117_s5 + $0x148] sm:$0xff]  ;;  %v296_v8 = vld [vmem:[%s8117_s5 + $0x150] sm:$0xff] }
  0xbb   : > { %7110 = vmatprep.subr.mxu0 %v12346_v22  ;;  %7238 = vmatprep.subr.mxu1 %v8220_v50  ;;  %v756_v51 = vand.u32 4294901760, %v755_v35  ;;  %12355 = vst [vmem:[#allocation34_spill] sm:$0xff] %v8789_v23  ;;  %v8803_v39 = vand.u32 4294901760, %v296_v8 }
  0xbc   : > { %6905 = vmatmul.mubr.f32.gmra.mxu0 %v716_v21  ;;  %12348 = vst [vmem:[#allocation24_spill] sm:$0xff] %v8766_v1  ;;  %7239 = vmatpush3.msra.mxu1 %v8220_v50  ;;  %v8776_v21 = vand.u32 4294901760, %v294_v55  ;;  %v766_v0 = vand.u32 4294901760, %v765_v31 }
  0xbd   : > { %7027 = vmatmul.mubr.f32.gmra.mxu1 %v8583_v54  ;;  %6907 = vmatprep.mubr.f32.mxu0 %v726_v47  ;;  %v775_v47 = vsub.f32 %v8732_v30, %v12352_v59  ;;  %v12357_v59 = vand.u32 4294901760, %v8748_v38  ;;  %12359 = vst [vmem:[#allocation102_spill] sm:$0xff] %v8803_v39  ;;  %v298_v54 = vld [vmem:[%s8117_s5 + $0x160] sm:$0xff]  ;;  %v8829_v31 = vsub.f32 %v296_v8, %v8803_v39  ;;  %v12371_v8 = vand.u32 4294901760, %v8789_v23 }
  0xbe   : > { %12351 = vst [vmem:[#allocation99_spill] sm:$0xff] %v8776_v21  ;;  %7029 = vmatprep.mubr.f32.mxu1 %v8585_v52  ;;  %7111 = vmatpush3.msra.mxu0 %v12346_v22  ;;  %v8791_v52 = vand.u32 4294901760, %v295_v12  ;;  %v297_v22 = vld [vmem:[%s8117_s5 + $0x158] sm:$0xff] }
  0xbf   : > { %7112 = vmatprep.subr.mxu0 %v12353_v41  ;;  %7240 = vmatprep.subr.mxu1 %v12354_v32  ;;  %v785_v35 = vsub.f32 %v8748_v38, %v12357_v59  ;;  %v776_v30 = vand.u32 4294901760, %v775_v47  ;;  %v12363_v59 = vand.u32 4294901760, %v8766_v1  ;;  %v299_v47 = vld [vmem:[%s8117_s5 + $0x168] sm:$0xff]  ;;  %12367 = vst [vmem:[#allocation104_spill] sm:$0xff] %v8829_v31 }
  0xc0   : > { %6908 = vmatmul.mubr.f32.gmra.mxu0 %v736_v56  ;;  %12356 = vst [vmem:[#allocation100_spill] sm:$0xff] %v8791_v52  ;;  %7241 = vmatpush3.msra.mxu1 %v12354_v32  ;;  %v8801_v56 = vsub.f32 %v294_v55, %v8776_v21  ;;  %v12362_v32 = vld [vmem:[#allocation27_spill] sm:$0xff]  ;;  %v8817_v38 = vsub.f32 %v295_v12, %v8791_v52 }
  0xc1   : > { %7030 = vmatmul.mubr.f32.gmra.mxu1 %v8601_v60  ;;  %6910 = vmatprep.mubr.f32.mxu0 %v746_v20  ;;  %v8808_v60 = vand.u32 4294901760, %v297_v22  ;;  %v12361_v20 = vld [vmem:[#allocation38_spill] sm:$0xff]  ;;  %v795_v55 = vsub.f32 %v8766_v1, %v12363_v59  ;;  %v300_v12 = vld [vmem:[%s8117_s5 + $0x170] sm:$0xff]  ;;  %v815_v59 = vsub.f32 %v8789_v23, %v12371_v8  ;;  %v301_v8 = vld [vmem:[%s8117_s5 + $0x178] sm:$0xff] }
  0xc2   : > { %12358 = vst [vmem:[#allocation101_spill] sm:$0xff] %v8801_v56  ;;  %7032 = vmatprep.mubr.f32.mxu1 %v8620_v57  ;;  %7113 = vmatpush3.msra.mxu0 %v12353_v41  ;;  %12364 = vst [vmem:[#allocation38_spill] sm:$0xff] %v8817_v38  ;;  %v8819_v57 = vand.u32 4294901760, %v298_v54  ;;  %v786_v41 = vand.u32 4294901760, %v785_v35  ;;  %v12370_v35 = vld [vmem:[#allocation36_spill] sm:$0xff] }
  0xc3   : > { %12360 = vst [vmem:[#allocation103_spill] sm:$0xff] %v8808_v60  ;;  %7114 = vmatprep.subr.mxu0 %v12361_v20  ;;  %7242 = vmatprep.subr.mxu1 %v12362_v32  ;;  %v8835_v1 = vsub.f32 %v297_v22, %v8808_v60 }
  0xc4   : > { %6911 = vmatmul.mubr.f32.gmra.mxu0 %v756_v51  ;;  %12365 = vst [vmem:[#allocation27_spill] sm:$0xff] %v8819_v57  ;;  %7243 = vmatpush3.msra.mxu1 %v12362_v32  ;;  %v12366_v51 = vand.u32 4294901760, %v8774_v29 }
  0xc5   : > { %7033 = vmatmul.mubr.f32.gmra.mxu1 %v8636_v33  ;;  %6913 = vmatprep.mubr.f32.mxu0 %v766_v0  ;;  %12368 = vst [vmem:[#allocation105_spill] sm:$0xff] %v8835_v1  ;;  %v8837_v0 = vand.u32 4294901760, %v299_v47  ;;  %v12373_v33 = vand.u32 4294901760, %v8801_v56 }
  0xc6   : > { %v805_v61 = vsub.f32 %v8774_v29, %v12366_v51  ;;  %7035 = vmatprep.mubr.f32.mxu1 %v8646_v19  ;;  %7115 = vmatpush3.msra.mxu0 %v12361_v20  ;;  %v796_v51 = vand.u32 4294901760, %v795_v55  ;;  %v8846_v20 = vsub.f32 %v298_v54, %v8819_v57  ;;  %v8854_v29 = vand.u32 4294901760, %v300_v12  ;;  %v302_v19 = vld [vmem:[%s8117_s5 + $0x180] sm:$0xff] }
  0xc7   : > { %12369 = vst [vmem:[#allocation106_spill] sm:$0xff] %v8837_v0  ;;  %7116 = vmatprep.subr.mxu0 %v8347_v26  ;;  %7244 = vmatprep.subr.mxu1 %v12370_v35  ;;  %v12377_v55 = vand.u32 4294901760, %v8817_v38  ;;  %v12379_v54 = vand.u32 4294901760, %v8829_v31 }
  0xc8   : > { %6914 = vmatmul.mubr.f32.gmra.mxu0 %v776_v30  ;;  %12372 = vst [vmem:[#allocation107_spill] sm:$0xff] %v8846_v20  ;;  %7245 = vmatpush3.msra.mxu1 %v12370_v35  ;;  %v806_v22 = vand.u32 4294901760, %v805_v61  ;;  %v825_v30 = vsub.f32 %v8801_v56, %v12373_v33  ;;  %12374 = vst [vmem:[#allocation108_spill] sm:$0xff] %v8854_v29  ;;  %v12376_v61 = vld [vmem:[#allocation12_spill] sm:$0xff]  ;;  %v816_v33 = vand.u32 4294901760, %v815_v59  ;;  %v8879_v59 = vand.u32 4294901760, %v302_v19 }
  0xc9   : > { %7036 = vmatmul.mubr.f32.gmra.mxu1 %v8664_v44  ;;  %6916 = vmatprep.mubr.f32.mxu0 %v786_v41  ;;  %v8862_v41 = vsub.f32 %v299_v47, %v8837_v0  ;;  %v845_v56 = vsub.f32 %v8829_v31, %v12379_v54  ;;  %v8877_v23 = vsub.f32 %v300_v12, %v8854_v29  ;;  %v12382_v44 = vand.u32 4294901760, %v8835_v1 }
  0xca   : > { %7038 = vmatprep.mubr.f32.mxu1 %v8673_v2  ;;  %7117 = vmatpush3.msra.mxu0 %v8347_v26  ;;  %v835_v2 = vsub.f32 %v8817_v38, %v12377_v55  ;;  %v8870_v26 = vand.u32 4294901760, %v301_v8  ;;  %v826_v47 = vand.u32 4294901760, %v825_v30  ;;  %12381 = vst [vmem:[#allocation111_spill] sm:$0xff] %v8879_v59  ;;  %v304_v55 = vld [vmem:[%s8117_s5 + $0x190] sm:$0xff]  ;;  %v12383_v54 = vand.u32 4294901760, %v8846_v20 }
  0xcb   : > { %12375 = vst [vmem:[#allocation109_spill] sm:$0xff] %v8862_v41  ;;  %7342 = vmatprep.subr.mxu0 %v12376_v61  ;;  %7470 = vmatprep.subr.mxu1 %v8127_v3  ;;  %12380 = vst [vmem:[#allocation110_spill] sm:$0xff] %v8877_v23  ;;  %v8899_v30 = vsub.f32 %v302_v19, %v8879_v59 }
  0xcc   : > { %6917 = vmatmul.mubr.f32.gmra.mxu0 %v796_v51  ;;  %12378 = vst [vmem:[#allocation12_spill] sm:$0xff] %v8870_v26  ;;  %v303_v51 = vld [vmem:[%s8117_s5 + $0x188] sm:$0xff]  ;;  %v865_v12 = vsub.f32 %v8846_v20, %v12383_v54  ;;  %v8892_v31 = vsub.f32 %v301_v8, %v8870_v26  ;;  %v306_v8 = vld [vmem:[%s8117_s5 + $0x1a0] sm:$0xff]  ;;  %v12386_v20 = vand.u32 4294901760, %v8862_v41 }
  0xcd   : > { %7039 = vmatmul.mubr.f32.gmra.mxu1 %v8681_v28  ;;  %6919 = vmatprep.mubr.f32.mxu0 %v806_v22  ;;  %v855_v22 = vsub.f32 %v8835_v1, %v12382_v44  ;;  %v836_v28 = vand.u32 4294901760, %v835_v2  ;;  %v8894_v38 = vand.u32 4294901760, %v303_v51  ;;  %12385 = vst [vmem:[#allocation113_spill] sm:$0xff] %v8899_v30  ;;  %v8901_v2 = vand.u32 4294901760, %v304_v55  ;;  %v307_v1 = vld [vmem:[%s8117_s5 + $0x1a8] sm:$0xff] }
  0xce   : > { %7041 = vmatprep.mubr.f32.mxu1 %v8689_v43  ;;  %12384 = vst [vmem:[#allocation112_spill] sm:$0xff] %v8892_v31  ;;  %v846_v43 = vand.u32 4294901760, %v845_v56 }
  0xcf   : > { %v856_v54 = vand.u32 4294901760, %v855_v22  ;;  %v8911_v44 = vsub.f32 %v303_v51, %v8894_v38  ;;  %v12388_v22 = vand.u32 4294901760, %v8877_v23  ;;  %v308_v51 = vld [vmem:[%s8117_s5 + $0x1b0] sm:$0xff] }
  0xd0   : > { %6920 = vmatmul.mubr.f32.gmra.mxu0 %v816_v33  ;;  %v305_v33 = vld [vmem:[%s8117_s5 + $0x198] sm:$0xff] }
  0xd1   : > { %7042 = vmatmul.mubr.f32.gmra.mxu1 %v8707_v17  ;;  %6922 = vmatprep.mubr.f32.mxu0 %v826_v47  ;;  %v875_v17 = vsub.f32 %v8862_v41, %v12386_v20  ;;  %v866_v47 = vand.u32 4294901760, %v865_v12  ;;  %12387 = vst [vmem:[#allocation114_spill] sm:$0xff] %v8911_v44  ;;  %v8913_v19 = vand.u32 4294901760, %v305_v33  ;;  %v8924_v12 = vand.u32 4294901760, %v306_v8 }
  0xd2   : > { %7044 = vmatprep.mubr.f32.mxu1 %v8724_v14  ;;  %v885_v14 = vsub.f32 %v8877_v23, %v12388_v22  ;;  %v8928_v41 = vand.u32 4294901760, %v307_v1  ;;  %v309_v23 = vld [vmem:[%s8117_s5 + $0x1b8] sm:$0xff] }
  0xd3   : > { %v876_v56 = vand.u32 4294901760, %v875_v17  ;;  %v8935_v20 = vsub.f32 %v305_v33, %v8913_v19  ;;  %v12392_v17 = vand.u32 4294901760, %v8899_v30  ;;  %v310_v33 = vld [vmem:[%s8117_s5 + $0x1c0] sm:$0xff] }
  0xd4   : > { %6923 = vmatmul.mubr.f32.gmra.mxu0 %v836_v28  ;;  %v8922_v28 = vsub.f32 %v304_v55, %v8901_v2  ;;  %v8937_v55 = vand.u32 4294901760, %v308_v51  ;;  %v8951_v22 = vsub.f32 %v307_v1, %v8928_v41 }
  0xd5   : > { %7045 = vmatmul.mubr.f32.gmra.mxu1 %v8740_v63  ;;  %6925 = vmatprep.mubr.f32.mxu0 %v846_v43  ;;  %v12390_v43 = vand.u32 4294901760, %v8892_v31  ;;  %12391 = vst [vmem:[#allocation116_spill] sm:$0xff] %v8935_v20 }
  0xd6   : > { %12389 = vst [vmem:[#allocation115_spill] sm:$0xff] %v8922_v28  ;;  %7047 = vmatprep.mubr.f32.mxu1 %v8750_v36  ;;  %v886_v36 = vand.u32 4294901760, %v885_v14  ;;  %v12396_v1 = vand.u32 4294901760, %v8922_v28 }
  0xd7   : > { %v895_v63 = vsub.f32 %v8892_v31, %v12390_v43  ;;  %v8946_v43 = vsub.f32 %v306_v8, %v8924_v12  ;;  %v8960_v8 = vsub.f32 %v308_v51, %v8937_v55  ;;  %v311_v31 = vld [vmem:[%s8117_s5 + $0x1c8] sm:$0xff] }
  0xd8   : > { %6926 = vmatmul.mubr.f32.gmra.mxu0 %v856_v54  ;;  %v905_v54 = vsub.f32 %v8899_v30, %v12392_v17  ;;  %v925_v30 = vsub.f32 %v8922_v28, %v12396_v1 }
  0xd9   : > { %7048 = vmatmul.mubr.f32.gmra.mxu1 %v8768_v42  ;;  %6928 = vmatprep.mubr.f32.mxu0 %v866_v47  ;;  %12393 = vst [vmem:[#allocation117_spill] sm:$0xff] %v8946_v43  ;;  %v8953_v42 = vand.u32 4294901760, %v309_v23  ;;  %v896_v14 = vand.u32 4294901760, %v895_v63  ;;  %v12394_v47 = vand.u32 4294901760, %v8911_v44  ;;  %12395 = vst [vmem:[#allocation118_spill] sm:$0xff] %v8960_v8  ;;  %v8967_v63 = vand.u32 4294901760, %v310_v33 }
  0xda   : > { %7050 = vmatprep.mubr.f32.mxu1 %v8776_v21  ;;  %v906_v21 = vand.u32 4294901760, %v905_v54  ;;  %v12397_v54 = vand.u32 4294901760, %v8935_v20  ;;  %v12398_v28 = vand.u32 4294901760, %v8946_v43 }
  0xdb   : > { %v915_v17 = vsub.f32 %v8911_v44, %v12394_v47  ;;  %v312_v47 = vld [vmem:[%s8117_s5 + $0x1d0] sm:$0xff]  ;;  %v8974_v35 = vsub.f32 %v309_v23, %v8953_v42  ;;  %v8987_v23 = vsub.f32 %v310_v33, %v8967_v63 }
  0xdc   : > { %6929 = vmatmul.mubr.f32.gmra.mxu0 %v876_v56  ;;  %v935_v1 = vsub.f32 %v8935_v20, %v12397_v54  ;;  %v945_v51 = vsub.f32 %v8946_v43, %v12398_v28  ;;  %v314_v54 = vld [vmem:[%s8117_s5 + $0x1e0] sm:$0xff]  ;;  %v12400_v56 = vand.u32 4294901760, %v8951_v22  ;;  %v12401_v28 = vand.u32 4294901760, %v8960_v8 }
  0xdd   : > { %7051 = vmatmul.mubr.f32.gmra.mxu1 %v8791_v52  ;;  %6931 = vmatprep.mubr.f32.mxu0 %v886_v36  ;;  %v916_v36 = vand.u32 4294901760, %v915_v17  ;;  %v8980_v52 = vand.u32 4294901760, %v311_v31  ;;  %12399 = vst [vmem:[#allocation119_spill] sm:$0xff] %v8987_v23  ;;  %v313_v17 = vld [vmem:[%s8117_s5 + $0x1d8] sm:$0xff] }
  0xde   : > { %7053 = vmatprep.mubr.f32.mxu1 %v8803_v39  ;;  %v926_v39 = vand.u32 4294901760, %v925_v30  ;;  %v12066_v30 = vand.u32 4294901760, %v8974_v35  ;;  %v965_v33 = vsub.f32 %v8960_v8, %v12401_v28  ;;  %v9004_v20 = vand.u32 4294901760, %v313_v17  ;;  %v316_v28 = vld [vmem:[%s8117_s5 + $0x1f0] sm:$0xff] }
  0xdf   : > { %v9002_v43 = vsub.f32 %v311_v31, %v8980_v52 }
  0xe0   : > { %6932 = vmatmul.mubr.f32.gmra.mxu0 %v896_v14  ;;  %v8989_v14 = vand.u32 4294901760, %v312_v47  ;;  %v975_v8 = vsub.f32 %v8974_v35, %v12066_v30  ;;  %v9021_v44 = vsub.f32 %v313_v17, %v9004_v20 }
  0xe1   : > { %7054 = vmatmul.mubr.f32.gmra.mxu1 %v8808_v60  ;;  %6934 = vmatprep.mubr.f32.mxu0 %v906_v21  ;;  %v955_v21 = vsub.f32 %v8951_v22, %v12400_v56  ;;  %v936_v60 = vand.u32 4294901760, %v935_v1  ;;  %v315_v1 = vld [vmem:[%s8117_s5 + $0x1e8] sm:$0xff] }
  0xe2   : > { %7056 = vmatprep.mubr.f32.mxu1 %v8819_v57  ;;  %v946_v57 = vand.u32 4294901760, %v945_v51  ;;  %v9009_v56 = vsub.f32 %v312_v47, %v8989_v14  ;;  %v12073_v51 = vand.u32 4294901760, %v9002_v43  ;;  %v9023_v47 = vand.u32 4294901760, %v315_v1 }
  0xe3   : > { %v956_v31 = vand.u32 4294901760, %v955_v21  ;;  %v976_v17 = vand.u32 4294901760, %v975_v8 }
  0xe4   : > { %6935 = vmatmul.mubr.f32.gmra.mxu0 %v916_v36  ;;  %v9011_v36 = vand.u32 4294901760, %v314_v54 }
  0xe5   : > { %7057 = vmatmul.mubr.f32.gmra.mxu1 %v8837_v0  ;;  %6937 = vmatprep.mubr.f32.mxu0 %v926_v39  ;;  %v966_v39 = vand.u32 4294901760, %v965_v33  ;;  %v317_v33 = vld [vmem:[%s8117_s5 + $0x1f8] sm:$0xff] }
  0xe6   : > { %7059 = vmatprep.mubr.f32.mxu1 %v8854_v29  ;;  %v12402_v29 = vand.u32 4294901760, %v8987_v23  ;;  %v9031_v30 = vsub.f32 %v314_v54, %v9011_v36  ;;  %v9044_v0 = vand.u32 4294901760, %v317_v33 }
  0xe8   : > { %6938 = vmatmul.mubr.f32.gmra.mxu0 %v936_v60  ;;  %v985_v21 = vsub.f32 %v8987_v23, %v12402_v29  ;;  %v9033_v60 = vand.u32 4294901760, %v316_v28  ;;  %v9042_v29 = vsub.f32 %v315_v1, %v9023_v47  ;;  %v12403_v23 = vand.u32 4294901760, %v9009_v56 }
  0xe9   : > { %7060 = vmatmul.mubr.f32.gmra.mxu1 %v8870_v26  ;;  %6940 = vmatprep.mubr.f32.mxu0 %v946_v57  ;;  %v995_v57 = vsub.f32 %v9002_v43, %v12073_v51  ;;  %v12074_v26 = vand.u32 4294901760, %v9021_v44 }
  0xea   : > { %7062 = vmatprep.mubr.f32.mxu1 %v8879_v59  ;;  %v986_v54 = vand.u32 4294901760, %v985_v21  ;;  %v1005_v8 = vsub.f32 %v9009_v56, %v12403_v23  ;;  %v9052_v59 = vsub.f32 %v316_v28, %v9033_v60  ;;  %v9060_v21 = vsub.f32 %v317_v33, %v9044_v0 }
  0xeb   : > { %v996_v1 = vand.u32 4294901760, %v995_v57  ;;  %v1015_v51 = vsub.f32 %v9021_v44, %v12074_v26 }
  0xec   : > { %6941 = vmatmul.mubr.f32.gmra.mxu0 %v956_v31  ;;  %v12075_v31 = vand.u32 4294901760, %v9031_v30  ;;  %v1006_v23 = vand.u32 4294901760, %v1005_v8  ;;  %v12076_v33 = vand.u32 4294901760, %v9060_v21 }
  0xed   : > { %7063 = vmatmul.mubr.f32.gmra.mxu1 %v8894_v38  ;;  %6943 = vmatprep.mubr.f32.mxu0 %v966_v39  ;;  %v12078_v39 = vand.u32 4294901760, %v9042_v29  ;;  %v1016_v57 = vand.u32 4294901760, %v1015_v51 }
  0xee   : > { %7065 = vmatprep.mubr.f32.mxu1 %v8901_v2  ;;  %v1025_v28 = vsub.f32 %v9031_v30, %v12075_v31  ;;  %v1055_v51 = vsub.f32 %v9060_v21, %v12076_v33 }
  0xef   : > { %v1035_v26 = vsub.f32 %v9042_v29, %v12078_v39  ;;  %v12531_v39 = vld [vmem:[#allocation23_spill] sm:$0xff] }
  0xf0   : > { %6944 = vmatmul.mubr.f32.gmra.mxu0 %v976_v17  ;;  %v12077_v17 = vand.u32 4294901760, %v9052_v59 }
  0xf1   : > { %7066 = vmatmul.mubr.f32.gmra.mxu1 %v8913_v19  ;;  %6946 = vmatprep.mubr.f32.mxu0 %v986_v54  ;;  %v1026_v54 = vand.u32 4294901760, %v1025_v28  ;;  %v1036_v31 = vand.u32 4294901760, %v1035_v26  ;;  %v12404_v26 = vld [vmem:[#allocation26_spill] sm:$0xff]  ;;  %v12405_v28 = vld [vmem:[#allocation28_spill] sm:$0xff] }
  0xf2   : > { %7068 = vmatprep.mubr.f32.mxu1 %v8924_v12  ;;  %v1045_v8 = vsub.f32 %v9052_v59, %v12077_v17  ;;  %v12528_v17 = vld [vmem:[#allocation20_spill] sm:$0xff] }
  0xf4   : > { %6947 = vmatmul.mubr.f32.gmra.mxu0 %v996_v1  ;;  %v1046_v1 = vand.u32 4294901760, %v1045_v8  ;;  %v12409_v8 = vld [vmem:[#allocation42_spill] sm:$0xff] }
  0xf5   : > { %7069 = vmatmul.mubr.f32.gmra.mxu1 %v8928_v41  ;;  %6949 = vmatprep.mubr.f32.mxu0 %v1006_v23  ;;  %v1056_v23 = vand.u32 4294901760, %v1055_v51  ;;  %v12410_v51 = vand.u32 4294901760, %v12404_v26 }
  0xf6   : > { %7071 = vmatprep.mubr.f32.mxu1 %v8937_v55 }
  0xf8   : > { %6950 = vmatmul.mubr.f32.gmra.mxu0 %v1016_v57  ;;  %v12406_v57 = vld [vmem:[#allocation35_spill] sm:$0xff] }
  0xf9   : > { %7072 = vmatmul.mubr.f32.gmra.mxu1 %v8953_v42  ;;  %6952 = vmatprep.mubr.f32.mxu0 %v1026_v54  ;;  %v12408_v54 = vld [vmem:[#allocation37_spill] sm:$0xff]  ;;  %v12414_v33 = vand.u32 4294901760, %v12406_v57 }
  0xfa   : > { %7074 = vmatprep.mubr.f32.mxu1 %v8967_v63 }
  0xfc   : > { %6953 = vmatmul.mubr.f32.gmra.mxu0 %v1036_v31  ;;  %v12407_v31 = vld [vmem:[#allocation13_spill] sm:$0xff] }
  0xfd   : > { %7075 = vmatmul.mubr.f32.gmra.mxu1 %v8980_v52  ;;  %6955 = vmatprep.mubr.f32.mxu0 %v1046_v1  ;;  %v12411_v1 = vld [vmem:[#allocation14_spill] sm:$0xff] }
  0xfe   : > { %7077 = vmatprep.mubr.f32.mxu1 %v8989_v14 }
 0x100   : > { %6956 = vmatmul.mubr.f32.gmra.mxu0 %v1056_v23  ;;  %v12412_v23 = vand.u32 4294901760, %v12405_v28 }
 0x101   : > { %7078 = vmatmul.mubr.f32.gmra.mxu1 %v9004_v20  ;;  %7118 = vmatprep.mubr.f32.mxu0 %v12404_v26  ;;  %v12415_v26 = vand.u32 4294901760, %v12408_v54 }
 0x102   : > { %7080 = vmatprep.mubr.f32.mxu1 %v9011_v36 }
 0x104   : > { %7119 = vmatmul.mubr.f32.vlgmr.msra.gmra.mxu0 %v12405_v28  ;;  %v12416_v28 = vand.u32 4294901760, %v12409_v8 }
 0x105   : > { %7081 = vmatmul.mubr.f32.gmra.mxu1 %v9023_v47  ;;  %7121 = vmatprep.mubr.f32.mxu0 %v12406_v57  ;;  %v12420_v57 = vld [vmem:[#allocation16_spill] sm:$0xff] }
 0x106   : > { %7083 = vmatprep.mubr.f32.mxu1 %v9033_v60  ;;  %7343 = vmatpush3.msra.mxu0 %v12376_v61  ;;  %v12413_v61 = vld [vmem:[#allocation46_spill] sm:$0xff] }
 0x107   : > { %7344 = vmatprep.subr.mxu0 %v12407_v31 }
 0x108   : > { %7122 = vmatmul.mubr.f32.gmra.mxu0 %v12408_v54  ;;  %v12424_v54 = vld [vmem:[#allocation17_spill] sm:$0xff] }
 0x109   : > { %7084 = vmatmul.mubr.f32.gmra.mxu1 %v9044_v0  ;;  %7124 = vmatprep.mubr.f32.mxu0 %v12409_v8  ;;  %v12426_v8 = vand.u32 4294901760, %v8410_v40 }
 0x10a   : > { %7246 = vmatprep.mubr.f32.mxu1 %v12410_v51  ;;  %7345 = vmatpush3.msra.mxu0 %v12407_v31  ;;  %v12422_v31 = vand.u32 4294901760, %v8383_v25  ;;  %v12428_v51 = vand.u32 4294901760, %v8413_v37 }
 0x10b   : > { %7346 = vmatprep.subr.mxu0 %v12411_v1 }
 0x10c   : > { %7125 = vmatmul.mubr.f32.gmra.mxu0 %v8352_v48 }
 0x10d   : > { %7247 = vmatmul.mubr.f32.vlgmr.msra.gmra.mxu1 %v12412_v23  ;;  %7127 = vmatprep.mubr.f32.mxu0 %v12413_v61  ;;  %v12434_v23 = vld [vmem:[#allocation64_spill] sm:$0xff] }
 0x10e   : > { %7249 = vmatprep.mubr.f32.mxu1 %v12414_v33  ;;  %7471 = vmatpush3.msra.mxu1 %v8127_v3  ;;  %v12417_v3 = vld [vmem:[#allocation15_spill] sm:$0xff]  ;;  %v12419_v33 = vand.u32 4294901760, %v12413_v61 }
 0x10f   : > { %7472 = vmatprep.subr.mxu1 %v8129_v4  ;;  %7347 = vmatpush3.msra.mxu0 %v12411_v1  ;;  %v12432_v1 = vand.u32 4294901760, %v8439_v13 }
 0x110   : > { %7128 = vmatmul.mubr.f32.gmra.mxu0 %v8383_v25  ;;  %7473 = vmatpush3.msra.mxu1 %v8129_v4  ;;  %v12418_v4 = vand.u32 4294901760, %v8352_v48  ;;  %v12423_v48 = vand.u32 4294901760, %v8396_v62  ;;  %v12427_v25 = vld [vmem:[#allocation58_spill] sm:$0xff] }
 0x111   : > { %7250 = vmatmul.mubr.f32.gmra.mxu1 %v12415_v26  ;;  %7130 = vmatprep.mubr.f32.mxu0 %v8396_v62  ;;  %v12429_v62 = vld [vmem:[#allocation18_spill] sm:$0xff]  ;;  %v12436_v61 = vand.u32 4294901760, %v12427_v25 }
 0x112   : > { %7252 = vmatprep.mubr.f32.mxu1 %v12416_v28  ;;  %7474 = vmatprep.subr.mxu1 %v8131_v5  ;;  %v12438_v26 = vld [vmem:[#allocation66_spill] sm:$0xff] }
 0x113   : > { %7475 = vmatpush3.msra.mxu1 %v8131_v5  ;;  %7348 = vmatprep.subr.mxu0 %v12417_v3  ;;  %v12421_v5 = vld [vmem:[#allocation53_spill] sm:$0xff] }
 0x114   : > { %7131 = vmatmul.mubr.f32.gmra.mxu0 %v8410_v40  ;;  %7476 = vmatprep.subr.mxu1 %v8133_v9  ;;  %v12431_v40 = vld [vmem:[#allocation62_spill] sm:$0xff] }
 0x115   : > { %7253 = vmatmul.mubr.f32.gmra.mxu1 %v12418_v4  ;;  %7133 = vmatprep.mubr.f32.mxu0 %v8413_v37  ;;  %v12433_v37 = vld [vmem:[#allocation19_spill] sm:$0xff]  ;;  %v12440_v28 = vand.u32 4294901760, %v12431_v40  ;;  %v12444_v4 = vld [vmem:[#allocation29_spill] sm:$0xff] }
 0x116   : > { %7255 = vmatprep.mubr.f32.mxu1 %v12419_v33  ;;  %7349 = vmatpush3.msra.mxu0 %v12417_v3  ;;  %v12441_v3 = vld [vmem:[#allocation22_spill] sm:$0xff]  ;;  %v12445_v33 = vld [vmem:[#allocation71_spill] sm:$0xff] }
 0x117   : > { %7477 = vmatpush3.msra.mxu1 %v8133_v9  ;;  %7350 = vmatprep.subr.mxu0 %v12420_v57  ;;  %v12425_v9 = vld [vmem:[#allocation56_spill] sm:$0xff] }
 0x118   : > { %7134 = vmatmul.mubr.f32.gmra.mxu0 %v12421_v5  ;;  %7478 = vmatprep.subr.mxu1 %v8135_v10 }
 0x119   : > { %7256 = vmatmul.mubr.f32.gmra.mxu1 %v12422_v31  ;;  %7136 = vmatprep.mubr.f32.mxu0 %v8439_v13  ;;  %v12437_v13 = vld [vmem:[#allocation21_spill] sm:$0xff]  ;;  %v12451_v31 = vld [vmem:[#allocation76_spill] sm:$0xff] }
 0x11a   : > { %7258 = vmatprep.mubr.f32.mxu1 %v12423_v48  ;;  %7351 = vmatpush3.msra.mxu0 %v12420_v57  ;;  %v12447_v57 = vand.u32 4294901760, %v8541_v45  ;;  %v12452_v48 = vand.u32 4294901760, %v8566_v6 }
 0x11b   : > { %7479 = vmatpush3.msra.mxu1 %v8135_v10  ;;  %7352 = vmatprep.subr.mxu0 %v12424_v54  ;;  %v12430_v10 = vand.u32 4294901760, %v12421_v5  ;;  %v12449_v5 = vld [vmem:[#allocation75_spill] sm:$0xff] }
 0x11c   : > { %7137 = vmatmul.mubr.f32.gmra.mxu0 %v12425_v9  ;;  %7480 = vmatprep.subr.mxu1 %v8137_v11 }
 0x11d   : > { %7259 = vmatmul.mubr.f32.gmra.mxu1 %v12426_v8  ;;  %7139 = vmatprep.mubr.f32.mxu0 %v12427_v25  ;;  %v12460_v8 = vand.u32 4294901760, %v12449_v5  ;;  %v12461_v25 = vld [vmem:[#allocation83_spill] sm:$0xff] }
 0x11e   : > { %7261 = vmatprep.mubr.f32.mxu1 %v12428_v51  ;;  %7353 = vmatpush3.msra.mxu0 %v12424_v54  ;;  %v12454_v54 = vld [vmem:[#allocation78_spill] sm:$0xff]  ;;  %v12462_v51 = vand.u32 4294901760, %v12451_v31 }
 0x11f   : > { %7354 = vmatprep.subr.mxu0 %v12429_v62  ;;  %7481 = vmatpush3.msra.mxu1 %v8137_v11  ;;  %v12435_v11 = vand.u32 4294901760, %v12425_v9  ;;  %v12458_v9 = vld [vmem:[#allocation81_spill] sm:$0xff] }
 0x120   : > { %7140 = vmatmul.mubr.f32.gmra.mxu0 %v8477_v58  ;;  %7482 = vmatprep.subr.mxu1 %v8146_v16 }
 0x121   : > { %7262 = vmatmul.mubr.f32.gmra.mxu1 %v12430_v10  ;;  %7142 = vmatprep.mubr.f32.mxu0 %v12431_v40  ;;  %v12466_v10 = vld [vmem:[#allocation88_spill] sm:$0xff]  ;;  %v12467_v40 = vand.u32 4294901760, %v8644_v18 }
 0x122   : > { %7264 = vmatprep.mubr.f32.mxu1 %v12432_v1  ;;  %7355 = vmatpush3.msra.mxu0 %v12429_v62  ;;  %v12464_v62 = vld [vmem:[#allocation86_spill] sm:$0xff]  ;;  %v12468_v1 = vld [vmem:[#allocation48_spill] sm:$0xff] }
 0x123   : > { %7356 = vmatprep.subr.mxu0 %v12433_v37  ;;  %7483 = vmatpush3.msra.mxu1 %v8146_v16  ;;  %v12439_v16 = vand.u32 4294901760, %v8477_v58  ;;  %v12443_v58 = vand.u32 4294901760, %v8508_v53 }
 0x124   : > { %7143 = vmatmul.mubr.f32.gmra.mxu0 %v12434_v23  ;;  %7484 = vmatprep.subr.mxu1 %v8168_v24 }
 0x125   : > { %7265 = vmatmul.mubr.f32.gmra.mxu1 %v12435_v11  ;;  %7145 = vmatprep.mubr.f32.mxu0 %v8508_v53  ;;  %v12448_v53 = vld [vmem:[#allocation31_spill] sm:$0xff]  ;;  %v12470_v11 = vld [vmem:[#allocation36_spill] sm:$0xff] }
 0x126   : > { %7267 = vmatprep.mubr.f32.mxu1 %v12436_v61  ;;  %7357 = vmatpush3.msra.mxu0 %v12433_v37  ;;  %v12471_v61 = vand.u32 4294901760, %v12458_v9 }
 0x127   : > { %7358 = vmatprep.subr.mxu0 %v12437_v13  ;;  %7485 = vmatpush3.msra.mxu1 %v8168_v24  ;;  %v12442_v24 = vand.u32 4294901760, %v12434_v23  ;;  %v12469_v23 = vld [vmem:[#allocation89_spill] sm:$0xff] }
 0x128   : > { %7146 = vmatmul.mubr.f32.gmra.mxu0 %v12438_v26  ;;  %7486 = vmatprep.subr.mxu1 %v8174_v27 }
 0x129   : > { %7268 = vmatmul.mubr.f32.gmra.mxu1 %v12439_v16  ;;  %7148 = vmatprep.mubr.f32.mxu0 %v8541_v45  ;;  %v12453_v45 = vld [vmem:[#allocation32_spill] sm:$0xff] }
 0x12a   : > { %7270 = vmatprep.mubr.f32.mxu1 %v12440_v28  ;;  %7359 = vmatpush3.msra.mxu0 %v12437_v13  ;;  %v12472_v13 = vld [vmem:[#allocation91_spill] sm:$0xff]  ;;  %v12474_v28 = vld [vmem:[#allocation93_spill] sm:$0xff] }
 0x12b   : > { %7360 = vmatprep.subr.mxu0 %v12441_v3  ;;  %7487 = vmatpush3.msra.mxu1 %v8174_v27  ;;  %v12446_v27 = vand.u32 4294901760, %v12438_v26 }
 0x12c   : > { %7149 = vmatmul.mubr.f32.gmra.mxu0 %v8560_v15  ;;  %7488 = vmatprep.subr.mxu1 %v8193_v34 }
 0x12d   : > { %7271 = vmatmul.mubr.f32.gmra.mxu1 %v12442_v24  ;;  %7151 = vmatprep.mubr.f32.mxu0 %v8566_v6  ;;  %v12457_v6 = vld [vmem:[#allocation41_spill] sm:$0xff]  ;;  %v12476_v24 = vld [vmem:[#allocation95_spill] sm:$0xff] }
 0x12e   : > { %7273 = vmatprep.mubr.f32.mxu1 %v12443_v58  ;;  %7361 = vmatpush3.msra.mxu0 %v12441_v3  ;;  %v12475_v3 = vand.u32 4294901760, %v12464_v62 }
 0x12f   : > { %7362 = vmatprep.subr.mxu0 %v12444_v4  ;;  %7489 = vmatpush3.msra.mxu1 %v8193_v34  ;;  %v12450_v34 = vand.u32 4294901760, %v8560_v15  ;;  %v12456_v15 = vand.u32 4294901760, %v8595_v7 }
 0x130   : > { %7152 = vmatmul.mubr.f32.gmra.mxu0 %v12445_v33  ;;  %7490 = vmatprep.subr.mxu1 %v8211_v46 }
 0x131   : > { %7274 = vmatmul.mubr.f32.gmra.mxu1 %v12446_v27  ;;  %7154 = vmatprep.mubr.f32.mxu0 %v8595_v7  ;;  %v12463_v7 = vld [vmem:[#allocation44_spill] sm:$0xff] }
 0x132   : > { %7276 = vmatprep.mubr.f32.mxu1 %v12447_v57  ;;  %7363 = vmatpush3.msra.mxu0 %v12444_v4  ;;  %v12478_v57 = vld [vmem:[#allocation24_spill] sm:$0xff] }
 0x133   : > { %7364 = vmatprep.subr.mxu0 %v12448_v53  ;;  %7491 = vmatpush3.msra.mxu1 %v8211_v46  ;;  %v12455_v46 = vand.u32 4294901760, %v12445_v33  ;;  %v12477_v33 = vand.u32 4294901760, %v12466_v10 }
 0x134   : > { %7155 = vmatmul.mubr.f32.gmra.mxu0 %v12449_v5  ;;  %7492 = vmatprep.subr.mxu1 %v8218_v49  ;;  %v12479_v5 = vand.u32 4294901760, %v12469_v23 }
 0x135   : > { %7277 = vmatmul.mubr.f32.gmra.mxu1 %v12450_v34  ;;  %7157 = vmatprep.mubr.f32.mxu0 %v12451_v31  ;;  %v12480_v34 = vld [vmem:[#allocation98_spill] sm:$0xff] }
 0x136   : > { %7279 = vmatprep.mubr.f32.mxu1 %v12452_v48  ;;  %7365 = vmatpush3.msra.mxu0 %v12448_v53 }
 0x137   : > { %7366 = vmatprep.subr.mxu0 %v12453_v45  ;;  %7493 = vmatpush3.msra.mxu1 %v8218_v49  ;;  %v12459_v49 = vld [vmem:[#allocation25_spill] sm:$0xff] }
 0x138   : > { %7158 = vmatmul.mubr.f32.gmra.mxu0 %v12454_v54  ;;  %7494 = vmatprep.subr.mxu1 %v8220_v50 }
 0x139   : > { %7280 = vmatmul.mubr.f32.gmra.mxu1 %v12455_v46  ;;  %7160 = vmatprep.mubr.f32.mxu0 %v8644_v18  ;;  %v12473_v18 = vand.u32 4294901760, %v12461_v25  ;;  %v12481_v46 = vand.u32 4294901760, %v12472_v13 }
 0x13a   : > { %7282 = vmatprep.mubr.f32.mxu1 %v12456_v15  ;;  %7367 = vmatpush3.msra.mxu0 %v12453_v45 }
 0x13b   : > { %7368 = vmatprep.subr.mxu0 %v12457_v6  ;;  %7495 = vmatpush3.msra.mxu1 %v8220_v50  ;;  %v12465_v50 = vand.u32 4294901760, %v12454_v54 }
 0x13c   : > { %7161 = vmatmul.mubr.f32.gmra.mxu0 %v12458_v9  ;;  %7496 = vmatprep.subr.mxu1 %v12459_v49 }
 0x13d   : > { %7283 = vmatmul.mubr.f32.gmra.mxu1 %v12460_v8  ;;  %7163 = vmatprep.mubr.f32.mxu0 %v12461_v25  ;;  %v12483_v25 = vand.u32 4294901760, %v12474_v28 }
 0x13e   : > { %7285 = vmatprep.mubr.f32.mxu1 %v12462_v51  ;;  %7369 = vmatpush3.msra.mxu0 %v12457_v6  ;;  %v12484_v51 = vld [vmem:[#allocation101_spill] sm:$0xff] }
 0x13f   : > { %7370 = vmatprep.subr.mxu0 %v12463_v7  ;;  %7497 = vmatpush3.msra.mxu1 %v12459_v49  ;;  %v12482_v49 = vld [vmem:[#allocation34_spill] sm:$0xff] }
 0x140   : > { %7164 = vmatmul.mubr.f32.gmra.mxu0 %v12464_v62  ;;  %7498 = vmatprep.subr.mxu1 %v12362_v32 }
 0x141   : > { %7286 = vmatmul.mubr.f32.gmra.mxu1 %v12465_v50  ;;  %7166 = vmatprep.mubr.f32.mxu0 %v12466_v10 }
 0x142   : > { %7288 = vmatprep.mubr.f32.mxu1 %v12467_v40  ;;  %7371 = vmatpush3.msra.mxu0 %v12463_v7  ;;  %v12485_v40 = vand.u32 4294901760, %v12476_v24 }
 0x143   : > { %7372 = vmatprep.subr.mxu0 %v12468_v1  ;;  %7499 = vmatpush3.msra.mxu1 %v12362_v32  ;;  %v9250_v32 = vld [vmem:[%s11832_s2] ss:$0 sm:$0xff] }
 0x144   : > { %v6864_v37 = vpop.f32.mrf.mxu0  ;;  %7167 = vmatmul.mubr.f32.gmra.mxu0 %v12469_v23  ;;  %7500 = vmatprep.subr.mxu1 %v12470_v11 }
 0x145   : > { %7289 = vmatmul.mubr.f32.gmra.mxu1 %v12471_v61  ;;  %7169 = vmatprep.mubr.f32.mxu0 %v12472_v13  ;;  %v439_v58 = vadd.f32 %v6864_v37, %v9250_v32  ;;  %v12487_v13 = vand.u32 4294901760, %v12478_v57 }
 0x146   : > { %v428_v26 = vpop.f32.mrf.mxu0  ;;  %7291 = vmatprep.mubr.f32.mxu1 %v12473_v18  ;;  %7373 = vmatpush3.msra.mxu0 %v12468_v1 }
 0x147   : > { %7501 = vmatpush3.msra.mxu1 %v12470_v11  ;;  %v429_v31 = vadd.f32 %v9250_v32, %v428_v26  ;;  %v12486_v11 = vld [vmem:[#allocation38_spill] sm:$0xff]  ;;  %v12488_v26 = vld [vmem:[#allocation104_spill] sm:$0xff] }
 0x148   : > { %v6867_v16 = vpop.f32.mrf.mxu0  ;;  %7170 = vmatmul.mubr.f32.gmra.mxu0 %v12474_v28 }
 0x149   : > { %7292 = vmatmul.mubr.f32.gmra.mxu1 %v12475_v3  ;;  %7172 = vmatprep.mubr.f32.mxu0 %v12476_v24  ;;  %v459_v48 = vadd.f32 %v6867_v16, %v9250_v32  ;;  %v12489_v24 = vand.u32 4294901760, %v12480_v34 }
 0x14a   : > { %v448_v4 = vpop.f32.mrf.mxu0  ;;  %7294 = vmatprep.mubr.f32.mxu1 %v12477_v33 }
 0x14b   : > { %v449_v7 = vadd.f32 %v9250_v32, %v448_v4 }
 0x14c   : > { %v6870_v27 = vpop.f32.mrf.mxu0  ;;  %7173 = vmatmul.mubr.f32.gmra.mxu0 %v12478_v57 }
 0x14d   : > { %v6992_v53 = vpop.f32.mrf.mxu1  ;;  %7295 = vmatmul.mubr.f32.gmra.mxu1 %v12479_v5  ;;  %7175 = vmatprep.mubr.f32.mxu0 %v12480_v34  ;;  %v479_v62 = vadd.f32 %v6870_v27, %v9250_v32  ;;  %v12490_v27 = vld [vmem:[#allocation105_spill] sm:$0xff]  ;;  %v12492_v5 = vld [vmem:[#allocation107_spill] sm:$0xff] }
 0x14e   : > { %v9266_v45 = vadd.f32 %v6992_v53, %v439_v58  ;;  %v468_v54 = vpop.f32.mrf.mxu0  ;;  %7297 = vmatprep.mubr.f32.mxu1 %v12481_v46  ;;  %v12491_v53 = vand.u32 4294901760, %v12482_v49  ;;  %v12493_v46 = vand.u32 4294901760, %v12484_v51 }
 0x14f   : > { %v1209_v15 = vpop.f32.mrf.mxu1  ;;  %v469_v18 = vadd.f32 %v9250_v32, %v468_v54 }
 0x150   : > { %v9270_v6 = vadd.f32 %v1209_v15, %v429_v31  ;;  %v6873_v9 = vpop.f32.mrf.mxu0  ;;  %7176 = vmatmul.mubr.f32.gmra.mxu0 %v12482_v49 }
 0x151   : > { %v6995_v8 = vpop.f32.mrf.mxu1  ;;  %7298 = vmatmul.mubr.f32.gmra.mxu1 %v12483_v25  ;;  %7178 = vmatprep.mubr.f32.mxu0 %v12484_v51  ;;  %v499_v16 = vadd.f32 %v6873_v9, %v9250_v32  ;;  %v12494_v25 = vld [vmem:[#allocation109_spill] sm:$0xff] }
 0x152   : > { %v9278_v50 = vadd.f32 %v6995_v8, %v459_v48  ;;  %v488_v10 = vpop.f32.mrf.mxu0  ;;  %7300 = vmatprep.mubr.f32.mxu1 %v12485_v40 }
 0x153   : > { %v1221_v1 = vpop.f32.mrf.mxu1  ;;  %v489_v31 = vadd.f32 %v9250_v32, %v488_v10 }
 0x154   : > { %v9282_v37 = vadd.f32 %v1221_v1, %v449_v7  ;;  %v6876_v23 = vpop.f32.mrf.mxu0  ;;  %7179 = vmatmul.mubr.f32.gmra.mxu0 %v12486_v11  ;;  %v12495_v7 = vand.u32 4294901760, %v12486_v11 }
 0x155   : > { %v6998_v61 = vpop.f32.mrf.mxu1  ;;  %7301 = vmatmul.mubr.f32.gmra.mxu1 %v12487_v13  ;;  %7181 = vmatprep.mubr.f32.mxu0 %v12488_v26  ;;  %v519_v48 = vadd.f32 %v6876_v23, %v9250_v32  ;;  %v12497_v23 = vand.u32 4294901760, %v12488_v26 }
 0x156   : > { %v9290_v28 = vadd.f32 %v6998_v61, %v479_v62  ;;  %v508_v3 = vpop.f32.mrf.mxu0  ;;  %7303 = vmatprep.mubr.f32.mxu1 %v12489_v24  ;;  %v12496_v62 = vld [vmem:[#allocation110_spill] sm:$0xff]  ;;  %v12499_v24 = vand.u32 4294901760, %v12490_v27 }
 0x157   : > { %v1233_v58 = vpop.f32.mrf.mxu1  ;;  %v509_v10 = vadd.f32 %v9250_v32, %v508_v3 }
 0x158   : > { %v9294_v4 = vadd.f32 %v1233_v58, %v469_v18  ;;  %v6879_v33 = vpop.f32.mrf.mxu0  ;;  %7182 = vmatmul.mubr.f32.gmra.mxu0 %v12490_v27  ;;  %v12500_v58 = vld [vmem:[#allocation113_spill] sm:$0xff] }
 0x159   : > { %v7001_v57 = vpop.f32.mrf.mxu1  ;;  %7304 = vmatmul.mubr.f32.gmra.mxu1 %v12491_v53  ;;  %7184 = vmatprep.mubr.f32.mxu0 %v12492_v5  ;;  %v539_v40 = vadd.f32 %v6879_v33, %v9250_v32  ;;  %v12501_v53 = vand.u32 4294901760, %v12492_v5 }
 0x15a   : > { %v9302_v54 = vadd.f32 %v7001_v57, %v499_v16  ;;  %v528_v34 = vpop.f32.mrf.mxu0  ;;  %7306 = vmatprep.mubr.f32.mxu1 %v12493_v46  ;;  %v12498_v16 = vld [vmem:[#allocation112_spill] sm:$0xff] }
 0x15b   : > { %v1245_v15 = vpop.f32.mrf.mxu1  ;;  %v529_v3 = vadd.f32 %v9250_v32, %v528_v34 }
 0x15c   : > { %v9306_v9 = vadd.f32 %v1245_v15, %v489_v31  ;;  %v6882_v8 = vpop.f32.mrf.mxu0  ;;  %7185 = vmatmul.mubr.f32.gmra.mxu0 %v12494_v25  ;;  %v12502_v15 = vld [vmem:[#allocation114_spill] sm:$0xff] }
 0x15d   : > { %v7004_v49 = vpop.f32.mrf.mxu1  ;;  %7307 = vmatmul.mubr.f32.gmra.mxu1 %v12495_v7  ;;  %7187 = vmatprep.mubr.f32.mxu0 %v12496_v62  ;;  %v559_v33 = vadd.f32 %v6882_v8, %v9250_v32  ;;  %v12504_v7 = vld [vmem:[#allocation115_spill] sm:$0xff] }
 0x15e   : > { %v9314_v1 = vadd.f32 %v7004_v49, %v519_v48  ;;  %v548_v51 = vpop.f32.mrf.mxu0  ;;  %7309 = vmatprep.mubr.f32.mxu1 %v12497_v23  ;;  %v12503_v49 = vand.u32 4294901760, %v12494_v25 }
 0x15f   : > { %v1257_v61 = vpop.f32.mrf.mxu1  ;;  %v549_v34 = vadd.f32 %v9250_v32, %v548_v51 }
 0x160   : > { %v9318_v13 = vadd.f32 %v1257_v61, %v509_v10  ;;  %v6885_v18 = vpop.f32.mrf.mxu0  ;;  %7188 = vmatmul.mubr.f32.gmra.mxu0 %v12498_v16 }
 0x161   : > { %v7007_v11 = vpop.f32.mrf.mxu1  ;;  %7310 = vmatmul.mubr.f32.gmra.mxu1 %v12499_v24  ;;  %7190 = vmatprep.mubr.f32.mxu0 %v12500_v58  ;;  %v579_v8 = vadd.f32 %v6885_v18, %v9250_v32  ;;  %v12506_v24 = vld [vmem:[#allocation116_spill] sm:$0xff] }
 0x162   : > { %v9326_v57 = vadd.f32 %v7007_v11, %v539_v40  ;;  %v568_v26 = vpop.f32.mrf.mxu0  ;;  %7312 = vmatprep.mubr.f32.mxu1 %v12501_v53  ;;  %v12505_v40 = vand.u32 4294901760, %v12496_v62  ;;  %v12508_v53 = vld [vmem:[#allocation117_spill] sm:$0xff] }
 0x163   : > { %v1269_v31 = vpop.f32.mrf.mxu1  ;;  %v569_v51 = vadd.f32 %v9250_v32, %v568_v26 }
 0x164   : > { %v9330_v48 = vadd.f32 %v1269_v31, %v529_v3  ;;  %v6888_v46 = vpop.f32.mrf.mxu0  ;;  %7191 = vmatmul.mubr.f32.gmra.mxu0 %v12502_v15  ;;  %v12507_v3 = vand.u32 4294901760, %v12498_v16  ;;  %v12509_v31 = vand.u32 4294901760, %v12500_v58 }
 0x165   : > { %v7010_v27 = vpop.f32.mrf.mxu1  ;;  %7313 = vmatmul.mubr.f32.gmra.mxu1 %v12503_v49  ;;  %7193 = vmatprep.mubr.f32.mxu0 %v12504_v7  ;;  %v599_v18 = vadd.f32 %v6888_v46, %v9250_v32 }
 0x166   : > { %v9338_v10 = vadd.f32 %v7010_v27, %v559_v33  ;;  %v588_v5 = vpop.f32.mrf.mxu0  ;;  %7315 = vmatprep.mubr.f32.mxu1 %v12505_v40  ;;  %v12510_v40 = vand.u32 4294901760, %v12502_v15 }
 0x167   : > { %v1281_v23 = vpop.f32.mrf.mxu1  ;;  %v589_v26 = vadd.f32 %v9250_v32, %v588_v5 }
 0x168   : > { %v9342_v61 = vadd.f32 %v1281_v23, %v549_v34  ;;  %v6891_v11 = vpop.f32.mrf.mxu0  ;;  %7194 = vmatmul.mubr.f32.gmra.mxu0 %v12506_v24  ;;  %v12511_v23 = vld [vmem:[#allocation118_spill] sm:$0xff] }
 0x169   : > { %v7013_v25 = vpop.f32.mrf.mxu1  ;;  %7316 = vmatmul.mubr.f32.gmra.mxu1 %v12507_v3  ;;  %7196 = vmatprep.mubr.f32.mxu0 %v12508_v53  ;;  %v619_v46 = vadd.f32 %v6891_v11, %v9250_v32 }
 0x16a   : > { %v9350_v33 = vadd.f32 %v7013_v25, %v579_v8  ;;  %v608_v62 = vpop.f32.mrf.mxu0  ;;  %7318 = vmatprep.mubr.f32.mxu1 %v12509_v31  ;;  %v12512_v25 = vand.u32 4294901760, %v12504_v7 }
 0x16b   : > { %v1293_v27 = vpop.f32.mrf.mxu1  ;;  %v609_v5 = vadd.f32 %v9250_v32, %v608_v62 }
 0x16c   : > { %v9354_v49 = vadd.f32 %v1293_v27, %v569_v51  ;;  %v6894_v34 = vpop.f32.mrf.mxu0  ;;  %7197 = vmatmul.mubr.f32.gmra.mxu0 %v8951_v22  ;;  %v12514_v27 = vand.u32 4294901760, %v12506_v24 }
 0x16d   : > { %v7016_v16 = vpop.f32.mrf.mxu1  ;;  %7319 = vmatmul.mubr.f32.gmra.mxu1 %v12510_v40  ;;  %7199 = vmatprep.mubr.f32.mxu0 %v12511_v23  ;;  %v12515_v40 = vld [vmem:[#allocation119_spill] sm:$0xff]  ;;  %v639_v11 = vadd.f32 %v6894_v34, %v9250_v32 }
 0x16e   : > { %v9362_v8 = vadd.f32 %v7016_v16, %v599_v18  ;;  %v628_v58 = vpop.f32.mrf.mxu0  ;;  %7321 = vmatprep.mubr.f32.mxu1 %v12512_v25  ;;  %v12516_v16 = vand.u32 4294901760, %v12508_v53 }
 0x16f   : > { %v1305_v3 = vpop.f32.mrf.mxu1  ;;  %v629_v62 = vadd.f32 %v9250_v32, %v628_v58 }
 0x170   : > { %v9366_v51 = vadd.f32 %v1305_v3, %v589_v26  ;;  %v6897_v31 = vpop.f32.mrf.mxu0  ;;  %7200 = vmatmul.mubr.f32.gmra.mxu0 %v8974_v35 }
 0x171   : > { %v7019_v15 = vpop.f32.mrf.mxu1  ;;  %7322 = vmatmul.mubr.f32.gmra.mxu1 %v12514_v27  ;;  %7202 = vmatprep.mubr.f32.mxu0 %v12515_v40  ;;  %v12518_v27 = vand.u32 4294901760, %v8951_v22  ;;  %v659_v34 = vadd.f32 %v6897_v31, %v9250_v32 }
 0x172   : > { %12513 = vst [vmem:[#allocation26_spill] sm:$0xff] %v9366_v51  ;;  %v9374_v18 = vadd.f32 %v7019_v15, %v619_v46  ;;  %v648_v7 = vpop.f32.mrf.mxu0  ;;  %7324 = vmatprep.mubr.f32.mxu1 %v12516_v16  ;;  %v12519_v15 = vand.u32 4294901760, %v12511_v23  ;;  %v12546_v51 = vld [vmem:[#allocation49_spill] sm:$0xff] }
 0x173   : > { %v1317_v26 = vpop.f32.mrf.mxu1  ;;  %v649_v58 = vadd.f32 %v9250_v32, %v648_v7 }
 0x174   : > { %v9378_v25 = vadd.f32 %v1317_v26, %v609_v5  ;;  %v6900_v3 = vpop.f32.mrf.mxu0  ;;  %7203 = vmatmul.mubr.f32.gmra.mxu0 %v9002_v43 }
 0x175   : > { %v7022_v24 = vpop.f32.mrf.mxu1  ;;  %7325 = vmatmul.mubr.f32.gmra.mxu1 %v12518_v27  ;;  %7205 = vmatprep.mubr.f32.mxu0 %v9009_v56  ;;  %v12521_v27 = vand.u32 4294901760, %v8974_v35  ;;  %v679_v31 = vadd.f32 %v6900_v3, %v9250_v32 }
 0x176   : > { %12517 = vst [vmem:[#allocation28_spill] sm:$0xff] %v9378_v25  ;;  %v9386_v46 = vadd.f32 %v7022_v24, %v639_v11  ;;  %v668_v53 = vpop.f32.mrf.mxu0  ;;  %7327 = vmatprep.mubr.f32.mxu1 %v12519_v15  ;;  %v12522_v24 = vand.u32 4294901760, %v12515_v40 }
 0x177   : > { %v1329_v5 = vpop.f32.mrf.mxu1  ;;  %v669_v7 = vadd.f32 %v9250_v32, %v668_v53 }
 0x178   : > { %v9390_v16 = vadd.f32 %v1329_v5, %v629_v62  ;;  %v6903_v26 = vpop.f32.mrf.mxu0  ;;  %7206 = vmatmul.mubr.f32.gmra.mxu0 %v9021_v44 }
 0x179   : > { %v7025_v22 = vpop.f32.mrf.mxu1  ;;  %7328 = vmatmul.mubr.f32.gmra.mxu1 %v12521_v27  ;;  %7208 = vmatprep.mubr.f32.mxu0 %v9031_v30  ;;  %v12524_v27 = vand.u32 4294901760, %v9002_v43  ;;  %v699_v3 = vadd.f32 %v6903_v26, %v9250_v32 }
 0x17a   : > { %12520 = vst [vmem:[#allocation35_spill] sm:$0xff] %v9390_v16  ;;  %v9398_v11 = vadd.f32 %v7025_v22, %v659_v34  ;;  %v688_v23 = vpop.f32.mrf.mxu0  ;;  %7330 = vmatprep.mubr.f32.mxu1 %v12522_v24  ;;  %v12525_v22 = vand.u32 4294901760, %v9009_v56  ;;  %v12537_v16 = vld [vmem:[#allocation39_spill] sm:$0xff] }
 0x17b   : > { %v1341_v62 = vpop.f32.mrf.mxu1  ;;  %v689_v53 = vadd.f32 %v9250_v32, %v688_v23 }
 0x17c   : > { %v9402_v15 = vadd.f32 %v1341_v62, %v649_v58  ;;  %v6906_v5 = vpop.f32.mrf.mxu0  ;;  %7209 = vmatmul.mubr.f32.gmra.mxu0 %v9042_v29 }
 0x17d   : > { %v7028_v35 = vpop.f32.mrf.mxu1  ;;  %7331 = vmatmul.mubr.f32.gmra.mxu1 %v12524_v27  ;;  %7211 = vmatprep.mubr.f32.mxu0 %v9052_v59  ;;  %v12527_v27 = vand.u32 4294901760, %v9021_v44  ;;  %v719_v26 = vadd.f32 %v6906_v5, %v9250_v32 }
 0x17e   : > { %12523 = vst [vmem:[#allocation13_spill] sm:$0xff] %v9402_v15  ;;  %v9410_v34 = vadd.f32 %v7028_v35, %v679_v31  ;;  %v708_v40 = vpop.f32.mrf.mxu0  ;;  %7333 = vmatprep.mubr.f32.mxu1 %v12525_v22  ;;  %v12529_v35 = vand.u32 4294901760, %v9031_v30  ;;  %v12533_v15 = vld [vmem:[#allocation30_spill] sm:$0xff] }
 0x17f   : > { %v1353_v58 = vpop.f32.mrf.mxu1  ;;  %v709_v23 = vadd.f32 %v9250_v32, %v708_v40 }
 0x180   : > { %v9414_v24 = vadd.f32 %v1353_v58, %v669_v7  ;;  %v6909_v62 = vpop.f32.mrf.mxu0  ;;  %7212 = vmatmul.mubr.f32.gmra.mxu0 %v9060_v21 }
 0x181   : > { %v7031_v43 = vpop.f32.mrf.mxu1  ;;  %7334 = vmatmul.mubr.f32.gmra.mxu1 %v12527_v27  ;;  %7374 = vmatprep.mubr.f32.mxu0 %v12528_v17  ;;  %v12532_v27 = vand.u32 4294901760, %v9042_v29  ;;  %v739_v5 = vadd.f32 %v6909_v62, %v9250_v32 }
 0x182   : > { %12526 = vst [vmem:[#allocation37_spill] sm:$0xff] %v9414_v24  ;;  %v9422_v31 = vadd.f32 %v7031_v43, %v699_v3  ;;  %v728_v56 = vpop.f32.mrf.mxu0  ;;  %7336 = vmatprep.mubr.f32.mxu1 %v12529_v35  ;;  %v12534_v43 = vand.u32 4294901760, %v9052_v59  ;;  %v12535_v24 = vld [vmem:[#allocation33_spill] sm:$0xff] }
 0x183   : > { %v1365_v7 = vpop.f32.mrf.mxu1  ;;  %v729_v40 = vadd.f32 %v9250_v32, %v728_v56 }
 0x184   : > { %v9426_v22 = vadd.f32 %v1365_v7, %v689_v53  ;;  %v6912_v58 = vpop.f32.mrf.mxu0  ;;  %7375 = vmatmul.mubr.f32.vlgmr.msra.gmra.mxu0 %v12531_v39 }
 0x185   : > { %v7034_v44 = vpop.f32.mrf.mxu1  ;;  %7337 = vmatmul.mubr.f32.gmra.mxu1 %v12532_v27  ;;  %7377 = vmatprep.mubr.f32.mxu0 %v12533_v15  ;;  %v12536_v27 = vand.u32 4294901760, %v9060_v21  ;;  %v759_v62 = vadd.f32 %v6912_v58, %v9250_v32  ;;  %v12539_v21 = vld [vmem:[#allocation43_spill] sm:$0xff] }
 0x186   : > { %12530 = vst [vmem:[#allocation42_spill] sm:$0xff] %v9426_v22  ;;  %v9434_v3 = vadd.f32 %v7034_v44, %v719_v26  ;;  %v748_v30 = vpop.f32.mrf.mxu0  ;;  %7339 = vmatprep.mubr.f32.mxu1 %v12534_v43 }
 0x187   : > { %v1377_v53 = vpop.f32.mrf.mxu1  ;;  %v749_v56 = vadd.f32 %v9250_v32, %v748_v30 }
 0x188   : > { %v9438_v35 = vadd.f32 %v1377_v53, %v709_v23  ;;  %v6915_v7 = vpop.f32.mrf.mxu0  ;;  %7378 = vmatmul.mubr.f32.gmra.mxu0 %v12535_v24  ;;  %v12538_v53 = vld [vmem:[#allocation40_spill] sm:$0xff] }
 0x189   : > { %v7037_v29 = vpop.f32.mrf.mxu1  ;;  %7340 = vmatmul.mubr.f32.gmra.mxu1 %v12536_v27  ;;  %7380 = vmatprep.mubr.f32.mxu0 %v12537_v16  ;;  %v779_v58 = vadd.f32 %v6915_v7, %v9250_v32 }
 0x18a   : > { %v9446_v26 = vadd.f32 %v7037_v29, %v739_v5  ;;  %v768_v59 = vpop.f32.mrf.mxu0  ;;  %7502 = vmatprep.mubr.f32.mxu1 %v12528_v17 }
 0x18b   : > { %v1389_v44 = vpop.f32.mrf.mxu1  ;;  %v769_v30 = vadd.f32 %v9250_v32, %v768_v59 }
 0x18c   : > { %v9449_v23 = vadd.f32 %v1389_v44, %v729_v40  ;;  %v6918_v43 = vpop.f32.mrf.mxu0  ;;  %7381 = vmatmul.mubr.f32.gmra.mxu0 %v12538_v53  ;;  %v12542_v44 = vld [vmem:[#allocation45_spill] sm:$0xff] }
 0x18d   : > { %v7040_v22 = vpop.f32.mrf.mxu1  ;;  %7503 = vmatmul.mubr.f32.vlgmr.msra.gmra.mxu1 %v12531_v39  ;;  %7383 = vmatprep.mubr.f32.mxu0 %v12539_v21  ;;  %v12543_v39 = vld [vmem:[#allocation47_spill] sm:$0xff]  ;;  %v799_v7 = vadd.f32 %v6918_v43, %v9250_v32 }
 0x18e   : > { %v9456_v5 = vadd.f32 %v7040_v22, %v759_v62  ;;  %v788_v29 = vpop.f32.mrf.mxu0  ;;  %7505 = vmatprep.mubr.f32.mxu1 %v12533_v15 }
 0x18f   : > { %v1401_v17 = vpop.f32.mrf.mxu1  ;;  %v789_v59 = vadd.f32 %v9250_v32, %v788_v29 }
 0x190   : > { %12540 = vst [vmem:[#allocation14_spill] sm:$0xff] %v9456_v5  ;;  %v9459_v27 = vadd.f32 %v1401_v17, %v749_v56  ;;  %v6921_v40 = vpop.f32.mrf.mxu0  ;;  %7384 = vmatmul.mubr.f32.gmra.mxu0 %v12542_v44  ;;  %v12594_v5 = vld [vmem:[#allocation87_spill] sm:$0xff] }
 0x191   : > { %v7043_v25 = vpop.f32.mrf.mxu1  ;;  %7506 = vmatmul.mubr.f32.gmra.mxu1 %v12535_v24  ;;  %7386 = vmatprep.mubr.f32.mxu0 %v12543_v39  ;;  %v12547_v24 = vld [vmem:[#allocation50_spill] sm:$0xff]  ;;  %v819_v43 = vadd.f32 %v6921_v40, %v9250_v32 }
 0x192   : > { %12541 = vst [vmem:[#allocation46_spill] sm:$0xff] %v9459_v27  ;;  %v9466_v22 = vadd.f32 %v7043_v25, %v779_v58  ;;  %v808_v62 = vpop.f32.mrf.mxu0  ;;  %7508 = vmatprep.mubr.f32.mxu1 %v12537_v16 }
 0x193   : > { %v1413_v15 = vpop.f32.mrf.mxu1  ;;  %v809_v29 = vadd.f32 %v9250_v32, %v808_v62 }
 0x194   : > { %12544 = vst [vmem:[#allocation15_spill] sm:$0xff] %v9466_v22  ;;  %v9469_v56 = vadd.f32 %v1413_v15, %v769_v30  ;;  %v6924_v17 = vpop.f32.mrf.mxu0  ;;  %7387 = vmatmul.mubr.f32.gmra.mxu0 %v12546_v51 }
 0x195   : > { %v7046_v27 = vpop.f32.mrf.mxu1  ;;  %7509 = vmatmul.mubr.f32.gmra.mxu1 %v12538_v53  ;;  %7389 = vmatprep.mubr.f32.mxu0 %v12547_v24  ;;  %v12551_v53 = vld [vmem:[#allocation52_spill] sm:$0xff]  ;;  %v839_v40 = vadd.f32 %v6924_v17, %v9250_v32 }
 0x196   : > { %12545 = vst [vmem:[#allocation16_spill] sm:$0xff] %v9469_v56  ;;  %v9476_v25 = vadd.f32 %v7046_v27, %v799_v7  ;;  %v828_v58 = vpop.f32.mrf.mxu0  ;;  %7511 = vmatprep.mubr.f32.mxu1 %v12539_v21  ;;  %v12550_v56 = vld [vmem:[#allocation51_spill] sm:$0xff] }
 0x197   : > { %v1425_v16 = vpop.f32.mrf.mxu1  ;;  %v829_v62 = vadd.f32 %v9250_v32, %v828_v58 }
 0x198   : > { %12548 = vst [vmem:[#allocation53_spill] sm:$0xff] %v9476_v25  ;;  %v9479_v30 = vadd.f32 %v1425_v16, %v789_v59  ;;  %v6927_v15 = vpop.f32.mrf.mxu0  ;;  %7390 = vmatmul.mubr.f32.gmra.mxu0 %v12550_v56 }
 0x199   : > { %v7049_v22 = vpop.f32.mrf.mxu1  ;;  %7512 = vmatmul.mubr.f32.gmra.mxu1 %v12542_v44  ;;  %7392 = vmatprep.mubr.f32.mxu0 %v12551_v53  ;;  %v12555_v44 = vld [vmem:[#allocation55_spill] sm:$0xff]  ;;  %v859_v17 = vadd.f32 %v6927_v15, %v9250_v32 }
 0x19a   : > { %12549 = vst [vmem:[#allocation17_spill] sm:$0xff] %v9479_v30  ;;  %v9486_v27 = vadd.f32 %v7049_v22, %v819_v43  ;;  %v848_v7 = vpop.f32.mrf.mxu0  ;;  %7514 = vmatprep.mubr.f32.mxu1 %v12543_v39  ;;  %v12554_v30 = vld [vmem:[#allocation54_spill] sm:$0xff] }
 0x19b   : > { %v1437_v21 = vpop.f32.mrf.mxu1  ;;  %v849_v58 = vadd.f32 %v9250_v32, %v848_v7 }
 0x19c   : > { %12552 = vst [vmem:[#allocation56_spill] sm:$0xff] %v9486_v27  ;;  %v9489_v59 = vadd.f32 %v1437_v21, %v809_v29  ;;  %v6930_v16 = vpop.f32.mrf.mxu0  ;;  %7393 = vmatmul.mubr.f32.gmra.mxu0 %v12554_v30 }
 0x19d   : > { %v7052_v25 = vpop.f32.mrf.mxu1  ;;  %7515 = vmatmul.mubr.f32.gmra.mxu1 %v12546_v51  ;;  %7395 = vmatprep.mubr.f32.mxu0 %v12555_v44  ;;  %v12559_v51 = vld [vmem:[#allocation59_spill] sm:$0xff]  ;;  %v879_v15 = vadd.f32 %v6930_v16, %v9250_v32 }
 0x19e   : > { %12553 = vst [vmem:[#allocation58_spill] sm:$0xff] %v9489_v59  ;;  %v9496_v22 = vadd.f32 %v7052_v25, %v839_v40  ;;  %v868_v43 = vpop.f32.mrf.mxu0  ;;  %7517 = vmatprep.mubr.f32.mxu1 %v12547_v24  ;;  %v12558_v59 = vld [vmem:[#allocation57_spill] sm:$0xff] }
 0x19f   : > { %v1449_v39 = vpop.f32.mrf.mxu1  ;;  %v869_v7 = vadd.f32 %v9250_v32, %v868_v43 }
 0x1a0   : > { %12556 = vst [vmem:[#allocation18_spill] sm:$0xff] %v9496_v22  ;;  %v9499_v29 = vadd.f32 %v1449_v39, %v829_v62  ;;  %v6933_v21 = vpop.f32.mrf.mxu0  ;;  %7396 = vmatmul.mubr.f32.gmra.mxu0 %v12558_v59 }
 0x1a1   : > { %v7055_v27 = vpop.f32.mrf.mxu1  ;;  %7518 = vmatmul.mubr.f32.gmra.mxu1 %v12550_v56  ;;  %7398 = vmatprep.mubr.f32.mxu0 %v12559_v51  ;;  %v12563_v56 = vld [vmem:[#allocation61_spill] sm:$0xff]  ;;  %v899_v16 = vadd.f32 %v6933_v21, %v9250_v32 }
 0x1a2   : > { %12557 = vst [vmem:[#allocation62_spill] sm:$0xff] %v9499_v29  ;;  %v9506_v25 = vadd.f32 %v7055_v27, %v859_v17  ;;  %v888_v40 = vpop.f32.mrf.mxu0  ;;  %7520 = vmatprep.mubr.f32.mxu1 %v12551_v53  ;;  %v12562_v29 = vld [vmem:[#allocation60_spill] sm:$0xff] }
 0x1a3   : > { %v1461_v24 = vpop.f32.mrf.mxu1  ;;  %v889_v43 = vadd.f32 %v9250_v32, %v888_v40 }
 0x1a4   : > { %12560 = vst [vmem:[#allocation19_spill] sm:$0xff] %v9506_v25  ;;  %v9509_v62 = vadd.f32 %v1461_v24, %v849_v58  ;;  %v6936_v39 = vpop.f32.mrf.mxu0  ;;  %7399 = vmatmul.mubr.f32.gmra.mxu0 %v12562_v29 }
 0x1a5   : > { %v7058_v22 = vpop.f32.mrf.mxu1  ;;  %7521 = vmatmul.mubr.f32.gmra.mxu1 %v12554_v30  ;;  %7401 = vmatprep.mubr.f32.mxu0 %v12563_v56  ;;  %v12567_v30 = vld [vmem:[#allocation65_spill] sm:$0xff]  ;;  %v919_v21 = vadd.f32 %v6936_v39, %v9250_v32 }
 0x1a6   : > { %12561 = vst [vmem:[#allocation64_spill] sm:$0xff] %v9509_v62  ;;  %v9516_v27 = vadd.f32 %v7058_v22, %v879_v15  ;;  %v908_v17 = vpop.f32.mrf.mxu0  ;;  %7523 = vmatprep.mubr.f32.mxu1 %v12555_v44  ;;  %v12566_v62 = vld [vmem:[#allocation63_spill] sm:$0xff] }
 0x1a7   : > { %v1473_v53 = vpop.f32.mrf.mxu1  ;;  %v909_v40 = vadd.f32 %v9250_v32, %v908_v17 }
 0x1a8   : > { %12564 = vst [vmem:[#allocation21_spill] sm:$0xff] %v9516_v27  ;;  %v9519_v58 = vadd.f32 %v1473_v53, %v869_v7  ;;  %v6939_v24 = vpop.f32.mrf.mxu0  ;;  %7402 = vmatmul.mubr.f32.gmra.mxu0 %v12566_v62 }
 0x1a9   : > { %v7061_v25 = vpop.f32.mrf.mxu1  ;;  %7524 = vmatmul.mubr.f32.gmra.mxu1 %v12558_v59  ;;  %7404 = vmatprep.mubr.f32.mxu0 %v12567_v30  ;;  %v12571_v59 = vld [vmem:[#allocation68_spill] sm:$0xff]  ;;  %v939_v39 = vadd.f32 %v6939_v24, %v9250_v32 }
 0x1aa   : > { %12565 = vst [vmem:[#allocation66_spill] sm:$0xff] %v9519_v58  ;;  %v9526_v22 = vadd.f32 %v7061_v25, %v899_v16  ;;  %v928_v15 = vpop.f32.mrf.mxu0  ;;  %7526 = vmatprep.mubr.f32.mxu1 %v12559_v51  ;;  %v12570_v58 = vld [vmem:[#allocation67_spill] sm:$0xff] }
 0x1ab   : > { %v1485_v44 = vpop.f32.mrf.mxu1  ;;  %v929_v17 = vadd.f32 %v9250_v32, %v928_v15 }
 0x1ac   : > { %12568 = vst [vmem:[#allocation22_spill] sm:$0xff] %v9526_v22  ;;  %v9529_v7 = vadd.f32 %v1485_v44, %v889_v43  ;;  %v6942_v53 = vpop.f32.mrf.mxu0  ;;  %7405 = vmatmul.mubr.f32.gmra.mxu0 %v12570_v58 }
 0x1ad   : > { %v7064_v27 = vpop.f32.mrf.mxu1  ;;  %7527 = vmatmul.mubr.f32.gmra.mxu1 %v12562_v29  ;;  %7407 = vmatprep.mubr.f32.mxu0 %v12571_v59  ;;  %v12575_v29 = vld [vmem:[#allocation70_spill] sm:$0xff]  ;;  %v959_v24 = vadd.f32 %v6942_v53, %v9250_v32 }
 0x1ae   : > { %12569 = vst [vmem:[#allocation29_spill] sm:$0xff] %v9529_v7  ;;  %v9536_v25 = vadd.f32 %v7064_v27, %v919_v21  ;;  %v948_v16 = vpop.f32.mrf.mxu0  ;;  %7529 = vmatprep.mubr.f32.mxu1 %v12563_v56  ;;  %v12574_v7 = vld [vmem:[#allocation69_spill] sm:$0xff] }
 0x1af   : > { %v1497_v51 = vpop.f32.mrf.mxu1  ;;  %v949_v15 = vadd.f32 %v9250_v32, %v948_v16 }
 0x1b0   : > { %12572 = vst [vmem:[#allocation71_spill] sm:$0xff] %v9536_v25  ;;  %v9539_v43 = vadd.f32 %v1497_v51, %v909_v40  ;;  %v6945_v44 = vpop.f32.mrf.mxu0  ;;  %7408 = vmatmul.mubr.f32.gmra.mxu0 %v12574_v7 }
 0x1b1   : > { %v7067_v22 = vpop.f32.mrf.mxu1  ;;  %7530 = vmatmul.mubr.f32.gmra.mxu1 %v12566_v62  ;;  %7410 = vmatprep.mubr.f32.mxu0 %v12575_v29  ;;  %v12579_v62 = vld [vmem:[#allocation73_spill] sm:$0xff]  ;;  %v979_v53 = vadd.f32 %v6945_v44, %v9250_v32 }
 0x1b2   : > { %12573 = vst [vmem:[#allocation31_spill] sm:$0xff] %v9539_v43  ;;  %v9546_v27 = vadd.f32 %v7067_v22, %v939_v39  ;;  %v968_v21 = vpop.f32.mrf.mxu0  ;;  %7532 = vmatprep.mubr.f32.mxu1 %v12567_v30  ;;  %v12578_v43 = vld [vmem:[#allocation72_spill] sm:$0xff] }
 0x1b3   : > { %v1509_v56 = vpop.f32.mrf.mxu1  ;;  %v969_v16 = vadd.f32 %v9250_v32, %v968_v21 }
 0x1b4   : > { %12576 = vst [vmem:[#allocation75_spill] sm:$0xff] %v9546_v27  ;;  %v9549_v40 = vadd.f32 %v1509_v56, %v929_v17  ;;  %v6948_v51 = vpop.f32.mrf.mxu0  ;;  %7411 = vmatmul.mubr.f32.gmra.mxu0 %v12578_v43 }
 0x1b5   : > { %v7070_v25 = vpop.f32.mrf.mxu1  ;;  %7533 = vmatmul.mubr.f32.gmra.mxu1 %v12570_v58  ;;  %7413 = vmatprep.mubr.f32.mxu0 %v12579_v62  ;;  %v12583_v58 = vld [vmem:[#allocation77_spill] sm:$0xff]  ;;  %v999_v44 = vadd.f32 %v6948_v51, %v9250_v32 }
 0x1b6   : > { %12577 = vst [vmem:[#allocation76_spill] sm:$0xff] %v9549_v40  ;;  %v9556_v22 = vadd.f32 %v7070_v25, %v959_v24  ;;  %v988_v39 = vpop.f32.mrf.mxu0  ;;  %7535 = vmatprep.mubr.f32.mxu1 %v12571_v59  ;;  %v12582_v40 = vld [vmem:[#allocation74_spill] sm:$0xff] }
 0x1b7   : > { %v1521_v30 = vpop.f32.mrf.mxu1  ;;  %v989_v21 = vadd.f32 %v9250_v32, %v988_v39 }
 0x1b8   : > { %12580 = vst [vmem:[#allocation32_spill] sm:$0xff] %v9556_v22  ;;  %v9559_v17 = vadd.f32 %v1521_v30, %v949_v15  ;;  %v6951_v56 = vpop.f32.mrf.mxu0  ;;  %7414 = vmatmul.mubr.f32.gmra.mxu0 %v12582_v40 }
 0x1b9   : > { %v7073_v27 = vpop.f32.mrf.mxu1  ;;  %7536 = vmatmul.mubr.f32.gmra.mxu1 %v12574_v7  ;;  %7416 = vmatprep.mubr.f32.mxu0 %v12583_v58  ;;  %v12587_v7 = vld [vmem:[#allocation80_spill] sm:$0xff]  ;;  %v1019_v51 = vadd.f32 %v6951_v56, %v9250_v32 }
 0x1ba   : > { %12581 = vst [vmem:[#allocation78_spill] sm:$0xff] %v9559_v17  ;;  %v9566_v25 = vadd.f32 %v7073_v27, %v979_v53  ;;  %v1008_v24 = vpop.f32.mrf.mxu0  ;;  %7538 = vmatprep.mubr.f32.mxu1 %v12575_v29  ;;  %v12586_v17 = vld [vmem:[#allocation79_spill] sm:$0xff] }
 0x1bb   : > { %v1533_v59 = vpop.f32.mrf.mxu1  ;;  %v1009_v39 = vadd.f32 %v9250_v32, %v1008_v24 }
 0x1bc   : > { %12584 = vst [vmem:[#allocation41_spill] sm:$0xff] %v9566_v25  ;;  %v9569_v15 = vadd.f32 %v1533_v59, %v969_v16  ;;  %v6954_v30 = vpop.f32.mrf.mxu0  ;;  %7417 = vmatmul.mubr.f32.gmra.mxu0 %v12586_v17 }
 0x1bd   : > { %v7076_v22 = vpop.f32.mrf.mxu1  ;;  %7539 = vmatmul.mubr.f32.gmra.mxu1 %v12578_v43  ;;  %7419 = vmatprep.mubr.f32.mxu0 %v12587_v7  ;;  %v12591_v43 = vld [vmem:[#allocation84_spill] sm:$0xff]  ;;  %v1039_v56 = vadd.f32 %v6954_v30, %v9250_v32 }
 0x1be   : > { %12585 = vst [vmem:[#allocation81_spill] sm:$0xff] %v9569_v15  ;;  %v9576_v27 = vadd.f32 %v7076_v22, %v999_v44  ;;  %v1028_v53 = vpop.f32.mrf.mxu0  ;;  %7541 = vmatprep.mubr.f32.mxu1 %v12579_v62  ;;  %v12590_v15 = vld [vmem:[#allocation82_spill] sm:$0xff] }
 0x1bf   : > { %v1545_v29 = vpop.f32.mrf.mxu1  ;;  %v1029_v24 = vadd.f32 %v9250_v32, %v1028_v53  ;;  %v12596_v53 = vld [vmem:[#allocation92_spill] sm:$0xff] }
 0x1c0   : > { %12588 = vst [vmem:[#allocation25_spill] sm:$0xff] %v9576_v27  ;;  %v9579_v16 = vadd.f32 %v1545_v29, %v989_v21  ;;  %v6957_v59 = vpop.f32.mrf.mxu0  ;;  %7420 = vmatmul.mubr.f32.gmra.mxu0 %v12590_v15 }
 0x1c1   : > { %v7079_v25 = vpop.f32.mrf.mxu1  ;;  %7542 = vmatmul.mubr.f32.gmra.mxu1 %v12582_v40  ;;  %7422 = vmatprep.mubr.f32.mxu0 %v12591_v43 }
 0x1c2   : > { %12589 = vst [vmem:[#allocation83_spill] sm:$0xff] %v9579_v16  ;;  %v9586_v22 = vadd.f32 %v7079_v25, %v1019_v51  ;;  %v1048_v44 = vpop.f32.mrf.mxu0  ;;  %7544 = vmatprep.mubr.f32.mxu1 %v12583_v58  ;;  %v12593_v16 = vld [vmem:[#allocation85_spill] sm:$0xff]  ;;  %v1059_v25 = vadd.f32 %v6957_v59, %v9250_v32 }
 0x1c3   : > { %v1557_v62 = vpop.f32.mrf.mxu1 }
 0x1c4   : > { %v9589_v21 = vadd.f32 %v1557_v62, %v1009_v39  ;;  %v7120_v29 = vpop.f32.mrf.mxu0  ;;  %7423 = vmatmul.mubr.f32.gmra.mxu0 %v12593_v16 }
 0x1c5   : > { %v7082_v27 = vpop.f32.mrf.mxu1  ;;  %v1699_v40 = vadd.f32 %v7120_v29, %v9266_v45  ;;  %7545 = vmatmul.mubr.f32.gmra.mxu1 %v12586_v17  ;;  %7425 = vmatprep.mubr.f32.mxu0 %v12594_v5  ;;  %v12595_v45 = vld [vmem:[#allocation90_spill] sm:$0xff] }
 0x1c6   : > { %12592 = vst [vmem:[#allocation44_spill] sm:$0xff] %v9589_v21  ;;  %v9597_v30 = vadd.f32 %v7082_v27, %v1039_v56  ;;  %v1691_v58 = vpop.f32.mrf.mxu0  ;;  %7547 = vmatprep.mubr.f32.mxu1 %v12587_v7  ;;  %v1049_v27 = vadd.f32 %v9250_v32, %v1048_v44 }
 0x1c7   : > { %v1569_v51 = vpop.f32.mrf.mxu1  ;;  %v1692_v39 = vadd.f32 %v1691_v58, %v9270_v6 }
 0x1c8   : > { %v9601_v62 = vadd.f32 %v1569_v51, %v1029_v24  ;;  %v7123_v21 = vpop.f32.mrf.mxu0  ;;  %7426 = vmatmul.mubr.f32.gmra.mxu0 %v12595_v45  ;;  %v12597_v51 = vld [vmem:[#allocation94_spill] sm:$0xff] }
 0x1c9   : > { %v7085_v17 = vpop.f32.mrf.mxu1  ;;  %v1713_v29 = vadd.f32 %v7123_v21, %v9278_v50  ;;  %7548 = vmatmul.mubr.f32.gmra.mxu1 %v12590_v15  ;;  %7428 = vmatprep.mubr.f32.mxu0 %v12596_v53  ;;  %v12598_v21 = vld [vmem:[#allocation96_spill] sm:$0xff] }
 0x1ca   : > { %v9608_v59 = vadd.f32 %v7085_v17, %v1059_v25  ;;  %v1705_v7 = vpop.f32.mrf.mxu0  ;;  %7550 = vmatprep.mubr.f32.mxu1 %v12591_v43 }
 0x1cb   : > { %v1581_v6 = vpop.f32.mrf.mxu1  ;;  %v1706_v56 = vadd.f32 %v1705_v7, %v9282_v37 }
 0x1cc   : > { %v9612_v24 = vadd.f32 %v1581_v6, %v1049_v27  ;;  %v7126_v58 = vpop.f32.mrf.mxu0  ;;  %7429 = vmatmul.mubr.f32.gmra.mxu0 %v12597_v51  ;;  %v12599_v27 = vld [vmem:[#allocation97_spill] sm:$0xff] }
 0x1cd   : > { %v1727_v50 = vadd.f32 %v7126_v58, %v9290_v28  ;;  %v7248_v15 = vpop.f32.mrf.mxu1  ;;  %7551 = vmatmul.mubr.f32.gmra.mxu1 %v12593_v16  ;;  %7431 = vmatprep.mubr.f32.mxu0 %v12598_v21  ;;  %v12600_v16 = vld [vmem:[#allocation99_spill] sm:$0xff] }
 0x1ce   : > { %v9618_v32 = vadd.f32 %v7248_v15, %v1699_v40  ;;  %v1719_v44 = vpop.f32.mrf.mxu0  ;;  %7553 = vmatprep.mubr.f32.mxu1 %v12594_v5  ;;  %v12601_v15 = vld [vmem:[#allocation100_spill] sm:$0xff] }
 0x1cf   : > { %v1720_v43 = vadd.f32 %v1719_v44, %v9294_v4  ;;  %v2221_v37 = vpop.f32.mrf.mxu1 }
 0x1d0   : > { %v9622_v25 = vadd.f32 %v2221_v37, %v1692_v39  ;;  %v7129_v17 = vpop.f32.mrf.mxu0  ;;  %7432 = vmatmul.mubr.f32.gmra.mxu0 %v12599_v27 }
 0x1d1   : > { %v1741_v28 = vadd.f32 %v7129_v17, %v9302_v54  ;;  %v7251_v7 = vpop.f32.mrf.mxu1  ;;  %7554 = vmatmul.mubr.f32.gmra.mxu1 %v12595_v45  ;;  %7434 = vmatprep.mubr.f32.mxu0 %v12600_v16  ;;  %v12602_v45 = vld [vmem:[#allocation102_spill] sm:$0xff] }
 0x1d2   : > { %v9628_v40 = vadd.f32 %v7251_v7, %v1713_v29  ;;  %v1733_v6 = vpop.f32.mrf.mxu0  ;;  %7556 = vmatprep.mubr.f32.mxu1 %v12596_v53  ;;  %v12603_v7 = vld [vmem:[#allocation103_spill] sm:$0xff] }
 0x1d3   : > { %v1734_v4 = vadd.f32 %v1733_v6, %v9306_v9  ;;  %v2237_v5 = vpop.f32.mrf.mxu1 }
 0x1d4   : > { %v9632_v39 = vadd.f32 %v2237_v5, %v1706_v56  ;;  %v7132_v58 = vpop.f32.mrf.mxu0  ;;  %7435 = vmatmul.mubr.f32.gmra.mxu0 %v12601_v15 }
 0x1d5   : > { %v1755_v54 = vadd.f32 %v7132_v58, %v9314_v1  ;;  %v7254_v44 = vpop.f32.mrf.mxu1  ;;  %7557 = vmatmul.mubr.f32.gmra.mxu1 %v12597_v51  ;;  %7437 = vmatprep.mubr.f32.mxu0 %v12602_v45  ;;  %v12604_v51 = vld [vmem:[#allocation27_spill] sm:$0xff] }
 0x1d6   : > { %v9638_v29 = vadd.f32 %v7254_v44, %v1727_v50  ;;  %v1747_v37 = vpop.f32.mrf.mxu0  ;;  %7559 = vmatprep.mubr.f32.mxu1 %v12598_v21  ;;  %v12605_v44 = vld [vmem:[#allocation106_spill] sm:$0xff] }
 0x1d7   : > { %v1748_v9 = vadd.f32 %v1747_v37, %v9318_v13  ;;  %v2253_v53 = vpop.f32.mrf.mxu1 }
 0x1d8   : > { %v9642_v56 = vadd.f32 %v2253_v53, %v1720_v43  ;;  %v7135_v17 = vpop.f32.mrf.mxu0  ;;  %7438 = vmatmul.mubr.f32.gmra.mxu0 %v12603_v7 }
 0x1d9   : > { %v1769_v1 = vadd.f32 %v7135_v17, %v9326_v57  ;;  %v7257_v6 = vpop.f32.mrf.mxu1  ;;  %7560 = vmatmul.mubr.f32.gmra.mxu1 %v12599_v27  ;;  %7440 = vmatprep.mubr.f32.mxu0 %v12604_v51  ;;  %v12606_v27 = vld [vmem:[#allocation108_spill] sm:$0xff] }
 0x1da   : > { %v9648_v50 = vadd.f32 %v7257_v6, %v1741_v28  ;;  %v1761_v5 = vpop.f32.mrf.mxu0  ;;  %7562 = vmatprep.mubr.f32.mxu1 %v12600_v16  ;;  %v12607_v6 = vld [vmem:[#allocation12_spill] sm:$0xff] }
 0x1db   : > { %v1762_v13 = vadd.f32 %v1761_v5, %v9330_v48  ;;  %v2269_v21 = vpop.f32.mrf.mxu1 }
 0x1dc   : > { %v9652_v43 = vadd.f32 %v2269_v21, %v1734_v4  ;;  %v7138_v58 = vpop.f32.mrf.mxu0  ;;  %7441 = vmatmul.mubr.f32.gmra.mxu0 %v12605_v44 }
 0x1dd   : > { %v1783_v57 = vadd.f32 %v7138_v58, %v9338_v10  ;;  %v7260_v37 = vpop.f32.mrf.mxu1  ;;  %7563 = vmatmul.mubr.f32.gmra.mxu1 %v12601_v15  ;;  %7443 = vmatprep.mubr.f32.mxu0 %v12606_v27  ;;  %v12608_v15 = vld [vmem:[#allocation111_spill] sm:$0xff] }
 0x1de   : > { %v9658_v28 = vadd.f32 %v7260_v37, %v1755_v54  ;;  %v1775_v53 = vpop.f32.mrf.mxu0  ;;  %7565 = vmatprep.mubr.f32.mxu1 %v12602_v45 }
 0x1df   : > { %v1776_v48 = vadd.f32 %v1775_v53, %v9342_v61  ;;  %v2285_v16 = vpop.f32.mrf.mxu1 }
 0x1e0   : > { %v9662_v4 = vadd.f32 %v2285_v16, %v1748_v9  ;;  %v7141_v17 = vpop.f32.mrf.mxu0  ;;  %7444 = vmatmul.mubr.f32.gmra.mxu0 %v12607_v6 }
 0x1e1   : > { %v1797_v10 = vadd.f32 %v7141_v17, %v9350_v33  ;;  %v7263_v5 = vpop.f32.mrf.mxu1  ;;  %7566 = vmatmul.mubr.f32.gmra.mxu1 %v12603_v7  ;;  %7446 = vmatprep.mubr.f32.mxu0 %v12608_v15 }
 0x1e2   : > { %v9668_v54 = vadd.f32 %v7263_v5, %v1769_v1  ;;  %v1789_v21 = vpop.f32.mrf.mxu0  ;;  %7568 = vmatprep.mubr.f32.mxu1 %v12604_v51 }
 0x1e3   : > { %v1790_v61 = vadd.f32 %v1789_v21, %v9354_v49  ;;  %v2301_v45 = vpop.f32.mrf.mxu1 }
 0x1e4   : > { %v9672_v9 = vadd.f32 %v2301_v45, %v1762_v13  ;;  %v7144_v58 = vpop.f32.mrf.mxu0  ;;  %7447 = vmatmul.mubr.f32.gmra.mxu0 %v8894_v38 }
 0x1e5   : > { %v1811_v33 = vadd.f32 %v7144_v58, %v9362_v8  ;;  %v7266_v37 = vpop.f32.mrf.mxu1  ;;  %7569 = vmatmul.mubr.f32.gmra.mxu1 %v12605_v44  ;;  %7449 = vmatprep.mubr.f32.mxu0 %v8901_v2 }
 0x1e6   : > { %v9678_v7 = vadd.f32 %v7266_v37, %v1783_v57  ;;  %v9680_v1 = vpop.f32.mrf.mxu0  ;;  %7571 = vmatprep.mubr.f32.mxu1 %v12606_v27 }
 0x1e7   : > { %v2317_v49 = vpop.f32.mrf.mxu1 }
 0x1e8   : > { %v9683_v51 = vadd.f32 %v2317_v49, %v1776_v48  ;;  %v7147_v13 = vpop.f32.mrf.mxu0  ;;  %7450 = vmatmul.mubr.f32.gmra.mxu0 %v8913_v19 }
 0x1e9   : > { %v1825_v53 = vadd.f32 %v7147_v13, %v9374_v18  ;;  %v7269_v8 = vpop.f32.mrf.mxu1  ;;  %7572 = vmatmul.mubr.f32.gmra.mxu1 %v12607_v6  ;;  %7452 = vmatprep.mubr.f32.mxu0 %v8924_v12 }
 0x1ea   : > { %v9689_v44 = vadd.f32 %v7269_v8, %v1797_v10  ;;  %v9691_v57 = vpop.f32.mrf.mxu0  ;;  %7574 = vmatprep.mubr.f32.mxu1 %v12608_v15 }
 0x1eb   : > { %v2333_v27 = vpop.f32.mrf.mxu1 }
 0x1ec   : > { %v9694_v16 = vadd.f32 %v2333_v27, %v1790_v61  ;;  %v7150_v48 = vpop.f32.mrf.mxu0  ;;  %7453 = vmatmul.mubr.f32.gmra.mxu0 %v8928_v41 }
 0x1ed   : > { %v1839_v17 = vadd.f32 %v7150_v48, %v9386_v46  ;;  %v7272_v18 = vpop.f32.mrf.mxu1  ;;  %7575 = vmatmul.mubr.f32.gmra.mxu1 %v8894_v38  ;;  %7455 = vmatprep.mubr.f32.mxu0 %v8937_v55 }
 0x1ee   : > { %v9700_v6 = vadd.f32 %v7272_v18, %v1811_v33  ;;  %v9702_v10 = vpop.f32.mrf.mxu0  ;;  %7577 = vmatprep.mubr.f32.mxu1 %v8901_v2 }
 0x1ef   : > { %v9705_v5 = vpop.f32.mrf.mxu1 }
 0x1f0   : > { %v7153_v15 = vpop.f32.mrf.mxu0  ;;  %7456 = vmatmul.mubr.f32.gmra.mxu0 %v8953_v42 }
 0x1f1   : > { %v1853_v21 = vadd.f32 %v7153_v15, %v9398_v11  ;;  %v7275_v61 = vpop.f32.mrf.mxu1  ;;  %7578 = vmatmul.mubr.f32.gmra.mxu1 %v8913_v19  ;;  %7458 = vmatprep.mubr.f32.mxu0 %v8967_v63 }
 0x1f2   : > { %v9711_v38 = vadd.f32 %v7275_v61, %v1825_v53  ;;  %v9713_v46 = vpop.f32.mrf.mxu0  ;;  %7580 = vmatprep.mubr.f32.mxu1 %v8924_v12  ;;  %v12614_v61 = vld [vmem:[#allocation14_spill] sm:$0xff] }
 0x1f3   : > { %v9716_v45 = vpop.f32.mrf.mxu1 }
 0x1f4   : > { %v7156_v2 = vpop.f32.mrf.mxu0  ;;  %7459 = vmatmul.mubr.f32.gmra.mxu0 %v8980_v52 }
 0x1f5   : > { %v1867_v58 = vadd.f32 %v7156_v2, %v9410_v34  ;;  %v7278_v33 = vpop.f32.mrf.mxu1  ;;  %7581 = vmatmul.mubr.f32.gmra.mxu1 %v8928_v41  ;;  %7461 = vmatprep.mubr.f32.mxu0 %v8989_v14 }
 0x1f6   : > { %v9722_v19 = vadd.f32 %v7278_v33, %v1839_v17  ;;  %v9724_v11 = vpop.f32.mrf.mxu0  ;;  %7583 = vmatprep.mubr.f32.mxu1 %v8937_v55 }
 0x1f7   : > { %v9727_v37 = vpop.f32.mrf.mxu1 }
 0x1f8   : > { %12609 = vst [vmem:[#allocation86_spill] sm:$0xff] %v9722_v19  ;;  %12610 = vst [vmem:[#allocation88_spill] sm:$0xff] %v9727_v37  ;;  %v7159_v12 = vpop.f32.mrf.mxu0  ;;  %7462 = vmatmul.mubr.f32.gmra.mxu0 %v9004_v20 }
 0x1f9   : > { %v1881_v49 = vadd.f32 %v7159_v12, %v9422_v31  ;;  %v7281_v13 = vpop.f32.mrf.mxu1  ;;  %7584 = vmatmul.mubr.f32.gmra.mxu1 %v8953_v42  ;;  %7464 = vmatprep.mubr.f32.mxu0 %v9011_v36 }
 0x1fa   : > { %v9733_v41 = vadd.f32 %v7281_v13, %v1853_v21  ;;  %v9735_v34 = vpop.f32.mrf.mxu0  ;;  %7586 = vmatprep.mubr.f32.mxu1 %v8967_v63 }
 0x1fb   : > { %v9738_v53 = vpop.f32.mrf.mxu1 }
 0x1fc   : > { %12611 = vst [vmem:[#allocation48_spill] sm:$0xff] %v9733_v41  ;;  %12612 = vst [vmem:[#allocation89_spill] sm:$0xff] %v9738_v53  ;;  %v7162_v55 = vpop.f32.mrf.mxu0  ;;  %7465 = vmatmul.mubr.f32.gmra.mxu0 %v9023_v47 }
 0x1fd   : > { %v1895_v8 = vadd.f32 %v7162_v55, %v9434_v3  ;;  %v7284_v27 = vpop.f32.mrf.mxu1  ;;  %7587 = vmatmul.mubr.f32.gmra.mxu1 %v8980_v52  ;;  %7467 = vmatprep.mubr.f32.mxu0 %v9033_v60 }
 0x1fe   : > { %v9744_v42 = vadd.f32 %v7284_v27, %v1867_v58  ;;  %v1887_v31 = vpop.f32.mrf.mxu0  ;;  %7589 = vmatprep.mubr.f32.mxu1 %v8989_v14 }
 0x1ff   : > { %v1888_v48 = vadd.f32 %v1887_v31, %v9438_v35  ;;  %v9748_v63 = vpop.f32.mrf.mxu1 }
 0x200   : > { %12613 = vst [vmem:[#allocation36_spill] sm:$0xff] %v9744_v42  ;;  %v7165_v17 = vpop.f32.mrf.mxu0  ;;  %7468 = vmatmul.mubr.f32.gmra.mxu0 %v9044_v0 }
 0x201   : > { %v1909_v18 = vadd.f32 %v7165_v17, %v9446_v26  ;;  %v7287_v3 = vpop.f32.mrf.mxu1  ;;  %7590 = vmatmul.mubr.f32.gmra.mxu1 %v9004_v20  ;;  %v12615_v20 = vld [vmem:[#allocation46_spill] sm:$0xff] }
 0x202   : > { %v9753_v52 = vadd.f32 %v7287_v3, %v1881_v49  ;;  %v1901_v15 = vpop.f32.mrf.mxu0  ;;  %7592 = vmatprep.mubr.f32.mxu1 %v9011_v36 }
 0x203   : > { %v1902_v21 = vadd.f32 %v1901_v15, %v9449_v23  ;;  %v9757_v14 = vpop.f32.mrf.mxu1  ;;  %v12616_v23 = vld [vmem:[#allocation15_spill] sm:$0xff] }
 0x204   : > { %v7168_v35 = vpop.f32.mrf.mxu0 }
 0x205   : > { %v1923_v2 = vadd.f32 %v7168_v35, %v12614_v61  ;;  %v7290_v58 = vpop.f32.mrf.mxu1  ;;  %7593 = vmatmul.mubr.f32.gmra.mxu1 %v9023_v47  ;;  %v12617_v47 = vld [vmem:[#allocation16_spill] sm:$0xff]  ;;  %v12618_v35 = vld [vmem:[#allocation53_spill] sm:$0xff] }
 0x206   : > { %v9761_v33 = vadd.f32 %v7290_v58, %v1895_v8  ;;  %v1915_v26 = vpop.f32.mrf.mxu0  ;;  %7595 = vmatprep.mubr.f32.mxu1 %v9033_v60 }
 0x207   : > { %v1916_v12 = vadd.f32 %v1915_v26, %v12615_v20  ;;  %v2445_v49 = vpop.f32.mrf.mxu1  ;;  %v12619_v20 = vld [vmem:[#allocation17_spill] sm:$0xff] }
 0x208   : > { %v9765_v13 = vadd.f32 %v2445_v49, %v1888_v48  ;;  %v7171_v36 = vpop.f32.mrf.mxu0 }
 0x209   : > { %v1937_v55 = vadd.f32 %v7171_v36, %v12616_v23  ;;  %v7293_v27 = vpop.f32.mrf.mxu1  ;;  %7596 = vmatmul.mubr.f32.gmra.mxu1 %v9044_v0 }
 0x20a   : > { %v9769_v31 = vadd.f32 %v7293_v27, %v1909_v18  ;;  %v1929_v17 = vpop.f32.mrf.mxu0  ;;  %v12620_v18 = vld [vmem:[#allocation56_spill] sm:$0xff] }
 0x20b   : > { %v1930_v8 = vadd.f32 %v1929_v17, %v12617_v47  ;;  %v2461_v3 = vpop.f32.mrf.mxu1  ;;  %v12621_v47 = vld [vmem:[#allocation58_spill] sm:$0xff] }
 0x20c   : > { %v9772_v15 = vadd.f32 %v2461_v3, %v1902_v21  ;;  %v7174_v60 = vpop.f32.mrf.mxu0 }
 0x20d   : > { %v1951_v61 = vadd.f32 %v7174_v60, %v12618_v35  ;;  %v7296_v58 = vpop.f32.mrf.mxu1  ;;  %v12623_v35 = vld [vmem:[#allocation18_spill] sm:$0xff] }
 0x20e   : > { %v9775_v48 = vadd.f32 %v7296_v58, %v1923_v2  ;;  %v1943_v26 = vpop.f32.mrf.mxu0 }
 0x20f   : > { %v1944_v49 = vadd.f32 %v1943_v26, %v12619_v20  ;;  %v2477_v36 = vpop.f32.mrf.mxu1  ;;  %v12625_v20 = vld [vmem:[#allocation62_spill] sm:$0xff] }
 0x210   : > { %v9778_v23 = vadd.f32 %v2477_v36, %v1916_v12  ;;  %v7177_v0 = vpop.f32.mrf.mxu0 }
 0x211   : > { %v1965_v27 = vadd.f32 %v7177_v0, %v12620_v18  ;;  %v7299_v19 = vpop.f32.mrf.mxu1 }
 0x212   : > { %v9781_v17 = vadd.f32 %v7299_v19, %v1937_v55  ;;  %v1957_v21 = vpop.f32.mrf.mxu0  ;;  %v12627_v55 = vld [vmem:[#allocation19_spill] sm:$0xff] }
 0x213   : > { %v1958_v3 = vadd.f32 %v1957_v21, %v12621_v47  ;;  %v2493_v37 = vpop.f32.mrf.mxu1 }
 0x214   : > { %v9784_v60 = vadd.f32 %v2493_v37, %v1930_v8  ;;  %v7180_v2 = vpop.f32.mrf.mxu0  ;;  %v12629_v8 = vld [vmem:[#allocation64_spill] sm:$0xff] }
 0x215   : > { %v1979_v58 = vadd.f32 %v7180_v2, %v12623_v35  ;;  %v7302_v53 = vpop.f32.mrf.mxu1 }
 0x216   : > { %12622 = vst [vmem:[#allocation91_spill] sm:$0xff] %v9784_v60  ;;  %v9787_v26 = vadd.f32 %v7302_v53, %v1951_v61  ;;  %v1971_v12 = vpop.f32.mrf.mxu0  ;;  %v12631_v61 = vld [vmem:[#allocation21_spill] sm:$0xff] }
 0x217   : > { %v1972_v36 = vadd.f32 %v1971_v12, %v12625_v20  ;;  %v2509_v41 = vpop.f32.mrf.mxu1 }
 0x218   : > { %12624 = vst [vmem:[#allocation93_spill] sm:$0xff] %v9787_v26  ;;  %v9790_v0 = vadd.f32 %v2509_v41, %v1944_v49  ;;  %v7183_v19 = vpop.f32.mrf.mxu0  ;;  %v12633_v49 = vld [vmem:[#allocation66_spill] sm:$0xff] }
 0x219   : > { %v1993_v18 = vadd.f32 %v7183_v19, %v12627_v55  ;;  %v7305_v42 = vpop.f32.mrf.mxu1 }
 0x21a   : > { %12626 = vst [vmem:[#allocation95_spill] sm:$0xff] %v9790_v0  ;;  %v9793_v21 = vadd.f32 %v7305_v42, %v1965_v27  ;;  %v1985_v37 = vpop.f32.mrf.mxu0  ;;  %v12635_v27 = vld [vmem:[#allocation22_spill] sm:$0xff] }
 0x21b   : > { %v1986_v47 = vadd.f32 %v1985_v37, %v12629_v8  ;;  %v2525_v60 = vpop.f32.mrf.mxu1 }
 0x21c   : > { %12628 = vst [vmem:[#allocation24_spill] sm:$0xff] %v9793_v21  ;;  %v9796_v2 = vadd.f32 %v2525_v60, %v1958_v3  ;;  %v7186_v53 = vpop.f32.mrf.mxu0  ;;  %v12637_v60 = vld [vmem:[#allocation29_spill] sm:$0xff] }
 0x21d   : > { %v2007_v35 = vadd.f32 %v7186_v53, %v12631_v61  ;;  %v7308_v26 = vpop.f32.mrf.mxu1 }
 0x21e   : > { %12630 = vst [vmem:[#allocation98_spill] sm:$0xff] %v9796_v2  ;;  %v9799_v12 = vadd.f32 %v7308_v26, %v1979_v58  ;;  %v1999_v41 = vpop.f32.mrf.mxu0  ;;  %v12639_v26 = vld [vmem:[#allocation71_spill] sm:$0xff] }
 0x21f   : > { %v2000_v20 = vadd.f32 %v1999_v41, %v12633_v49  ;;  %v2541_v0 = vpop.f32.mrf.mxu1 }
 0x220   : > { %12632 = vst [vmem:[#allocation34_spill] sm:$0xff] %v9799_v12  ;;  %v9802_v19 = vadd.f32 %v2541_v0, %v1972_v36  ;;  %v7189_v42 = vpop.f32.mrf.mxu0  ;;  %v12641_v0 = vld [vmem:[#allocation31_spill] sm:$0xff] }
 0x221   : > { %v2021_v55 = vadd.f32 %v7189_v42, %v12635_v27  ;;  %v7311_v21 = vpop.f32.mrf.mxu1 }
 0x222   : > { %12634 = vst [vmem:[#allocation101_spill] sm:$0xff] %v9802_v19  ;;  %v9805_v37 = vadd.f32 %v7311_v21, %v1993_v18  ;;  %v2013_v3 = vpop.f32.mrf.mxu0  ;;  %v12643_v21 = vld [vmem:[#allocation75_spill] sm:$0xff] }
 0x223   : > { %v2014_v8 = vadd.f32 %v2013_v3, %v12637_v60  ;;  %v2557_v2 = vpop.f32.mrf.mxu1 }
 0x224   : > { %12636 = vst [vmem:[#allocation38_spill] sm:$0xff] %v9805_v37  ;;  %v9808_v53 = vadd.f32 %v2557_v2, %v1986_v47  ;;  %v7192_v58 = vpop.f32.mrf.mxu0  ;;  %v12645_v2 = vld [vmem:[#allocation76_spill] sm:$0xff] }
 0x225   : > { %v2035_v61 = vadd.f32 %v7192_v58, %v12639_v26  ;;  %v7314_v12 = vpop.f32.mrf.mxu1 }
 0x226   : > { %12638 = vst [vmem:[#allocation104_spill] sm:$0xff] %v9808_v53  ;;  %v9811_v41 = vadd.f32 %v7314_v12, %v2007_v35  ;;  %v2027_v36 = vpop.f32.mrf.mxu0  ;;  %v12647_v12 = vld [vmem:[#allocation32_spill] sm:$0xff] }
 0x227   : > { %v2028_v49 = vadd.f32 %v2027_v36, %v12641_v0  ;;  %v2573_v19 = vpop.f32.mrf.mxu1 }
 0x228   : > { %12640 = vst [vmem:[#allocation105_spill] sm:$0xff] %v9811_v41  ;;  %v9814_v42 = vadd.f32 %v2573_v19, %v2000_v20  ;;  %v7195_v18 = vpop.f32.mrf.mxu0  ;;  %v12649_v19 = vld [vmem:[#allocation78_spill] sm:$0xff] }
 0x229   : > { %v2049_v27 = vadd.f32 %v7195_v18, %v12643_v21  ;;  %v7317_v37 = vpop.f32.mrf.mxu1 }
 0x22a   : > { %12642 = vst [vmem:[#allocation107_spill] sm:$0xff] %v9814_v42  ;;  %v9817_v3 = vadd.f32 %v7317_v37, %v2021_v55  ;;  %v2041_v47 = vpop.f32.mrf.mxu0  ;;  %v12651_v37 = vld [vmem:[#allocation41_spill] sm:$0xff] }
 0x22b   : > { %v2042_v60 = vadd.f32 %v2041_v47, %v12645_v2  ;;  %v2589_v53 = vpop.f32.mrf.mxu1 }
 0x22c   : > { %12644 = vst [vmem:[#allocation109_spill] sm:$0xff] %v9817_v3  ;;  %v9820_v58 = vadd.f32 %v2589_v53, %v2014_v8  ;;  %v7198_v35 = vpop.f32.mrf.mxu0  ;;  %v12653_v53 = vld [vmem:[#allocation81_spill] sm:$0xff] }
 0x22d   : > { %v2063_v26 = vadd.f32 %v7198_v35, %v12647_v12  ;;  %v7320_v41 = vpop.f32.mrf.mxu1 }
 0x22e   : > { %12646 = vst [vmem:[#allocation110_spill] sm:$0xff] %v9820_v58  ;;  %v9823_v36 = vadd.f32 %v7320_v41, %v2035_v61  ;;  %v2055_v20 = vpop.f32.mrf.mxu0  ;;  %v12655_v41 = vld [vmem:[#allocation25_spill] sm:$0xff] }
 0x22f   : > { %v2056_v0 = vadd.f32 %v2055_v20, %v12649_v19  ;;  %v2605_v42 = vpop.f32.mrf.mxu1 }
 0x230   : > { %12648 = vst [vmem:[#allocation112_spill] sm:$0xff] %v9823_v36  ;;  %v9826_v18 = vadd.f32 %v2605_v42, %v2028_v49  ;;  %v7201_v55 = vpop.f32.mrf.mxu0  ;;  %v12657_v42 = vld [vmem:[#allocation83_spill] sm:$0xff] }
 0x231   : > { %v2077_v21 = vadd.f32 %v7201_v55, %v12651_v37  ;;  %v7323_v3 = vpop.f32.mrf.mxu1 }
 0x232   : > { %12650 = vst [vmem:[#allocation113_spill] sm:$0xff] %v9826_v18  ;;  %v9829_v47 = vadd.f32 %v7323_v3, %v2049_v27  ;;  %v2069_v8 = vpop.f32.mrf.mxu0 }
 0x233   : > { %v2070_v2 = vadd.f32 %v2069_v8, %v12653_v53  ;;  %v2621_v58 = vpop.f32.mrf.mxu1 }
 0x234   : > { %12652 = vst [vmem:[#allocation114_spill] sm:$0xff] %v9829_v47  ;;  %v9832_v35 = vadd.f32 %v2621_v58, %v2042_v60  ;;  %v7204_v61 = vpop.f32.mrf.mxu0  ;;  %v12660_v58 = vld [vmem:[#allocation44_spill] sm:$0xff] }
 0x235   : > { %v2091_v12 = vadd.f32 %v7204_v61, %v12655_v41  ;;  %v7326_v36 = vpop.f32.mrf.mxu1 }
 0x236   : > { %12654 = vst [vmem:[#allocation115_spill] sm:$0xff] %v9832_v35  ;;  %v9835_v20 = vadd.f32 %v7326_v36, %v2063_v26  ;;  %v2083_v49 = vpop.f32.mrf.mxu0 }
 0x237   : > { %v2084_v19 = vadd.f32 %v2083_v49, %v12657_v42  ;;  %v2637_v18 = vpop.f32.mrf.mxu1 }
 0x238   : > { %12656 = vst [vmem:[#allocation116_spill] sm:$0xff] %v9835_v20  ;;  %v9838_v55 = vadd.f32 %v2637_v18, %v2056_v0  ;;  %v7207_v27 = vpop.f32.mrf.mxu0 }
 0x239   : > { %v2105_v3 = vadd.f32 %v7207_v27, %v9586_v22  ;;  %v7329_v37 = vpop.f32.mrf.mxu1 }
 0x23a   : > { %12658 = vst [vmem:[#allocation117_spill] sm:$0xff] %v9838_v55  ;;  %v9841_v8 = vadd.f32 %v7329_v37, %v2077_v21  ;;  %v2097_v60 = vpop.f32.mrf.mxu0 }
 0x23b   : > { %v2098_v53 = vadd.f32 %v2097_v60, %v12660_v58  ;;  %v2653_v35 = vpop.f32.mrf.mxu1 }
 0x23c   : > { %12659 = vst [vmem:[#allocation118_spill] sm:$0xff] %v9841_v8  ;;  %v9844_v61 = vadd.f32 %v2653_v35, %v2070_v2  ;;  %v7210_v26 = vpop.f32.mrf.mxu0 }
 0x23d   : > { %v2119_v36 = vadd.f32 %v7210_v26, %v9597_v30  ;;  %v7332_v41 = vpop.f32.mrf.mxu1 }
 0x23e   : > { %12661 = vst [vmem:[#allocation119_spill] sm:$0xff] %v9844_v61  ;;  %v9847_v49 = vadd.f32 %v7332_v41, %v2091_v12  ;;  %v2111_v0 = vpop.f32.mrf.mxu0 }
 0x23f   : > { %v2112_v18 = vadd.f32 %v2111_v0, %v9601_v62  ;;  %v2669_v42 = vpop.f32.mrf.mxu1 }
 0x240   : > { %12662 = vst [vmem:[#allocation20_spill] sm:$0xff] %v9847_v49  ;;  %v9850_v22 = vadd.f32 %v2669_v42, %v2084_v19  ;;  %v7213_v21 = vpop.f32.mrf.mxu0 }
 0x241   : > { %v2133_v27 = vadd.f32 %v7213_v21, %v9608_v59  ;;  %v7335_v37 = vpop.f32.mrf.mxu1 }
 0x242   : > { %12663 = vst [vmem:[#allocation23_spill] sm:$0xff] %v9850_v22  ;;  %v9853_v60 = vadd.f32 %v7335_v37, %v2105_v3  ;;  %v2125_v2 = vpop.f32.mrf.mxu0 }
 0x243   : > { %v2126_v35 = vadd.f32 %v2125_v2, %v9612_v24  ;;  %v2685_v58 = vpop.f32.mrf.mxu1 }
 0x244   : > { %12664 = vst [vmem:[#allocation30_spill] sm:$0xff] %v9853_v60  ;;  %v9856_v30 = vadd.f32 %v2685_v58, %v2098_v53  ;;  %v7376_v12 = vpop.f32.mrf.mxu0 }
 0x245   : > { %v7338_v26 = vpop.f32.mrf.mxu1  ;;  %v2851_v41 = vadd.f32 %v7376_v12, %v9618_v32 }
 0x246   : > { %12665 = vst [vmem:[#allocation33_spill] sm:$0xff] %v9856_v30  ;;  %v9859_v62 = vadd.f32 %v7338_v26, %v2119_v36  ;;  %v2844_v19 = vpop.f32.mrf.mxu0 }
 0x247   : > { %v2701_v0 = vpop.f32.mrf.mxu1  ;;  %v2845_v42 = vadd.f32 %v2844_v19, %v9622_v25 }
 0x248   : > { %12666 = vst [vmem:[#allocation39_spill] sm:$0xff] %v9859_v62  ;;  %v9862_v59 = vadd.f32 %v2701_v0, %v2112_v18  ;;  %v7379_v3 = vpop.f32.mrf.mxu0 }
 0x249   : > { %v7341_v21 = vpop.f32.mrf.mxu1  ;;  %v2863_v37 = vadd.f32 %v7379_v3, %v9628_v40 }
 0x24a   : > { %12667 = vst [vmem:[#allocation40_spill] sm:$0xff] %v9862_v59  ;;  %v9865_v24 = vadd.f32 %v7341_v21, %v2133_v27  ;;  %v2856_v53 = vpop.f32.mrf.mxu0 }
 0x24b   : > { %v2717_v2 = vpop.f32.mrf.mxu1  ;;  %v2857_v58 = vadd.f32 %v2856_v53, %v9632_v39 }
 0x24c   : > { %12668 = vst [vmem:[#allocation43_spill] sm:$0xff] %v9865_v24  ;;  %v9868_v55 = vadd.f32 %v2717_v2, %v2126_v35  ;;  %v7382_v32 = vpop.f32.mrf.mxu0 }
 0x24d   : > { %v2875_v36 = vadd.f32 %v7382_v32, %v9638_v29  ;;  %v7504_v12 = vpop.f32.mrf.mxu1 }
 0x24e   : > { %12669 = vst [vmem:[#allocation45_spill] sm:$0xff] %v9868_v55  ;;  %v9871_v26 = vadd.f32 %v7504_v12, %v2851_v41  ;;  %v2868_v25 = vpop.f32.mrf.mxu0  ;;  %v12681_v55 = vld [vmem:[#allocation28_spill] sm:$0xff] }
 0x24f   : > { %v2869_v18 = vadd.f32 %v2868_v25, %v9642_v56  ;;  %v3309_v19 = vpop.f32.mrf.mxu1 }
 0x250   : > { %12670 = vst [vmem:[#allocation47_spill] sm:$0xff] %v9871_v26  ;;  %v9874_v0 = vadd.f32 %v3309_v19, %v2845_v42  ;;  %v7385_v40 = vpop.f32.mrf.mxu0 }
 0x251   : > { %v2887_v27 = vadd.f32 %v7385_v40, %v9648_v50  ;;  %v7507_v3 = vpop.f32.mrf.mxu1 }
 0x252   : > { %12671 = vst [vmem:[#allocation49_spill] sm:$0xff] %v9874_v0  ;;  %v9877_v21 = vadd.f32 %v7507_v3, %v2863_v37  ;;  %v2880_v39 = vpop.f32.mrf.mxu0 }
 0x253   : > { %v2881_v35 = vadd.f32 %v2880_v39, %v9652_v43  ;;  %v3321_v53 = vpop.f32.mrf.mxu1 }
 0x254   : > { %12672 = vst [vmem:[#allocation50_spill] sm:$0xff] %v9877_v21  ;;  %v9880_v29 = vadd.f32 %v3321_v53, %v2857_v58  ;;  %v7388_v41 = vpop.f32.mrf.mxu0 }
 0x255   : > { %v2899_v2 = vadd.f32 %v7388_v41, %v9658_v28  ;;  %v7510_v32 = vpop.f32.mrf.mxu1 }
 0x256   : > { %12673 = vst [vmem:[#allocation51_spill] sm:$0xff] %v9880_v29  ;;  %v9883_v56 = vadd.f32 %v7510_v32, %v2875_v36  ;;  %v2892_v42 = vpop.f32.mrf.mxu0 }
 0x257   : > { %v2893_v12 = vadd.f32 %v2892_v42, %v9662_v4  ;;  %v3333_v25 = vpop.f32.mrf.mxu1 }
 0x258   : > { %v9886_v50 = vadd.f32 %v3333_v25, %v2869_v18  ;;  %v9888_v37 = vpop.f32.mrf.mxu0 }
 0x259   : > { %v7513_v19 = vpop.f32.mrf.mxu1 }
 0x25a   : > { %v9890_v40 = vadd.f32 %v7513_v19, %v2887_v27  ;;  %v9892_v43 = vpop.f32.mrf.mxu0 }
 0x25b   : > { %v3345_v58 = vpop.f32.mrf.mxu1 }
 0x25c   : > { %v9894_v3 = vadd.f32 %v3345_v58, %v2881_v35  ;;  %v9896_v28 = vpop.f32.mrf.mxu0 }
 0x25d   : > { %v7516_v36 = vpop.f32.mrf.mxu1 }
 0x25e   : > { %12674 = vst [vmem:[#allocation52_spill] sm:$0xff] %v9894_v3  ;;  %v9898_v39 = vadd.f32 %v7516_v36, %v2899_v2  ;;  %v9900_v53 = vpop.f32.mrf.mxu0  ;;  %v12677_v36 = vld [vmem:[#allocation26_spill] sm:$0xff] }
 0x25f   : > { %v3357_v4 = vpop.f32.mrf.mxu1 }
 0x260   : > { %12675 = vst [vmem:[#allocation54_spill] sm:$0xff] %v9898_v39  ;;  %v9902_v18 = vadd.f32 %v3357_v4, %v2893_v12  ;;  %v9904_v41 = vpop.f32.mrf.mxu0  ;;  %v1804_v12 = vadd.f32 %v9680_v1, %v12677_v36  ;;  %v1818_v1 = vadd.f32 %v9691_v57, %v12681_v55 }
 0x261   : > { %v9906_v32 = vpop.f32.mrf.mxu1 }
 0x262   : > { %12676 = vst [vmem:[#allocation55_spill] sm:$0xff] %v9902_v18  ;;  %v9908_v27 = vpop.f32.mrf.mxu0  ;;  %v2350_v61 = vadd.f32 %v9705_v5, %v1804_v12  ;;  %v2366_v5 = vadd.f32 %v9716_v45, %v1818_v1 }
 0x263   : > { %v9910_v42 = vpop.f32.mrf.mxu1 }
 0x264   : > { %v7400_v35 = vpop.f32.mrf.mxu0 }
 0x265   : > { %v2947_v25 = vadd.f32 %v7400_v35, %v9700_v6  ;;  %v9913_v19 = vpop.f32.mrf.mxu1 }
 0x266   : > { %v2940_v2 = vpop.f32.mrf.mxu0 }
 0x267   : > { %v9915_v58 = vpop.f32.mrf.mxu1  ;;  %v2941_v49 = vadd.f32 %v2940_v2, %v2350_v61 }
 0x268   : > { %v7403_v4 = vpop.f32.mrf.mxu0 }
 0x269   : > { %v7525_v20 = vpop.f32.mrf.mxu1  ;;  %v2959_v12 = vadd.f32 %v7403_v4, %v9711_v38 }
 0x26a   : > { %v2952_v8 = vpop.f32.mrf.mxu0 }
 0x26b   : > { %v9920_v22 = vpop.f32.mrf.mxu1  ;;  %v2953_v0 = vadd.f32 %v2952_v8, %v2366_v5 }
 0x26c   : > { %v9922_v30 = vpop.f32.mrf.mxu0 }
 0x26d   : > { %12678 = vst [vmem:[#allocation57_spill] sm:$0xff] %v9922_v30  ;;  %v7528_v60 = vpop.f32.mrf.mxu1 }
 0x26e   : > { %v9924_v6 = vpop.f32.mrf.mxu0  ;;  %v9950_v45 = vadd.f32 %v7528_v60, %v2947_v25 }
 0x26f   : > { %12679 = vst [vmem:[#allocation59_spill] sm:$0xff] %v9924_v6  ;;  %v3405_v35 = vpop.f32.mrf.mxu1 }
 0x270   : > { %v9926_v59 = vpop.f32.mrf.mxu0  ;;  %12689 = vst [vmem:[#allocation72_spill] sm:$0xff] %v9950_v45  ;;  %v9954_v1 = vadd.f32 %v3405_v35, %v2941_v49 }
 0x271   : > { %12680 = vst [vmem:[#allocation60_spill] sm:$0xff] %v9926_v59  ;;  %v7531_v62 = vpop.f32.mrf.mxu1 }
 0x272   : > { %v9930_v36 = vpop.f32.mrf.mxu0  ;;  %12691 = vst [vmem:[#allocation74_spill] sm:$0xff] %v9954_v1  ;;  %v9956_v5 = vadd.f32 %v7531_v62, %v2959_v12 }
 0x273   : > { %12682 = vst [vmem:[#allocation61_spill] sm:$0xff] %v9930_v36  ;;  %v3417_v24 = vpop.f32.mrf.mxu1 }
 0x274   : > { %v9934_v61 = vpop.f32.mrf.mxu0  ;;  %12692 = vst [vmem:[#allocation77_spill] sm:$0xff] %v9956_v5 }
 0x275   : > { %12683 = vst [vmem:[#allocation63_spill] sm:$0xff] %v9934_v61  ;;  %v9936_v2 = vpop.f32.mrf.mxu1 }
 0x276   : > { %12684 = vst [vmem:[#allocation65_spill] sm:$0xff] %v9936_v2  ;;  %v9938_v6 = vpop.f32.mrf.mxu0 }
 0x277   : > { %12685 = vst [vmem:[#allocation67_spill] sm:$0xff] %v9938_v6  ;;  %v9940_v47 = vpop.f32.mrf.mxu1  ;;  %v2935_v6 = vadd.f32 %v9904_v41, %v9689_v44 }
 0x278   : > { %12686 = vst [vmem:[#allocation68_spill] sm:$0xff] %v9940_v47  ;;  %v9942_v30 = vpop.f32.mrf.mxu0 }
 0x279   : > { %v9944_v3 = vpop.f32.mrf.mxu1 }
 0x27a   : > { %12687 = vst [vmem:[#allocation69_spill] sm:$0xff] %v9944_v3  ;;  %v9946_v57 = vpop.f32.mrf.mxu0  ;;  %v9962_v3 = vadd.f32 %v3417_v24, %v2953_v0 }
 0x27b   : > { %v9948_v55 = vpop.f32.mrf.mxu1 }
 0x27c   : > { %12688 = vst [vmem:[#allocation70_spill] sm:$0xff] %v9948_v55  ;;  %v7418_v38 = vpop.f32.mrf.mxu0  ;;  %12694 = vst [vmem:[#allocation80_spill] sm:$0xff] %v9962_v3 }
 0x27d   : > { %v9952_v4 = vpop.f32.mrf.mxu1 }
 0x27e   : > { %12690 = vst [vmem:[#allocation73_spill] sm:$0xff] %v9952_v4  ;;  %v3012_v8 = vpop.f32.mrf.mxu0 }
 0x27f   : > { %v9958_v2 = vpop.f32.mrf.mxu1 }
 0x280   : > { %12693 = vst [vmem:[#allocation79_spill] sm:$0xff] %v9958_v2  ;;  %v7421_v47 = vpop.f32.mrf.mxu0 }
 0x281   : > { %v9960_v36 = vpop.f32.mrf.mxu1 }
 0x282   : > { %v9964_v18 = vpop.f32.mrf.mxu0 }
 0x283   : > { %v9966_v55 = vpop.f32.mrf.mxu1 }
 0x284   : > { %v7424_v60 = vpop.f32.mrf.mxu0 }
 0x285   : > { %v7546_v25 = vpop.f32.mrf.mxu1  ;;  %v9975_v5 = vadd.f32 %v7424_v60, %v9775_v48  ;;  %v9994_v48 = vadd.f32 %v7525_v20, %v2935_v6  ;;  %v3019_v20 = vadd.f32 %v7418_v38, %v9761_v33  ;;  %v2917_v33 = vadd.f32 %v9900_v53, %v9683_v51 }
 0x286   : > { %v3036_v45 = vpop.f32.mrf.mxu0 }
 0x287   : > { %v3477_v59 = vpop.f32.mrf.mxu1  ;;  %v9982_v3 = vadd.f32 %v3036_v45, %v9778_v23  ;;  %v2923_v23 = vadd.f32 %v9896_v28, %v9678_v7  ;;  %v3694_v7 = vmul.f32 0.70710677, %v9871_v26  ;;  %v10018_v28 = vadd.f32 %v7546_v25, %v3019_v20 }
 0x288   : > { %v7427_v49 = vpop.f32.mrf.mxu0  ;;  %v3031_v20 = vadd.f32 %v7421_v47, %v9769_v31 }
 0x289   : > { %v7549_v35 = vpop.f32.mrf.mxu1  ;;  %12695 = vst [vmem:[#allocation82_spill] sm:$0xff] %v9982_v3  ;;  %v9997_v60 = vadd.f32 %v7427_v49, %v9781_v17  ;;  %v10008_v44 = vadd.f32 %v9913_v19, %v2923_v23  ;;  %v3708_v17 = vmul.f32 0.70710677, %v9994_v48  ;;  %v3013_v23 = vadd.f32 %v3012_v8, %v9765_v13  ;;  %v12702_v8 = vld [vmem:[#allocation42_spill] sm:$0xff] }
 0x28a   : > { %v9968_v1 = vpop.f32.mrf.mxu0  ;;  %v3007_v13 = vadd.f32 %v9942_v30, %v9753_v52  ;;  %v10051_v31 = vadd.f32 %v7549_v35, %v3031_v20 }
 0x28b   : > { %v9970_v62 = vpop.f32.mrf.mxu1  ;;  %v3706_v38 = vmul.f32 0.70710677, %v10008_v44  ;;  %7664 = verf.f32 %v3708_v17  ;;  %v3698_v17 = vmul.f32 0.70710677, %v9883_v56 }
 0x28c   : > { %v9972_v12 = vpop.f32.mrf.mxu0  ;;  %7666 = verf.f32 %v3694_v7  ;;  %v1874_v7 = vadd.f32 %v9735_v34, %v12702_v8  ;;  %v10067_v30 = vadd.f32 %v9960_v36, %v3007_v13 }
 0x28d   : > { %v9977_v24 = vpop.f32.mrf.mxu1 }
 0x28e   : > { %v9979_v0 = vpop.f32.mrf.mxu0  ;;  %v2430_v35 = vadd.f32 %v9757_v14, %v1874_v7 }
 0x28f   : > { %v9984_v2 = vpop.f32.mrf.mxu1 }
 0x290   : > { %12696 = vst [vmem:[#allocation84_spill] sm:$0xff] %v9984_v2  ;;  %v9986_v39 = vpop.f32.mrf.mxu0  ;;  %v12087_v2 = vlaneseq  ;;  %v3001_v14 = vadd.f32 %v9946_v57, %v2430_v35 }
 0x291   : > { %12697 = vst [vmem:[#allocation85_spill] sm:$0xff] %v9986_v39  ;;  %v9990_v4 = vpop.f32.mrf.mxu1  ;;  %v2929_v39 = vadd.f32 %v9908_v27, %v9694_v16  ;;  %v3696_v27 = vmul.f32 0.70710677, %v9877_v21  ;;  %v12771_v21 = vld [vmem:[#allocation72_spill] sm:$0xff] }
 0x292   : > { %v9992_v61 = vpop.f32.mrf.mxu0  ;;  %v10023_v16 = vand.u32 127, %v12087_v2  ;;  %v3722_v2 = vmul.f32 0.70710677, %v10018_v28  ;;  %v10091_v8 = vadd.f32 %v9966_v55, %v3001_v14 }
 0x293   : > { %v10005_v3 = vpop.f32.mrf.mxu1  ;;  %v10015_v6 = vadd.f32 %v9920_v22, %v2929_v39  ;;  %v10034_v39 = vadd.f32 %v9915_v58, %v2917_v33  ;;  %7668 = verf.f32 %v3696_v27  ;;  %v2911_v27 = vadd.f32 %v9888_v37, %v9668_v54  ;;  %v12703_v33 = vld [vmem:[#allocation35_spill] sm:$0xff] }
 0x294   : > { %v10001_v45 = vpop.f32.mrf.mxu0  ;;  %7670 = verf.f32 %v3706_v38  ;;  %v12704_v38 = vld [vmem:[#allocation37_spill] sm:$0xff] }
 0x295   : > { %v10028_v19 = vpop.f32.mrf.mxu1  ;;  %v3707_v25 = vmul.f32 0.70710677, %v10015_v6  ;;  %v1860_v52 = vadd.f32 %v9724_v11, %v12704_v38  ;;  %v10071_v34 = vadd.f32 %v9906_v32, %v2911_v27  ;;  %v3724_v11 = vmul.f32 0.70710677, %v10051_v31 }
 0x296   : > { %v10011_v41 = vpop.f32.mrf.mxu0  ;;  %v3025_v32 = vadd.f32 %v9964_v18, %v9772_v15  ;;  %v10103_v18 = vadd.f32 %v9977_v24, %v9975_v5  ;;  %v12717_v5 = vld [vmem:[#allocation24_spill] sm:$0xff] }
 0x297   : > { %v10046_v58 = vpop.f32.mrf.mxu1  ;;  %7672 = verf.f32 %v3707_v25  ;;  %v12705_v25 = vld [vmem:[#allocation13_spill] sm:$0xff]  ;;  %v2414_v20 = vadd.f32 %v9748_v63, %v1860_v52  ;;  %v12707_v63 = vld [vmem:[#allocation91_spill] sm:$0xff]  ;;  %v3704_v13 = vmul.f32 0.70710677, %v10071_v34  ;;  %v12715_v35 = vld [vmem:[#allocation84_spill] sm:$0xff] }
 0x298   : > { %v10020_v49 = vpop.f32.mrf.mxu0  ;;  %7674 = verf.f32 %v3722_v2  ;;  %v3697_v2 = vmul.f32 0.70710677, %v9886_v50  ;;  %v10094_v57 = vadd.f32 %v9970_v62, %v3025_v32  ;;  %12709 = vst [vmem:[#allocation97_spill] sm:$0xff] %v10103_v18  ;;  %v3700_v62 = vmul.f32 0.70710677, %v9890_v40  ;;  %v7665_v52 = vpop.eup %7664  ;;  %v12718_v24 = vld [vmem:[#allocation85_spill] sm:$0xff] }
 0x299   : > { %12698 = vst [vmem:[#allocation87_spill] sm:$0xff] %v10020_v49  ;;  %v10044_v49 = vadd.f32 %v3477_v59, %v3013_v23  ;;  %v3705_v59 = vmul.f32 0.70710677, %v10034_v39  ;;  %v10062_v23 = vadd.f32 %v9702_v10, %v12703_v33  ;;  %v7561_v37 = vpop.f32.mrf.mxu1  ;;  %v1846_v10 = vadd.f32 %v9713_v46, %v12705_v25  ;;  %v12713_v33 = vld [vmem:[#allocation63_spill] sm:$0xff] }
 0x29a   : > { %v10031_v22 = vpop.f32.mrf.mxu0  ;;  %v3720_v46 = vmul.f32 0.70710677, %v10067_v30  ;;  %v3079_v25 = vadd.f32 %v12718_v24, %v12717_v5  ;;  %v3719_v32 = vmul.f32 0.70710677, %v10091_v8 }
 0x29b   : > { %12699 = vst [vmem:[#allocation90_spill] sm:$0xff] %v10031_v22  ;;  %v3695_v22 = vmul.f32 0.70710677, %v9880_v29  ;;  %v3721_v54 = vmul.f32 0.70710677, %v10044_v49  ;;  %v3537_v7 = vpop.f32.mrf.mxu1 }
 0x29c   : > { %v10040_v51 = vpop.f32.mrf.mxu0 }
 0x29d   : > { %12700 = vst [vmem:[#allocation92_spill] sm:$0xff] %v10040_v51  ;;  %7676 = verf.f32 %v3695_v22  ;;  %v2905_v22 = vadd.f32 %v9892_v43, %v9672_v9  ;;  %v12708_v9 = vld [vmem:[#allocation93_spill] sm:$0xff] }
 0x29e   : > { %v10053_v47 = vpop.f32.mrf.mxu0  ;;  %7678 = verf.f32 %v3698_v17  ;;  %v3049_v17 = vadd.f32 %v9968_v1, %v12707_v63  ;;  %v3067_v43 = vadd.f32 %v9972_v12, %v12708_v9  ;;  %v12710_v1 = vld [vmem:[#allocation95_spill] sm:$0xff]  ;;  %v12714_v12 = vld [vmem:[#allocation82_spill] sm:$0xff]  ;;  %v7564_v63 = vpop.f32.mrf.mxu1 }
 0x29f   : > { %12701 = vst [vmem:[#allocation94_spill] sm:$0xff] %v10053_v47  ;;  %7680 = verf.f32 %v3705_v59  ;;  %v10097_v15 = vadd.f32 %v9910_v42, %v2905_v22  ;;  %v3061_v27 = vadd.f32 %v9979_v0, %v12710_v1  ;;  %v12712_v59 = vld [vmem:[#allocation36_spill] sm:$0xff]  ;;  %v3723_v42 = vmul.f32 0.70710677, %v10094_v57  ;;  %v12721_v22 = vld [vmem:[#allocation98_spill] sm:$0xff] }
 0x2a0   : > { %v10078_v36 = vpop.f32.mrf.mxu0  ;;  %7682 = verf.f32 %v3724_v11  ;;  %v2995_v38 = vadd.f32 %v12713_v33, %v12712_v59  ;;  %v10121_v0 = vadd.f32 %v9990_v4, %v9997_v60  ;;  %v10123_v11 = vpop.eup %7666  ;;  %v12722_v59 = vld [vmem:[#allocation67_spill] sm:$0xff]  ;;  %v10136_v60 = vadd.f32 %v10005_v3, %v3049_v17 }
 0x2a1   : > { %12706 = vst [vmem:[#allocation96_spill] sm:$0xff] %v10078_v36  ;;  %7684 = verf.f32 %v3721_v54  ;;  %v10115_v54 = vadd.f32 %v12715_v35, %v12714_v12  ;;  %v10131_v9 = vpop.eup %7668  ;;  %v3703_v1 = vmul.f32 0.70710677, %v10097_v15  ;;  %v2989_v4 = vadd.f32 %v12722_v59, %v2414_v20  ;;  %v12724_v35 = vld [vmem:[#allocation34_spill] sm:$0xff]  ;;  %v12728_v20 = vld [vmem:[#allocation48_spill] sm:$0xff] }
 0x2a2   : > { %v10107_v55 = vpop.f32.mrf.mxu0  ;;  %7686 = verf.f32 %v3697_v2  ;;  %12719 = vst [vmem:[#allocation102_spill] sm:$0xff] %v10121_v0  ;;  %v12720_v2 = vld [vmem:[#allocation73_spill] sm:$0xff]  ;;  %12723 = vst [vmem:[#allocation103_spill] sm:$0xff] %v10136_v60  ;;  %v3836_v12 = vadd.f32 1.0, %v7665_v52  ;;  %v10141_v5 = vadd.f32 %v10028_v19, %v3067_v43  ;;  %v12729_v59 = vld [vmem:[#allocation60_spill] sm:$0xff]  ;;  %v10149_v17 = vadd.f32 %v10046_v58, %v3061_v27 }
 0x2a3   : > { %12711 = vst [vmem:[#allocation99_spill] sm:$0xff] %v10107_v55  ;;  %7688 = verf.f32 %v3720_v46  ;;  %12716 = vst [vmem:[#allocation100_spill] sm:$0xff] %v10115_v54  ;;  %v10126_v14 = vadd.f32 %v12720_v2, %v2995_v38  ;;  %v3073_v46 = vadd.f32 %v9992_v61, %v12721_v22  ;;  %v7671_v38 = vpop.eup %7670  ;;  %v12726_v61 = vld [vmem:[#allocation101_spill] sm:$0xff]  ;;  %v12727_v2 = vld [vmem:[#allocation54_spill] sm:$0xff]  ;;  %v2983_v3 = vadd.f32 %v12729_v59, %v12728_v20 }
 0x2a4   : > { %7690 = verf.f32 %v3723_v42  ;;  %v7448_v33 = vpop.f32.mrf.mxu0  ;;  %v3091_v42 = vadd.f32 %v10001_v45, %v12724_v35  ;;  %12725 = vst [vmem:[#allocation27_spill] sm:$0xff] %v10141_v5  ;;  %v3085_v24 = vadd.f32 %v10011_v41, %v12726_v61  ;;  %v3702_v22 = vmul.f32 0.70710677, %v12727_v2  ;;  %12730 = vst [vmem:[#allocation106_spill] sm:$0xff] %v10149_v17  ;;  %v12731_v45 = vld [vmem:[#allocation79_spill] sm:$0xff]  ;;  %v3549_v41 = vpop.f32.mrf.mxu1  ;;  %v12750_v55 = vld [vmem:[#allocation57_spill] sm:$0xff] }
 0x2a5   : > { %7692 = verf.f32 %v3704_v13  ;;  %v7673_v13 = vpop.eup %7672  ;;  %v3718_v53 = vmul.f32 0.70710677, %v10126_v14  ;;  %v10153_v35 = vadd.f32 %v12731_v45, %v2989_v4  ;;  %v10155_v19 = vadd.f32 %v7561_v37, %v3079_v25  ;;  %v12734_v54 = vld [vmem:[#allocation55_spill] sm:$0xff]  ;;  %v12736_v4 = vld [vmem:[#allocation69_spill] sm:$0xff] }
 0x2a6   : > { %7694 = verf.f32 %v3700_v62  ;;  %v7675_v52 = vpop.eup %7674  ;;  %v12733_v62 = vld [vmem:[#allocation89_spill] sm:$0xff]  ;;  %v3701_v47 = vmul.f32 0.70710677, %v12734_v54  ;;  %v10161_v20 = vadd.f32 %v3537_v7, %v3073_v46  ;;  %v3132_v58 = vpop.f32.mrf.mxu0  ;;  %v3834_v59 = vadd.f32 1.0, %v7671_v38 }
 0x2a7   : > { %7696 = verf.f32 %v3719_v32  ;;  %12732 = vst [vmem:[#allocation108_spill] sm:$0xff] %v10155_v19  ;;  %v2398_v61 = vadd.f32 %v12733_v62, %v1846_v10  ;;  %v3900_v51 = vmul.f32 0.5, %v3836_v12  ;;  %v10166_v45 = vadd.f32 %v12736_v4, %v2983_v3 }
 0x2a8   : > { %7698 = verf.f32 %v3703_v1  ;;  %12735 = vst [vmem:[#allocation12_spill] sm:$0xff] %v10161_v20  ;;  %v10168_v37 = vadd.f32 %v7564_v63, %v3091_v42  ;;  %v3835_v32 = vadd.f32 1.0, %v7673_v13  ;;  %v3850_v17 = vadd.f32 1.0, %v7675_v52  ;;  %v12743_v1 = vld [vmem:[#allocation61_spill] sm:$0xff]  ;;  %v12744_v42 = vld [vmem:[#allocation88_spill] sm:$0xff]  ;;  %v7451_v52 = vpop.f32.mrf.mxu0 }
 0x2a9   : > { %7700 = verf.f32 %v3702_v22  ;;  %v10170_v10 = vadd.f32 %v3549_v41, %v3085_v24  ;;  %v12739_v7 = vand.u32 63, %v10023_v16  ;;  %v12740_v46 = vmov 0  ;;  %v12745_v13 = vld [vmem:[#allocation52_spill] sm:$0xff] }
 0x2aa   : > { %v10157_v43 = vpop.eup %7676  ;;  %12737 = vst [vmem:[#allocation111_spill] sm:$0xff] %v10168_v37  ;;  %v2977_v38 = vadd.f32 %v12743_v1, %v2398_v61  ;;  %7702 = verf.f32 %v3718_v53  ;;  %v3717_v12 = vmul.f32 0.70710677, %v10153_v35  ;;  %v2382_v22 = vadd.f32 %v12744_v42, %v10062_v23  ;;  %v12746_v61 = vld [vmem:[#allocation70_spill] sm:$0xff]  ;;  %v10193_v42 = vpop.f32.mrf.mxu1 }
 0x2ab   : > { %v10163_v27 = vpop.eup %7678  ;;  %12738 = vst [vmem:[#allocation14_spill] sm:$0xff] %v10170_v10  ;;  %vm10174_vm0 = vcmp.lt.s32.totalorder %v12739_v7, 32  ;;  %v3699_v3 = vmul.f32 0.70710677, %v12745_v13  ;;  %7704 = verf.f32 %v3701_v47  ;;  %v10183_v41 = vmul.f32 0.5, %v3834_v59  ;;  %12747 = vst [vmem:[#allocation15_spill] sm:$0xff] %v10193_v42 }
 0x2ac   : > { %v7681_v25 = vpop.eup %7680  ;;  %v12741_v46 = vsel %vm10174_vm0, 4294967295, %v12740_v46  ;;  %v3966_v16 = vsel %vm10174_vm0, %v3900_v51, 1.0  ;;  %v3716_v4 = vmul.f32 0.70710677, %v10166_v45  ;;  %v10189_v53 = vadd.f32 %v12746_v61, %v2977_v38  ;;  %v12748_v47 = vld [vmem:[#allocation112_spill] sm:$0xff]  ;;  %v12749_v37 = vld [vmem:[#allocation86_spill] sm:$0xff] }
 0x2ad   : > { %v7683_v62 = vpop.eup %7682  ;;  %12742 = vst [vmem:[#allocation46_spill] sm:$0xff] %v12741_v46  ;;  %v3899_v1 = vmul.f32 0.5, %v3835_v32  ;;  %v3914_v10 = vmul.f32 0.5, %v3850_v17  ;;  %v3833_v20 = vadd.f32 1.0, %v7681_v25  ;;  %v2971_v51 = vadd.f32 %v12750_v55, %v12749_v37  ;;  %v12751_v32 = vld [vmem:[#allocation113_spill] sm:$0xff]  ;;  %v12752_v61 = vld [vmem:[#allocation114_spill] sm:$0xff] }
 0x2ae   : > { %v7685_v63 = vpop.eup %7684  ;;  %v3852_v24 = vadd.f32 1.0, %v7683_v62  ;;  %v10196_v62 = vadd.f32 %v7448_v33, %v12748_v47  ;;  %7706 = verf.f32 %v3717_v12  ;;  %v10201_v38 = vmul.f32 %v3966_v16, %v9994_v48  ;;  %v3144_v47 = vpop.f32.mrf.mxu0  ;;  %v12753_v42 = vld [vmem:[#allocation65_spill] sm:$0xff] }
 0x2af   : > { %v10191_v7 = vpop.eup %7686  ;;  %v3849_v19 = vadd.f32 1.0, %v7685_v63  ;;  %v10209_v33 = vadd.f32 %v7451_v52, %v12752_v61  ;;  %v10212_v36 = vadd.f32 %v12753_v42, %v2971_v51  ;;  %7708 = verf.f32 %v3716_v4  ;;  %v10222_v52 = vpop.f32.mrf.mxu1  ;;  %v12755_v42 = vld [vmem:[#allocation115_spill] sm:$0xff] }
 0x2b0   : > { %v3916_v23 = vmul.f32 0.5, %v3852_v24  ;;  %v7689_v59 = vpop.eup %7688  ;;  %v10206_v24 = vadd.f32 %v3132_v58, %v12751_v32  ;;  %v3965_v37 = vsel %vm10174_vm0, %v3899_v1, 1.0  ;;  %v3715_v12 = vmul.f32 0.70710677, %v10189_v53  ;;  %12754 = vst [vmem:[#allocation16_spill] sm:$0xff] %v10222_v52 }
 0x2b1   : > { %v7691_v5 = vpop.eup %7690  ;;  %v3848_v58 = vadd.f32 1.0, %v7689_v59  ;;  %v3980_v63 = vsel %vm10174_vm0, %v3914_v10, 1.0  ;;  %7710 = verf.f32 %v3699_v3  ;;  %v10233_v59 = vand.u32 4294901760, %v10201_v38 }
 0x2b2   : > { %v3982_v17 = vsel %vm10174_vm0, %v3916_v23, 1.0  ;;  %v7693_v25 = vpop.eup %7692  ;;  %v3851_v48 = vadd.f32 1.0, %v7691_v5  ;;  %v3913_v23 = vmul.f32 0.5, %v3849_v19  ;;  %v10230_v5 = vadd.f32 %v3144_v47, %v12755_v42 }
 0x2b3   : > { %v10215_v55 = vmul.f32 %v3982_v17, %v10051_v31  ;;  %v10224_v16 = vpop.eup %7694  ;;  %v3832_v1 = vadd.f32 1.0, %v7693_v25  ;;  %12756 = vst [vmem:[#allocation53_spill] sm:$0xff] %v10233_v59  ;;  %v12757_v17 = vld [vmem:[#allocation59_spill] sm:$0xff]  ;;  %v3964_v19 = vsel %vm10174_vm0, %v10183_v41, 1.0  ;;  %v3897_v61 = vmul.f32 0.5, %v3833_v20  ;;  %v12758_v25 = vld [vmem:[#allocation68_spill] sm:$0xff]  ;;  %v10255_v20 = vpop.f32.mrf.mxu1 }
 0x2b4   : > { %v3915_v31 = vmul.f32 0.5, %v3851_v48  ;;  %v7697_v51 = vpop.eup %7696  ;;  %v2965_v10 = vadd.f32 %v12757_v17, %v2382_v22  ;;  %v10240_v52 = vmul.f32 %v3965_v37, %v10015_v6  ;;  %v3714_v3 = vmul.f32 0.70710677, %v10212_v36  ;;  %12759 = vst [vmem:[#allocation17_spill] sm:$0xff] %v10255_v20 }
 0x2b5   : > { %v10227_v4 = vand.u32 4294901760, %v10215_v55  ;;  %v7699_v32 = vpop.eup %7698  ;;  %v10250_v22 = vmul.f32 %v3980_v63, %v10018_v28  ;;  %7712 = verf.f32 %v3715_v12  ;;  %v3912_v41 = vmul.f32 0.5, %v3848_v58  ;;  %v10279_v0 = vpop.f32.mrf.mxu1 }
 0x2b6   : > { %v3981_v47 = vsel %vm10174_vm0, %v3915_v31, 1.0  ;;  %v10247_v48 = vadd.f32 %v12758_v25, %v2965_v10  ;;  %v7701_v6 = vpop.eup %7700  ;;  %v3847_v37 = vadd.f32 1.0, %v7697_v51  ;;  %v3979_v31 = vsel %vm10174_vm0, %v3913_v23, 1.0  ;;  %v12760_v10 = vld [vmem:[#allocation49_spill] sm:$0xff]  ;;  %12763 = vst [vmem:[#allocation18_spill] sm:$0xff] %v10279_v0 }
 0x2b7   : > { %6422 = vmatprep.subr.mxu0 %v10227_v4  ;;  %v10253_v42 = vmul.f32 %v3981_v47, %v10094_v57  ;;  %v7703_v17 = vpop.eup %7702  ;;  %v3693_v25 = vmul.f32 0.70710677, %v12760_v10  ;;  %v3896_v57 = vmul.f32 0.5, %v3832_v1  ;;  %v3831_v47 = vadd.f32 1.0, %v7699_v32 }
 0x2b8   : > { %6423 = vmatpush3.xpose.msra.mxu0 %v10233_v59  ;;  %v7705_v63 = vpop.eup %7704  ;;  %v10265_v20 = vmul.f32 %v3964_v19, %v10008_v44  ;;  %v10268_v60 = vand.u32 4294901760, %v10240_v52  ;;  %v3963_v12 = vsel %vm10174_vm0, %v3897_v61, 1.0  ;;  %v3713_v58 = vmul.f32 0.70710677, %v10247_v48 }
 0x2b9   : > { %v10262_v28 = vand.u32 4294901760, %v10253_v42  ;;  %v10274_v23 = vand.u32 4294901760, %v10250_v22  ;;  %v10277_v51 = vmul.f32 %v3979_v31, %v10044_v49  ;;  %7714 = verf.f32 %v3714_v3 }
 0x2ba   : > { %12761 = vst [vmem:[#allocation56_spill] sm:$0xff] %v10268_v60  ;;  %v3846_v44 = vadd.f32 1.0, %v7703_v17  ;;  %v3978_v1 = vsel %vm10174_vm0, %v3912_v41, 1.0  ;;  %v3911_v32 = vmul.f32 0.5, %v3847_v37  ;;  %7716 = verf.f32 %v3693_v25  ;;  %v12765_v37 = vld [vmem:[#allocation77_spill] sm:$0xff] }
 0x2bb   : > { %12762 = vst [vmem:[#allocation58_spill] sm:$0xff] %v10274_v23  ;;  %6424 = vmatprep.subr.mxu0 %v10262_v28  ;;  %v7707_v19 = vpop.eup %7706  ;;  %v3824_v61 = vadd.f32 1.0, %v10131_v9  ;;  %v3830_v18 = vadd.f32 1.0, %v7701_v6  ;;  %v3962_v49 = vsel %vm10174_vm0, %v3896_v57, 1.0  ;;  %v3895_v31 = vmul.f32 0.5, %v3831_v47  ;;  %v10302_v6 = vpop.f32.mrf.mxu1 }
 0x2bc   : > { %6425 = vmatpush3.xpose.msra.mxu0 %v10268_v60  ;;  %v10290_v3 = vand.u32 4294901760, %v10265_v20  ;;  %v10293_v17 = vmul.f32 %v3963_v12, %v10034_v39  ;;  %v7709_v41 = vpop.eup %7708  ;;  %v3712_v0 = vmul.f32 0.70710677, %v12765_v37  ;;  %7718 = verf.f32 %v3713_v58  ;;  %12766 = vst [vmem:[#allocation19_spill] sm:$0xff] %v10302_v6 }
 0x2bd   : > { %6426 = vmatprep.subr.mxu0 %v10274_v23  ;;  %v10297_v25 = vmul.f32 %v3978_v1, %v10067_v30  ;;  %v10300_v9 = vand.u32 4294901760, %v10277_v51  ;;  %v10305_v57 = vadd.f32 1.0, %v10123_v11  ;;  %v3910_v47 = vmul.f32 0.5, %v3846_v44 }
 0x2be   : > { %12764 = vst [vmem:[#allocation62_spill] sm:$0xff] %v10290_v3  ;;  %v3845_v10 = vadd.f32 1.0, %v7707_v19  ;;  %v3977_v39 = vsel %vm10174_vm0, %v3911_v32, 1.0  ;;  %v10310_v12 = vmul.f32 0.5, %v3824_v61  ;;  %v10313_v30 = vadd.f32 1.0, %v10157_v43  ;;  %v7711_v11 = vpop.eup %7710 }
 0x2bf   : > { %v3826_v58 = vadd.f32 1.0, %v10163_v27  ;;  %v3828_v1 = vadd.f32 1.0, %v10224_v16  ;;  %v3894_v6 = vmul.f32 0.5, %v3830_v18  ;;  %v3829_v44 = vadd.f32 1.0, %v7705_v63  ;;  %v10332_v16 = vpop.f32.mrf.mxu1  ;;  %v12769_v18 = vld [vmem:[#allocation80_spill] sm:$0xff] }
 0x2c0   : > { %6427 = vmatpush3.xpose.msra.mxu0 %v10290_v3  ;;  %12767 = vst [vmem:[#allocation64_spill] sm:$0xff] %v10310_v12  ;;  %v10319_v19 = vmul.f32 %v3962_v49, %v10071_v34  ;;  %v10322_v32 = vand.u32 4294901760, %v10293_v17  ;;  %v3961_v61 = vsel %vm10174_vm0, %v3895_v31, 1.0  ;;  %7720 = verf.f32 %v3712_v0  ;;  %12768 = vst [vmem:[#allocation21_spill] sm:$0xff] %v10332_v16 }
 0x2c1   : > { %6428 = vmatprep.subr.mxu0 %v10300_v9  ;;  %v10327_v43 = vand.u32 4294901760, %v10297_v25  ;;  %v10330_v27 = vmul.f32 %v3977_v39, %v10091_v8  ;;  %v3711_v63 = vmul.f32 0.70710677, %v12769_v18  ;;  %v3844_v26 = vadd.f32 1.0, %v7709_v41 }
 0x2c2   : > { %v3976_v34 = vsel %vm10174_vm0, %v3910_v47, 1.0  ;;  %v3909_v49 = vmul.f32 0.5, %v3845_v10  ;;  %v7713_v29 = vpop.eup %7712  ;;  %v10341_v31 = vmul.f32 0.5, %v3826_v58  ;;  %v3825_v8 = vadd.f32 1.0, %v10191_v7 }
 0x2c3   : > { %v3827_v39 = vadd.f32 1.0, %v7711_v11  ;;  %v3892_v16 = vmul.f32 0.5, %v3828_v1  ;;  %v3960_v41 = vsel %vm10174_vm0, %v3894_v6, 1.0  ;;  %v10348_v10 = vand.u32 4294901760, %v10319_v19  ;;  %v7576_v11 = vpop.f32.mrf.mxu1 }
 0x2c4   : > { %6429 = vmatpush3.xpose.msra.mxu0 %v10322_v32  ;;  %v10351_v47 = vmul.f32 %v3961_v61, %v10097_v15  ;;  %v3893_v18 = vmul.f32 0.5, %v3829_v44  ;;  %v3710_v0 = vmul.f32 0.70710677, %v12771_v21  ;;  %v10355_v58 = vmul.f32 %v3976_v34, %v10126_v14 }
 0x2c5   : > { %6430 = vmatprep.subr.mxu0 %v10327_v43  ;;  %12770 = vst [vmem:[#allocation66_spill] sm:$0xff] %v10348_v10  ;;  %v10358_v7 = vand.u32 4294901760, %v10330_v27  ;;  %7722 = verf.f32 %v3711_v63  ;;  %v3908_v1 = vmul.f32 0.5, %v3844_v26  ;;  %v3843_v12 = vadd.f32 1.0, %v7713_v29  ;;  %v3597_v21 = vpop.f32.mrf.mxu1 }
 0x2c6   : > { %v3975_v6 = vsel %vm10174_vm0, %v3909_v49, 1.0  ;;  %v7715_v15 = vpop.eup %7714  ;;  %v10366_v61 = vmul.f32 0.5, %v3825_v8  ;;  %v3891_v14 = vmul.f32 0.5, %v3827_v39  ;;  %v10370_v34 = vsub.f32 %v10201_v38, %v10233_v59  ;;  %v12775_v8 = vld [vmem:[#allocation74_spill] sm:$0xff] }
 0x2c7   : > { %12772 = vst [vmem:[#allocation22_spill] sm:$0xff] %v10358_v7  ;;  %v10373_v26 = vpop.eup %7716  ;;  %v3958_v29 = vsel %vm10174_vm0, %v3892_v16, 1.0  ;;  %v10378_v63 = vmul.f32 %v3960_v41, %v12727_v2  ;;  %v10381_v49 = vand.u32 4294901760, %v10351_v47  ;;  %v3709_v44 = vmul.f32 0.70710677, %v12775_v8 }
 0x2c8   : > { %6431 = vmatpush3.xpose.msra.mxu0 %v10348_v10  ;;  %12773 = vst [vmem:[#allocation29_spill] sm:$0xff] %v10373_v26  ;;  %v3959_v39 = vsel %vm10174_vm0, %v3893_v18, 1.0  ;;  %7724 = verf.f32 %v3710_v0  ;;  %v10387_v38 = vand.u32 4294901760, %v10355_v58  ;;  %v10390_v59 = vmul.f32 %v3975_v6, %v10153_v35 }
 0x2c9   : > { %6432 = vmatprep.subr.mxu0 %v10358_v7  ;;  %12774 = vst [vmem:[#allocation71_spill] sm:$0xff] %v10381_v49  ;;  %v7719_v16 = vpop.eup %7718  ;;  %v3842_v26 = vadd.f32 1.0, %v7715_v15  ;;  %v3974_v2 = vsel %vm10174_vm0, %v3908_v1, 1.0  ;;  %v3907_v41 = vmul.f32 0.5, %v3843_v12  ;;  %v10396_v8 = vsub.f32 %v10215_v55, %v10227_v4 }
 0x2ca   : > { %12776 = vst [vmem:[#allocation31_spill] sm:$0xff] %v10387_v38  ;;  %v10400_v18 = vmul.f32 %v3958_v29, %v9890_v40  ;;  %v3957_v35 = vsel %vm10174_vm0, %v3891_v14, 1.0  ;;  %v10407_v6 = vsub.f32 %v10240_v52, %v10268_v60  ;;  %v10411_v12 = vand.u32 4294901760, %v10378_v63  ;;  %v7579_v29 = vpop.f32.mrf.mxu1 }
 0x2cb   : > { %12777 = vst [vmem:[#allocation75_spill] sm:$0xff] %v10396_v8  ;;  %v10414_v55 = vmul.f32 %v3959_v39, %v12734_v54  ;;  %v10418_v40 = vsub.f32 %v10265_v20, %v10290_v3  ;;  %7726 = verf.f32 %v3709_v44  ;;  %v3841_v1 = vadd.f32 1.0, %v7719_v16 }
 0x2cc   : > { %6433 = vmatpush3.xpose.msra.mxu0 %v10381_v49  ;;  %v10421_v15 = vmul.f32 %v3974_v2, %v10166_v45  ;;  %v10424_v52 = vand.u32 4294901760, %v10390_v59  ;;  %v10427_v14 = vadd.f32 %v7576_v11, %v10196_v62  ;;  %v3906_v60 = vmul.f32 0.5, %v3842_v26 }
 0x2cd   : > { %6434 = vmatprep.subr.mxu0 %v10387_v38  ;;  %v7721_v0 = vpop.eup %7720  ;;  %v3973_v54 = vsel %vm10174_vm0, %v3907_v41, 1.0  ;;  %v10433_v20 = vsub.f32 %v10253_v42, %v10262_v28  ;;  %v12111_v44 = vand.u32 4294901760, %v10396_v8  ;;  %v10438_v45 = vand.u32 4294901760, %v10400_v18 }
 0x2ce   : > { %12778 = vst [vmem:[#allocation76_spill] sm:$0xff] %v10427_v14  ;;  %v10441_v62 = vmul.f32 %v3957_v35, %v12745_v13  ;;  %v12780_v26 = vand.u32 4294901760, %v10370_v34  ;;  %v10449_v42 = vand.u32 4294901760, %v10414_v55  ;;  %v10454_v2 = vsub.f32 %v10250_v22, %v10274_v23  ;;  %v3609_v14 = vpop.f32.mrf.mxu1 }
 0x2cf   : > { %12779 = vst [vmem:[#allocation32_spill] sm:$0xff] %v10438_v45  ;;  %v4304_v13 = vsub.f32 %v10396_v8, %v12111_v44  ;;  %v3840_v41 = vadd.f32 1.0, %v7721_v0  ;;  %v10460_v35 = vand.u32 4294901760, %v10421_v15  ;;  %v10466_v11 = vadd.f32 %v3597_v21, %v10206_v24 }
 0x2d0   : > { %6435 = vmatpush3.xpose.msra.mxu0 %v10411_v12  ;;  %v4192_v39 = vsub.f32 %v10370_v34, %v12780_v26  ;;  %v10463_v26 = vmul.f32 %v3973_v54, %v10189_v53  ;;  %v3972_v16 = vsel %vm10174_vm0, %v3906_v60, 1.0  ;;  %v3905_v22 = vmul.f32 0.5, %v3841_v1 }
 0x2d1   : > { %6436 = vmatprep.subr.mxu0 %v10424_v52  ;;  %12781 = vst [vmem:[#allocation78_spill] sm:$0xff] %v10466_v11  ;;  %v4305_v3 = vand.u32 4294901760, %v4304_v13  ;;  %v12112_v23 = vand.u32 4294901760, %v10433_v20  ;;  %v10474_v44 = vsub.f32 %v10293_v17, %v10322_v32  ;;  %v10477_v54 = vadd.f32 %v7579_v29, %v10209_v33 }
 0x2d2   : > { %v7723_v0 = vpop.eup %7722  ;;  %v4193_v53 = vand.u32 4294901760, %v4192_v39  ;;  %v12783_v21 = vand.u32 4294901760, %v10407_v6  ;;  %v10485_v60 = vsub.f32 %v10277_v51, %v10300_v9  ;;  %v10491_v1 = vadd.f32 %v3609_v14, %v10230_v5 }
 0x2d3   : > { %12782 = vst [vmem:[#allocation41_spill] sm:$0xff] %v10477_v54  ;;  %6456 = vmatprep.subr.mxu1 %v4305_v3  ;;  %v4311_v17 = vsub.f32 %v10433_v20, %v12112_v23  ;;  %v12113_v33 = vand.u32 4294901760, %v10454_v2  ;;  %v10496_v29 = vsub.f32 %v10319_v19, %v10348_v10  ;;  %v3904_v39 = vmul.f32 0.5, %v3840_v41 }
 0x2d4   : > { %6437 = vmatpush3.xpose.msra.mxu0 %v10449_v42  ;;  %v4199_v24 = vsub.f32 %v10407_v6, %v12783_v21  ;;  %12784 = vst [vmem:[#allocation81_spill] sm:$0xff] %v10491_v1  ;;  %v10499_v13 = vmul.f32 %v3972_v16, %v10212_v36  ;;  %v10502_v51 = vand.u32 4294901760, %v10463_v26  ;;  %6457 = vmatpush3.xpose.msra.mxu1 %v4193_v53  ;;  %v3839_v21 = vadd.f32 1.0, %v7723_v0 }
 0x2d5   : > { %6438 = vmatprep.subr.mxu0 %v10460_v35  ;;  %v7725_v3 = vpop.eup %7724  ;;  %v3971_v5 = vsel %vm10174_vm0, %v3905_v22, 1.0  ;;  %v4312_v14 = vand.u32 4294901760, %v4311_v17  ;;  %v4318_v23 = vsub.f32 %v10454_v2, %v12113_v33  ;;  %v10513_v36 = vsub.f32 %v10297_v25, %v10327_v43 }
 0x2d6   : > { %12785 = vst [vmem:[#allocation25_spill] sm:$0xff] %v10502_v51  ;;  %v4200_v16 = vand.u32 4294901760, %v4199_v24  ;;  %v12786_v41 = vand.u32 4294901760, %v10418_v40  ;;  %v12787_v22 = vsel %vm10174_vm0, %v10341_v31, 1.0  ;;  %v10527_v17 = vand.u32 4294901760, %v10441_v62 }
 0x2d7   : > { %v10524_v53 = vmul.f32 %v12787_v22, %v9883_v56  ;;  %6458 = vmatprep.subr.mxu1 %v4312_v14  ;;  %v4319_v25 = vand.u32 4294901760, %v4318_v23  ;;  %v12115_v24 = vand.u32 4294901760, %v10485_v60  ;;  %v10535_v11 = vand.u32 4294901760, %v10499_v13 }
 0x2d8   : > { %6439 = vmatpush3.xpose.msra.mxu0 %v10438_v45  ;;  %v4206_v0 = vsub.f32 %v10418_v40, %v12786_v41  ;;  %12788 = vst [vmem:[#allocation83_spill] sm:$0xff] %v10527_v17  ;;  %v7727_v33 = vpop.eup %7726  ;;  %v3955_v41 = vsel %vm10174_vm0, %v10366_v61, 1.0  ;;  %v10538_v56 = vmul.f32 %v3971_v5, %v10247_v48  ;;  %6459 = vmatpush3.xpose.msra.mxu1 %v4200_v16  ;;  %v3838_v31 = vadd.f32 1.0, %v7725_v3 }
 0x2d9   : > { %6440 = vmatprep.subr.mxu0 %v10502_v51  ;;  %12789 = vst [vmem:[#allocation44_spill] sm:$0xff] %v10535_v11  ;;  %v3970_v23 = vsel %vm10174_vm0, %v3904_v39, 1.0  ;;  %v3903_v14 = vmul.f32 0.5, %v3839_v21  ;;  %6460 = vmatprep.subr.mxu1 %v4319_v25  ;;  %v4325_v22 = vsub.f32 %v10485_v60, %v12115_v24  ;;  %v10548_v61 = vsub.f32 %v10351_v47, %v10381_v49  ;;  %v12799_v49 = vld [vmem:[#allocation80_spill] sm:$0xff] }
 0x2da   : > { %v4207_v19 = vand.u32 4294901760, %v4206_v0  ;;  %v12790_v48 = vand.u32 4294901760, %v10474_v44  ;;  %v12116_v5 = vand.u32 4294901760, %v10513_v36  ;;  %v10556_v39 = vand.u32 4294901760, %v10524_v53 }
 0x2db   : > { %v10559_v21 = vmul.f32 %v3955_v41, %v9886_v50  ;;  %v10563_v16 = vsub.f32 %v10330_v27, %v10358_v7  ;;  %v4326_v47 = vand.u32 4294901760, %v4325_v22  ;;  %v3887_v0 = vmul.f32 0.5, %v10313_v30 }
 0x2dc   : > { %6441 = vmatpush3.xpose.msra.mxu0 %v10527_v17  ;;  %v4213_v3 = vsub.f32 %v10474_v44, %v12790_v48  ;;  %12791 = vst [vmem:[#allocation26_spill] sm:$0xff] %v10556_v39  ;;  %v10567_v25 = vmul.f32 %v3970_v23, %v12765_v37  ;;  %v10570_v48 = vand.u32 4294901760, %v10538_v56  ;;  %6461 = vmatpush3.xpose.msra.mxu1 %v4207_v19  ;;  %v3902_v50 = vmul.f32 0.5, %v3838_v31 }
 0x2dd   : > { %6442 = vmatprep.subr.mxu0 %v10535_v11  ;;  %v4332_v24 = vsub.f32 %v10513_v36, %v12116_v5  ;;  %v3837_v41 = vadd.f32 1.0, %v7727_v33  ;;  %v3969_v27 = vsel %vm10174_vm0, %v3903_v14, 1.0  ;;  %6462 = vmatprep.subr.mxu1 %v4326_v47  ;;  %v3886_v30 = vmul.f32 0.5, %v10305_v57  ;;  %v12794_v5 = vld [vmem:[#allocation50_spill] sm:$0xff]  ;;  %v12795_v33 = vld [vmem:[#allocation64_spill] sm:$0xff] }
 0x2de   : > { %12792 = vst [vmem:[#allocation28_spill] sm:$0xff] %v10570_v48  ;;  %v4214_v23 = vand.u32 4294901760, %v4213_v3  ;;  %v12793_v22 = vand.u32 4294901760, %v10496_v29  ;;  %v12796_v31 = vsel %vm10174_vm0, %v12795_v33, 1.0  ;;  %v10592_v47 = vand.u32 4294901760, %v10559_v21  ;;  %v12798_v3 = vld [vmem:[#allocation29_spill] sm:$0xff] }
 0x2df   : > { %v10589_v14 = vmul.f32 %v12796_v31, %v12794_v5  ;;  %v4333_v57 = vand.u32 4294901760, %v4332_v24  ;;  %v12123_v37 = vand.u32 4294901760, %v10563_v16  ;;  %v3821_v1 = vadd.f32 1.0, %v12798_v3 }
 0x2e0   : > { %6443 = vmatpush3.xpose.msra.mxu0 %v10556_v39  ;;  %v4220_v19 = vsub.f32 %v10496_v29, %v12793_v22  ;;  %12797 = vst [vmem:[#allocation42_spill] sm:$0xff] %v10592_v47  ;;  %v3953_v22 = vsel %vm10174_vm0, %v3887_v0, 1.0  ;;  %v10599_v54 = vand.u32 4294901760, %v10567_v25  ;;  %v10602_v7 = vmul.f32 %v3969_v27, %v12799_v49  ;;  %6463 = vmatpush3.xpose.msra.mxu1 %v4214_v23 }
 0x2e1   : > { %6444 = vmatprep.subr.mxu0 %v10570_v48  ;;  %v3968_v5 = vsel %vm10174_vm0, %v3902_v50, 1.0  ;;  %v3901_v33 = vmul.f32 0.5, %v3837_v41  ;;  %v10608_v24 = vsub.f32 %v10355_v58, %v10387_v38  ;;  %6464 = vmatprep.subr.mxu1 %v4333_v57  ;;  %v4339_v0 = vsub.f32 %v10563_v16, %v12123_v37  ;;  %v12802_v41 = vld [vmem:[#allocation51_spill] sm:$0xff]  ;;  %v12803_v37 = vld [vmem:[#allocation72_spill] sm:$0xff] }
 0x2e2   : > { %v4221_v31 = vand.u32 4294901760, %v4220_v19  ;;  %v12800_v49 = vand.u32 4294901760, %v10548_v61  ;;  %v10619_v50 = vand.u32 4294901760, %v10589_v14  ;;  %v10622_v58 = vmul.f32 %v3953_v22, %v12802_v41 }
 0x2e3   : > { %v4340_v23 = vand.u32 4294901760, %v4339_v0  ;;  %v3952_v57 = vsel %vm10174_vm0, %v3886_v30, 1.0  ;;  %v3885_v3 = vmul.f32 0.5, %v3821_v1  ;;  %v10627_v38 = vmul.f32 %v3968_v5, %v12803_v37  ;;  %v12805_v30 = vld [vmem:[#allocation47_spill] sm:$0xff] }
 0x2e4   : > { %6445 = vmatpush3.xpose.msra.mxu0 %v10592_v47  ;;  %v4227_v27 = vsub.f32 %v10548_v61, %v12800_v49  ;;  %12801 = vst [vmem:[#allocation35_spill] sm:$0xff] %v10619_v50  ;;  %v10630_v19 = vand.u32 4294901760, %v10602_v7  ;;  %6465 = vmatpush3.xpose.msra.mxu1 %v4221_v31  ;;  %v3967_v49 = vsel %vm10174_vm0, %v3901_v33, 1.0  ;;  %v12128_v10 = vand.u32 4294901760, %v10608_v24  ;;  %v12808_v31 = vld [vmem:[#allocation74_spill] sm:$0xff] }
 0x2e5   : > { %6446 = vmatprep.subr.mxu0 %v10599_v54  ;;  %6466 = vmatprep.subr.mxu1 %v4340_v23  ;;  %v10638_v1 = vmul.f32 %v3952_v57, %v12805_v30  ;;  %v10641_v37 = vand.u32 4294901760, %v10622_v58  ;;  %v3951_v5 = vsel %vm10174_vm0, %v3885_v3, 1.0  ;;  %v10647_v33 = vsub.f32 %v10378_v63, %v10411_v12  ;;  %v12810_v63 = vld [vmem:[#allocation49_spill] sm:$0xff] }
 0x2e6   : > { %12804 = vst [vmem:[#allocation37_spill] sm:$0xff] %v10630_v19  ;;  %v4228_v22 = vand.u32 4294901760, %v4227_v27  ;;  %v10650_v0 = vand.u32 4294901760, %v10627_v38  ;;  %v10653_v27 = vmul.f32 %v3967_v49, %v12808_v31  ;;  %v4346_v41 = vsub.f32 %v10608_v24, %v12128_v10 }
 0x2e7   : > { %12806 = vst [vmem:[#allocation13_spill] sm:$0xff] %v10641_v37  ;;  %v10661_v23 = vand.u32 4294901760, %v10638_v1  ;;  %v10664_v57 = vmul.f32 %v3951_v5, %v12810_v63  ;;  %v12129_v30 = vand.u32 4294901760, %v10647_v33  ;;  %v10677_v31 = vsub.f32 %v10414_v55, %v10449_v42 }
 0x2e8   : > { %6447 = vmatpush3.xpose.msra.mxu0 %v10619_v50  ;;  %12807 = vst [vmem:[#allocation91_spill] sm:$0xff] %v10650_v0  ;;  %6467 = vmatpush3.xpose.msra.mxu1 %v4228_v22  ;;  %v4347_v3 = vand.u32 4294901760, %v4346_v41  ;;  %v10668_v49 = vand.u32 4294901760, %v10653_v27  ;;  %v10681_v5 = vsub.f32 %v10390_v59, %v10424_v52  ;;  %v10689_v63 = vsub.f32 %v10400_v18, %v10438_v45 }
 0x2e9   : > { %6448 = vmatprep.subr.mxu0 %v10630_v19  ;;  %12809 = vst [vmem:[#allocation93_spill] sm:$0xff] %v10661_v23  ;;  %v10673_v22 = vand.u32 4294901760, %v10664_v57  ;;  %v4234_v41 = vsub.f32 %v10647_v33, %v12129_v30  ;;  %v10696_v59 = vsub.f32 %v10421_v15, %v10460_v35  ;;  %v10701_v46 = vsub.f32 %v10441_v62, %v10527_v17 }
 0x2ea   : > { %12811 = vst [vmem:[#allocation95_spill] sm:$0xff] %v10668_v49  ;;  %6468 = vmatprep.subr.mxu1 %v4347_v3  ;;  %v12133_v10 = vand.u32 4294901760, %v10681_v5  ;;  %v10720_v30 = vsub.f32 %v10524_v53, %v10556_v39 }
 0x2eb   : > { %12812 = vst [vmem:[#allocation36_spill] sm:$0xff] %v10673_v22  ;;  %v4235_v3 = vand.u32 4294901760, %v4234_v41  ;;  %v10708_v41 = vsub.f32 %v10463_v26, %v10502_v51  ;;  %v12140_v62 = vand.u32 4294901760, %v10696_v59 }
 0x2ec   : > { %6449 = vmatpush3.xpose.msra.mxu0 %v10641_v37  ;;  %v4353_v18 = vsub.f32 %v10681_v5, %v12133_v10 }
 0x2ed   : > { %6450 = vmatprep.subr.mxu0 %v10650_v0  ;;  %6469 = vmatpush3.xpose.msra.mxu1 %v4235_v3  ;;  %v10715_v3 = vsub.f32 %v10499_v13, %v10535_v11  ;;  %v4360_v13 = vsub.f32 %v10696_v59, %v12140_v62  ;;  %v12141_v11 = vand.u32 4294901760, %v10708_v41 }
 0x2ee   : > { %v4354_v55 = vand.u32 4294901760, %v4353_v18  ;;  %v12814_v18 = vand.u32 4294901760, %v10689_v63 }
 0x2ef   : > { %v4361_v53 = vand.u32 4294901760, %v4360_v13 }
 0x2f0   : > { %6451 = vmatpush3.xpose.msra.mxu0 %v10661_v23  ;;  %6470 = vmatprep.subr.mxu1 %v4354_v55  ;;  %v4248_v17 = vsub.f32 %v10689_v63, %v12814_v18  ;;  %v4367_v55 = vsub.f32 %v10708_v41, %v12141_v11 }
 0x2f1   : > { %6452 = vmatprep.subr.mxu0 %v10668_v49 }
 0x2f2   : > { %v4249_v10 = vand.u32 4294901760, %v4248_v17  ;;  %v4368_v13 = vand.u32 4294901760, %v4367_v55  ;;  %v10756_v17 = vsub.f32 %v10589_v14, %v10619_v50  ;;  %v10764_v55 = vsub.f32 %v10602_v7, %v10630_v19 }
 0x2f4   : > { %6453 = vmatpush3.xpose.msra.mxu0 %v10673_v22  ;;  %12818 = vst [vmem:[#allocation82_spill] sm:$0xff] %v10764_v55 }
 0x2f5   : > { %6490 = vmatprep.subr.mxu0 %v10396_v8  ;;  %v12813_v8 = vand.u32 4294901760, %v10677_v31 }
 0x2f7   : > { %v4241_v15 = vsub.f32 %v10677_v31, %v12813_v8  ;;  %v10728_v8 = vsub.f32 %v10538_v56, %v10570_v48  ;;  %v10741_v56 = vsub.f32 %v10559_v21, %v10592_v47  ;;  %v12815_v48 = vand.u32 4294901760, %v10701_v46  ;;  %v4079_v21 = vld [vmem:[#allocation7] sm:$0xff] }
 0x2f9   : > { %v4242_v26 = vand.u32 4294901760, %v4241_v15  ;;  %v12144_v15 = vand.u32 4294901760, %v10715_v3  ;;  %v4255_v62 = vsub.f32 %v10701_v46, %v12815_v48  ;;  %v12147_v18 = vand.u32 4294901760, %v10728_v8 }
 0x2fa   : > { %v12820_v7 = vand.u32 4294901760, %v10741_v56 }
 0x2fb   : > { %6471 = vmatpush3.xpose.msra.mxu1 %v4242_v26  ;;  %v10748_v26 = vsub.f32 %v10567_v25, %v10599_v54  ;;  %v4374_v11 = vsub.f32 %v10715_v3, %v12144_v15  ;;  %v4256_v47 = vand.u32 4294901760, %v4255_v62  ;;  %v12817_v25 = vand.u32 4294901760, %v10720_v30 }
 0x2fc   : > { %6472 = vmatprep.subr.mxu1 %v4361_v53  ;;  %v12151_v62 = vand.u32 4294901760, %v10756_v17 }
 0x2fd   : > { %12816 = vst [vmem:[#allocation63_spill] sm:$0xff] %v10748_v26  ;;  %v4262_v53 = vsub.f32 %v10720_v30, %v12817_v25  ;;  %v4375_v15 = vand.u32 4294901760, %v4374_v11  ;;  %v12148_v14 = vand.u32 4294901760, %v10748_v26  ;;  %v10775_v25 = vsub.f32 %v10622_v58, %v10641_v37 }
 0x2fe   : > { %v4269_v11 = vsub.f32 %v10741_v56, %v12820_v7  ;;  %v10818_v7 = vsub.f32 %v10664_v57, %v10673_v22 }
 0x2ff   : > { %6473 = vmatpush3.xpose.msra.mxu1 %v4249_v10  ;;  %v4381_v10 = vsub.f32 %v10728_v8, %v12147_v18  ;;  %12819 = vst [vmem:[#allocation84_spill] sm:$0xff] %v10775_v25  ;;  %v4263_v48 = vand.u32 4294901760, %v4262_v53  ;;  %v4388_v58 = vsub.f32 %v10748_v26, %v12148_v14 }
 0x300   : > { %6474 = vmatprep.subr.mxu1 %v4368_v13  ;;  %v10770_v13 = vand.u32 4294901760, %v4079_v21  ;;  %12828 = vst [vmem:[#allocation101_spill] sm:$0xff] %v10818_v7  ;;  %v12154_v57 = vand.u32 4294901760, %v10818_v7 }
 0x301   : > { %v4382_v18 = vand.u32 4294901760, %v4381_v10  ;;  %v4276_v10 = vsub.f32 %v10756_v17, %v12151_v62 }
 0x302   : > { %v10781_v19 = vsub.f32 %v4079_v21, %v10770_v13  ;;  %6488 = vmatprep.mubr.f32.mxu1 %v10770_v13  ;;  %v10797_v21 = vsub.f32 %v10638_v1, %v10661_v23 }
 0x303   : > { %6475 = vmatpush3.xpose.msra.mxu1 %v4256_v47  ;;  %v10786_v47 = vsub.f32 %v10627_v38, %v10650_v0  ;;  %v4270_v38 = vand.u32 4294901760, %v4269_v11  ;;  %v12826_v0 = vand.u32 4294901760, %v10764_v55  ;;  %v4277_v23 = vand.u32 4294901760, %v4276_v10 }
 0x304   : > { %6476 = vmatprep.subr.mxu1 %v4375_v15  ;;  %12821 = vst [vmem:[#allocation24_spill] sm:$0xff] %v10781_v19  ;;  %v10793_v53 = vand.u32 4294901760, %v10781_v19  ;;  %12824 = vst [vmem:[#allocation98_spill] sm:$0xff] %v10797_v21  ;;  %v4389_v15 = vand.u32 4294901760, %v4388_v58  ;;  %v12156_v62 = vand.u32 4294901760, %v10797_v21 }
 0x305   : > { %12822 = vst [vmem:[#allocation85_spill] sm:$0xff] %v10786_v47  ;;  %v4395_v1 = vsub.f32 %v10764_v55, %v12826_v0 }
 0x306   : > { %12823 = vst [vmem:[#allocation73_spill] sm:$0xff] %v10793_v53  ;;  %v4180_v14 = vsub.f32 %v10781_v19, %v10793_v53  ;;  %v4290_v10 = vsub.f32 %v10797_v21, %v12156_v62 }
 0x307   : > { %6477 = vmatpush3.xpose.msra.mxu1 %v4263_v48  ;;  %v10807_v48 = vsub.f32 %v10653_v27, %v10668_v49  ;;  %v12829_v27 = vand.u32 4294901760, %v10775_v25  ;;  %v4396_v0 = vand.u32 4294901760, %v4395_v1 }
 0x308   : > { %6478 = vmatprep.subr.mxu1 %v4382_v18  ;;  %v12157_v18 = vand.u32 4294901760, %v10786_v47  ;;  %v10813_v11 = vand.u32 4294901760, %v4180_v14 }
 0x309   : > { %12825 = vst [vmem:[#allocation67_spill] sm:$0xff] %v10807_v48  ;;  %v4283_v58 = vsub.f32 %v10775_v25, %v12829_v27 }
 0x30a   : > { %12827 = vst [vmem:[#allocation34_spill] sm:$0xff] %v10813_v11  ;;  %6454 = vmatprep.mubr.f32.mxu0 %v10813_v11  ;;  %v4402_v14 = vsub.f32 %v10786_v47, %v12157_v18 }
 0x30b   : > { %6479 = vmatpush3.xpose.msra.mxu1 %v4270_v38  ;;  %6455 = vmatmul.mubr.f32.vlgmr.msra.gmra.mxu0 %v10813_v11  ;;  %v4284_v38 = vand.u32 4294901760, %v4283_v58  ;;  %v4297_v58 = vsub.f32 %v10818_v7, %v12154_v57  ;;  %v10875_v57 = vpop.f32.mrf.mxu0 }
 0x30c   : > { %6480 = vmatprep.subr.mxu1 %v4389_v15  ;;  %v12155_v15 = vand.u32 4294901760, %v10807_v48  ;;  %6491 = vmatpush3.xpose.msra.mxu0 %v10370_v34  ;;  %v4403_v1 = vand.u32 4294901760, %v4402_v14  ;;  %12838 = vst [vmem:[#allocation54_spill] sm:$0xff] %v10875_v57  ;;  %v12842_v57 = vld [vmem:[#allocation83_spill] sm:$0xff] }
 0x30d   : > { %6492 = vmatprep.subr.mxu0 %v10433_v20  ;;  %6522 = vmatprep.mubr.f32.mxu0 %v10781_v19  ;;  %v4298_v14 = vand.u32 4294901760, %v4297_v58  ;;  %v12835_v58 = vld [vmem:[#allocation22_spill] sm:$0xff]  ;;  %v10883_v62 = vpop.f32.mrf.mxu0 }
 0x30e   : > { %v4409_v27 = vsub.f32 %v10807_v48, %v12155_v15  ;;  %v10879_v15 = vpop.f32.mrf.mxu1  ;;  %12840 = vst [vmem:[#allocation60_spill] sm:$0xff] %v10883_v62 }
 0x30f   : > { %6481 = vmatpush3.xpose.msra.mxu1 %v4277_v23  ;;  %v4291_v23 = vand.u32 4294901760, %v4290_v10  ;;  %v12831_v10 = vld [vmem:[#allocation56_spill] sm:$0xff]  ;;  %12839 = vst [vmem:[#allocation48_spill] sm:$0xff] %v10879_v15  ;;  %v10891_v11 = vpop.f32.mrf.mxu0 }
 0x310   : > { %6482 = vmatprep.subr.mxu1 %v4396_v0  ;;  %6493 = vmatpush3.xpose.msra.mxu0 %v10407_v6  ;;  %v4410_v0 = vand.u32 4294901760, %v4409_v27  ;;  %v12833_v27 = vld [vmem:[#allocation62_spill] sm:$0xff]  ;;  %v10887_v18 = vpop.f32.mrf.mxu1 }
 0x311   : > { %6494 = vmatprep.subr.mxu0 %v10454_v2  ;;  %12841 = vst [vmem:[#allocation79_spill] sm:$0xff] %v10887_v18  ;;  %v10899_v62 = vpop.f32.mrf.mxu0 }
 0x312   : > { %v10895_v15 = vpop.f32.mrf.mxu1 }
 0x313   : > { %6483 = vmatpush3.xpose.msra.mxu1 %v4284_v38  ;;  %v12830_v38 = vld [vmem:[#allocation53_spill] sm:$0xff] }
 0x314   : > { %6484 = vmatprep.subr.mxu1 %v4403_v1  ;;  %6495 = vmatpush3.xpose.msra.mxu0 %v10418_v40  ;;  %v12832_v1 = vld [vmem:[#allocation58_spill] sm:$0xff]  ;;  %v10903_v18 = vpop.f32.mrf.mxu1 }
 0x315   : > { %6496 = vmatprep.subr.mxu0 %v10485_v60 }
 0x317   : > { %6485 = vmatpush3.xpose.msra.mxu1 %v4291_v23  ;;  %v12834_v23 = vld [vmem:[#allocation66_spill] sm:$0xff] }
 0x318   : > { %6486 = vmatprep.subr.mxu1 %v4410_v0  ;;  %6497 = vmatpush3.xpose.msra.mxu0 %v10474_v44  ;;  %v12836_v0 = vld [vmem:[#allocation71_spill] sm:$0xff] }
 0x319   : > { %6498 = vmatprep.subr.mxu0 %v10513_v36 }
 0x31b   : > { %6487 = vmatpush3.xpose.msra.mxu1 %v4298_v14  ;;  %v12837_v14 = vld [vmem:[#allocation31_spill] sm:$0xff] }
 0x31c   : > { %6524 = vmatprep.subr.mxu1 %v10227_v4  ;;  %6499 = vmatpush3.xpose.msra.mxu0 %v10496_v29 }
 0x31d   : > { %6500 = vmatprep.subr.mxu0 %v10563_v16 }
 0x31e   : > { %6489 = vmatmul.mubr.f32.vlgmr.msra.gmra.mxu1 %v10770_v13 }
 0x31f   : > { %6525 = vmatpush3.xpose.msra.mxu1 %v12830_v38  ;;  %6556 = vmatprep.mubr.f32.mxu1 %v10793_v53 }
 0x320   : > { %6526 = vmatprep.subr.mxu1 %v10262_v28  ;;  %6501 = vmatpush3.xpose.msra.mxu0 %v10548_v61 }
 0x321   : > { %6502 = vmatprep.subr.mxu0 %v10608_v24 }
 0x323   : > { %6527 = vmatpush3.xpose.msra.mxu1 %v12831_v10 }
 0x324   : > { %6528 = vmatprep.subr.mxu1 %v12832_v1  ;;  %6503 = vmatpush3.xpose.msra.mxu0 %v10647_v33 }
 0x325   : > { %6504 = vmatprep.subr.mxu0 %v10681_v5 }
 0x327   : > { %6529 = vmatpush3.xpose.msra.mxu1 %v12833_v27 }
 0x328   : > { %6530 = vmatprep.subr.mxu1 %v10300_v9  ;;  %6505 = vmatpush3.xpose.msra.mxu0 %v10677_v31 }
 0x329   : > { %6506 = vmatprep.subr.mxu0 %v10696_v59 }
 0x32b   : > { %6531 = vmatpush3.xpose.msra.mxu1 %v10322_v32 }
 0x32c   : > { %6532 = vmatprep.subr.mxu1 %v10327_v43  ;;  %6507 = vmatpush3.xpose.msra.mxu0 %v10689_v63 }
 0x32d   : > { %6508 = vmatprep.subr.mxu0 %v10708_v41 }
 0x32f   : > { %6533 = vmatpush3.xpose.msra.mxu1 %v12834_v23 }
 0x330   : > { %6534 = vmatprep.subr.mxu1 %v12835_v58  ;;  %6509 = vmatpush3.xpose.msra.mxu0 %v10701_v46 }
 0x331   : > { %6510 = vmatprep.subr.mxu0 %v10715_v3 }
 0x333   : > { %6535 = vmatpush3.xpose.msra.mxu1 %v12836_v0 }
 0x334   : > { %6536 = vmatprep.subr.mxu1 %v12837_v14  ;;  %6511 = vmatpush3.xpose.msra.mxu0 %v10720_v30 }
 0x335   : > { %6512 = vmatprep.subr.mxu0 %v10728_v8 }
 0x337   : > { %6537 = vmatpush3.xpose.msra.mxu1 %v10411_v12 }
 0x338   : > { %6538 = vmatprep.subr.mxu1 %v10424_v52  ;;  %6513 = vmatpush3.xpose.msra.mxu0 %v10741_v56 }
 0x339   : > { %6514 = vmatprep.subr.mxu0 %v10748_v26  ;;  %v12843_v26 = vld [vmem:[#allocation44_spill] sm:$0xff] }
 0x33b   : > { %6539 = vmatpush3.xpose.msra.mxu1 %v10449_v42 }
 0x33c   : > { %6540 = vmatprep.subr.mxu1 %v10460_v35  ;;  %6515 = vmatpush3.xpose.msra.mxu0 %v10756_v17 }
 0x33d   : > { %6516 = vmatprep.subr.mxu0 %v10764_v55  ;;  %v12844_v55 = vld [vmem:[#allocation28_spill] sm:$0xff] }
 0x33f   : > { %6541 = vmatpush3.xpose.msra.mxu1 %v10438_v45  ;;  %v10907_v45 = vpop.f32.mrf.mxu0 }
 0x340   : > { %6542 = vmatprep.subr.mxu1 %v10502_v51  ;;  %6517 = vmatpush3.xpose.msra.mxu0 %v10775_v25  ;;  %v10911_v51 = vpop.f32.mrf.mxu1  ;;  %v12845_v25 = vld [vmem:[#allocation42_spill] sm:$0xff] }
 0x341   : > { %6518 = vmatprep.subr.mxu0 %v10786_v47  ;;  %v12846_v47 = vld [vmem:[#allocation75_spill] sm:$0xff] }
 0x343   : > { %6543 = vmatpush3.xpose.msra.mxu1 %v12842_v57  ;;  %v10915_v57 = vpop.f32.mrf.mxu0 }
 0x344   : > { %6544 = vmatprep.subr.mxu1 %v12843_v26  ;;  %6519 = vmatpush3.xpose.msra.mxu0 %v10797_v21  ;;  %v10919_v26 = vpop.f32.mrf.mxu1 }
 0x345   : > { %6520 = vmatprep.subr.mxu0 %v10807_v48  ;;  %v10924_v21 = vpop.f32.mrf.mxu0  ;;  %v12848_v48 = vand.u32 4294901760, %v10370_v34  ;;  %v12852_v34 = vld [vmem:[#allocation91_spill] sm:$0xff] }
 0x347   : > { %6545 = vmatpush3.xpose.msra.mxu1 %v10556_v39  ;;  %v12847_v39 = vand.u32 4294901760, %v12846_v47  ;;  %v10936_v47 = vpop.f32.mrf.mxu0 }
 0x348   : > { %6546 = vmatprep.subr.mxu1 %v12844_v55  ;;  %6521 = vmatpush3.xpose.msra.mxu0 %v10818_v7  ;;  %v10930_v55 = vpop.f32.mrf.mxu1  ;;  %v12850_v7 = vand.u32 4294901760, %v10433_v20  ;;  %v12855_v20 = vand.u32 4294901760, %v10418_v40  ;;  %v12858_v40 = vand.u32 4294901760, %v10513_v36 }
 0x349   : > { %6558 = vmatprep.subr.mxu0 %v12847_v39  ;;  %v12851_v39 = vand.u32 4294901760, %v10407_v6 }
 0x34b   : > { %6547 = vmatpush3.xpose.msra.mxu1 %v12845_v25  ;;  %6523 = vmatmul.mubr.f32.vlgmr.msra.gmra.mxu0 %v10781_v19  ;;  %v12849_v25 = vld [vmem:[#allocation37_spill] sm:$0xff]  ;;  %v10941_v19 = vpop.f32.mrf.mxu1 }
 0x34c   : > { %6548 = vmatprep.subr.mxu1 %v10599_v54  ;;  %6559 = vmatpush3.xpose.msra.mxu0 %v12848_v48  ;;  %v12853_v48 = vand.u32 4294901760, %v10454_v2 }
 0x34d   : > { %6560 = vmatprep.subr.mxu0 %v12850_v7  ;;  %6590 = vmatprep.mubr.f32.mxu0 %v10770_v13  ;;  %v7594_v7 = vpop.f32.mrf.mxu1 }
 0x34f   : > { %6549 = vmatpush3.xpose.msra.mxu1 %v10619_v50  ;;  %v12854_v50 = vld [vmem:[#allocation93_spill] sm:$0xff]  ;;  %v10957_v2 = vpop.f32.mrf.mxu1 }
 0x350   : > { %6550 = vmatprep.subr.mxu1 %v12849_v25  ;;  %6561 = vmatpush3.xpose.msra.mxu0 %v12851_v39  ;;  %v7466_v25 = vpop.f32.mrf.mxu0  ;;  %v12857_v39 = vand.u32 4294901760, %v10474_v44  ;;  %v12860_v44 = vand.u32 4294901760, %v10563_v16  ;;  %v12866_v16 = vld [vmem:[#allocation109_spill] sm:$0xff] }
 0x351   : > { %6562 = vmatprep.subr.mxu0 %v12853_v48 }
 0x352   : > { %v10952_v6 = vpop.f32.mrf.mxu0 }
 0x353   : > { %6551 = vmatpush3.xpose.msra.mxu1 %v10641_v37  ;;  %v12856_v37 = vand.u32 4294901760, %v10485_v60  ;;  %v12859_v60 = vand.u32 4294901760, %v10496_v29  ;;  %v12864_v29 = vand.u32 4294901760, %v10548_v61  ;;  %v12872_v61 = vld [vmem:[#allocation19_spill] sm:$0xff] }
 0x354   : > { %6552 = vmatprep.subr.mxu1 %v12852_v34  ;;  %6563 = vmatpush3.xpose.msra.mxu0 %v12855_v20  ;;  %v7469_v48 = vpop.f32.mrf.mxu0  ;;  %v12861_v20 = vld [vmem:[#allocation43_spill] sm:$0xff] }
 0x355   : > { %6564 = vmatprep.subr.mxu0 %v12856_v37  ;;  %v7597_v37 = vpop.f32.mrf.mxu1  ;;  %v12874_v34 = vld [vmem:[#allocation99_spill] sm:$0xff] }
 0x357   : > { %6553 = vmatpush3.xpose.msra.mxu1 %v12854_v50 }
 0x358   : > { %6554 = vmatprep.subr.mxu1 %v10668_v49  ;;  %6565 = vmatpush3.xpose.msra.mxu0 %v12857_v39  ;;  %v3223_v39 = vadd.f32 %v7469_v48, %v12861_v20  ;;  %v3681_v48 = vpop.f32.mrf.mxu1  ;;  %v12868_v20 = vand.u32 4294901760, %v10608_v24  ;;  %v12875_v24 = vand.u32 4294901760, %v10647_v33 }
 0x359   : > { %6566 = vmatprep.subr.mxu0 %v12858_v40  ;;  %v3216_v40 = vpop.f32.mrf.mxu0 }
 0x35a   : > { %v10973_v49 = vadd.f32 %v7597_v37, %v3223_v39  ;;  %v12870_v37 = vld [vmem:[#allocation45_spill] sm:$0xff] }
 0x35b   : > { %6555 = vmatpush3.xpose.msra.mxu1 %v10673_v22  ;;  %v12863_v22 = vld [vmem:[#allocation102_spill] sm:$0xff]  ;;  %v3217_v39 = vadd.f32 %v3216_v40, %v12870_v37  ;;  %v12878_v37 = vld [vmem:[#allocation92_spill] sm:$0xff] }
 0x35c   : > { %6592 = vmatprep.subr.mxu1 %v10227_v4  ;;  %6567 = vmatpush3.xpose.msra.mxu0 %v12859_v60  ;;  %v12862_v4 = vld [vmem:[#allocation97_spill] sm:$0xff]  ;;  %v12867_v60 = vld [vmem:[#allocation96_spill] sm:$0xff] }
 0x35d   : > { %6568 = vmatprep.subr.mxu0 %v12860_v44  ;;  %v3726_v36 = vmul.f32 0.70710677, %v12862_v4  ;;  %v3127_v44 = vadd.f32 %v12867_v60, %v12866_v16  ;;  %v12869_v4 = vld [vmem:[#allocation27_spill] sm:$0xff]  ;;  %v3756_v60 = vmul.f32 0.70710677, %v10973_v49 }
 0x35e   : > { %6557 = vmatmul.mubr.f32.vlgmr.msra.gmra.mxu1 %v10793_v53  ;;  %v3728_v53 = vmul.f32 0.70710677, %v12863_v22  ;;  %v3730_v22 = vmul.f32 0.70710677, %v12869_v4 }
 0x35f   : > { %6593 = vmatpush3.xpose.msra.mxu1 %v12830_v38  ;;  %6624 = vmatprep.mubr.f32.mxu1 %v10770_v13  ;;  %7728 = verf.f32 %v3726_v36  ;;  %v12876_v36 = vld [vmem:[#allocation106_spill] sm:$0xff] }
 0x360   : > { %6594 = vmatprep.subr.mxu1 %v10262_v28  ;;  %6569 = vmatpush3.xpose.msra.mxu0 %v12864_v29  ;;  %v12865_v28 = vld [vmem:[#allocation103_spill] sm:$0xff]  ;;  %v10988_v29 = vadd.f32 %v12872_v61, %v3127_v44  ;;  %7730 = verf.f32 %v3728_v53  ;;  %v3729_v40 = vmul.f32 0.70710677, %v12876_v36  ;;  %v12879_v53 = vand.u32 4294901760, %v10681_v5 }
 0x361   : > { %v3727_v38 = vmul.f32 0.70710677, %v12865_v28  ;;  %6570 = vmatprep.subr.mxu0 %v12868_v20  ;;  %v12873_v28 = vld [vmem:[#allocation110_spill] sm:$0xff]  ;;  %v12877_v20 = vld [vmem:[#allocation105_spill] sm:$0xff]  ;;  %v12886_v5 = vand.u32 4294901760, %v10677_v31 }
 0x362   : > { %v3121_v16 = vadd.f32 %v12874_v34, %v12873_v28  ;;  %v3115_v44 = vadd.f32 %v12878_v37, %v12877_v20  ;;  %v12880_v34 = vld [vmem:[#allocation111_spill] sm:$0xff]  ;;  %v12884_v20 = vld [vmem:[#allocation38_spill] sm:$0xff] }
 0x363   : > { %6595 = vmatpush3.xpose.msra.mxu1 %v12831_v10  ;;  %v12871_v10 = vld [vmem:[#allocation108_spill] sm:$0xff]  ;;  %7732 = verf.f32 %v3727_v38  ;;  %v3734_v28 = vmul.f32 0.70710677, %v12880_v34  ;;  %v12883_v38 = vld [vmem:[#allocation17_spill] sm:$0xff]  ;;  %v12885_v37 = vld [vmem:[#allocation87_spill] sm:$0xff] }
 0x364   : > { %6596 = vmatprep.subr.mxu1 %v12832_v1  ;;  %v3732_v50 = vmul.f32 0.70710677, %v12871_v10  ;;  %v10993_v1 = vadd.f32 %v3681_v48, %v3217_v39  ;;  %6571 = vmatpush3.xpose.msra.mxu0 %v12875_v24  ;;  %7734 = verf.f32 %v3730_v22  ;;  %v12881_v48 = vld [vmem:[#allocation21_spill] sm:$0xff]  ;;  %v11010_v61 = vadd.f32 %v12883_v38, %v3115_v44  ;;  %v12889_v44 = vld [vmem:[#allocation94_spill] sm:$0xff] }
 0x365   : > { %6572 = vmatprep.subr.mxu0 %v12879_v53  ;;  %v11006_v39 = vadd.f32 %v12881_v48, %v3121_v16  ;;  %v3740_v24 = vmul.f32 0.70710677, %v10988_v29  ;;  %v12888_v16 = vld [vmem:[#allocation107_spill] sm:$0xff]  ;;  %v12890_v48 = vand.u32 4294901760, %v10696_v59 }
 0x366   : > { %7736 = verf.f32 %v3732_v50  ;;  %v3755_v22 = vmul.f32 0.70710677, %v10993_v1  ;;  %v12887_v50 = vld [vmem:[#allocation12_spill] sm:$0xff]  ;;  %v3109_v53 = vadd.f32 %v12889_v44, %v12888_v16  ;;  %v12898_v16 = vld [vmem:[#allocation14_spill] sm:$0xff] }
 0x367   : > { %6597 = vmatpush3.xpose.msra.mxu1 %v12833_v27  ;;  %v12882_v27 = vld [vmem:[#allocation39_spill] sm:$0xff]  ;;  %7738 = verf.f32 %v3756_v60 }
 0x368   : > { %6598 = vmatprep.subr.mxu1 %v10300_v9  ;;  %v3211_v33 = vadd.f32 %v7466_v25, %v12882_v27  ;;  %v3103_v9 = vadd.f32 %v12885_v37, %v12884_v20  ;;  %6573 = vmatpush3.xpose.msra.mxu0 %v12886_v5  ;;  %7740 = verf.f32 %v3729_v40  ;;  %v3731_v25 = vmul.f32 0.70710677, %v12887_v50  ;;  %v12892_v27 = vld [vmem:[#allocation40_spill] sm:$0xff]  ;;  %v12894_v20 = vld [vmem:[#allocation30_spill] sm:$0xff] }
 0x369   : > { %6574 = vmatprep.subr.mxu0 %v12890_v48  ;;  %7742 = verf.f32 %v3734_v28  ;;  %v3205_v31 = vadd.f32 %v10952_v6, %v12892_v27  ;;  %v3738_v40 = vmul.f32 0.70710677, %v11010_v61  ;;  %v12895_v37 = vand.u32 4294901760, %v10689_v63  ;;  %v12896_v6 = vld [vmem:[#allocation104_spill] sm:$0xff] }
 0x36a   : > { %v11015_v36 = vadd.f32 %v7594_v7, %v3211_v33  ;;  %v12891_v7 = vld [vmem:[#allocation15_spill] sm:$0xff]  ;;  %v12893_v33 = vld [vmem:[#allocation18_spill] sm:$0xff]  ;;  %7744 = verf.f32 %v3740_v24  ;;  %v3733_v24 = vmul.f32 0.70710677, %v12898_v16 }
 0x36b   : > { %6599 = vmatpush3.xpose.msra.mxu1 %v10322_v32  ;;  %v11028_v60 = vadd.f32 %v12891_v7, %v3103_v9  ;;  %v3739_v32 = vmul.f32 0.70710677, %v11006_v39  ;;  %v11035_v38 = vadd.f32 %v12893_v33, %v3109_v53  ;;  %v11041_v28 = vadd.f32 %v10957_v2, %v3205_v31  ;;  %v12897_v9 = vld [vmem:[#allocation90_spill] sm:$0xff]  ;;  %v12901_v53 = vld [vmem:[#allocation33_spill] sm:$0xff] }
 0x36c   : > { %6600 = vmatprep.subr.mxu1 %v10327_v43  ;;  %v3199_v43 = vadd.f32 %v10924_v21, %v12894_v20  ;;  %v3754_v59 = vmul.f32 0.70710677, %v11015_v36  ;;  %7746 = verf.f32 %v3755_v22  ;;  %6575 = vmatpush3.xpose.msra.mxu0 %v12895_v37  ;;  %v3097_v5 = vadd.f32 %v12897_v9, %v12896_v6  ;;  %v12906_v20 = vld [vmem:[#allocation100_spill] sm:$0xff] }
 0x36d   : > { %7748 = verf.f32 %v3731_v25  ;;  %v12899_v21 = vand.u32 4294901760, %v10708_v41  ;;  %v3736_v2 = vmul.f32 0.70710677, %v11028_v60  ;;  %v3737_v44 = vmul.f32 0.70710677, %v11035_v38  ;;  %v7729_v25 = vpop.eup %7728 }
 0x36e   : > { %7750 = verf.f32 %v3739_v32  ;;  %v11054_v22 = vadd.f32 %v10930_v55, %v3199_v43  ;;  %v3193_v48 = vadd.f32 %v10936_v47, %v12901_v53  ;;  %v3753_v41 = vmul.f32 0.70710677, %v11041_v28  ;;  %v7731_v55 = vpop.eup %7730 }
 0x36f   : > { %6601 = vmatpush3.xpose.msra.mxu1 %v12834_v23  ;;  %6576 = vmatprep.subr.mxu0 %v12899_v21  ;;  %v12900_v23 = vld [vmem:[#allocation16_spill] sm:$0xff]  ;;  %7752 = verf.f32 %v3738_v40  ;;  %v12903_v7 = vand.u32 4294901760, %v10715_v3  ;;  %v12905_v3 = vand.u32 4294901760, %v10720_v30  ;;  %v3725_v43 = vmul.f32 0.70710677, %v12906_v20 }
 0x370   : > { %6602 = vmatprep.subr.mxu1 %v12835_v58  ;;  %v11057_v63 = vadd.f32 %v12900_v23, %v3097_v5  ;;  %7754 = verf.f32 %v3754_v59  ;;  %v12902_v58 = vand.u32 4294901760, %v10701_v46  ;;  %v7733_v32 = vpop.eup %7732  ;;  %v3752_v27 = vmul.f32 0.70710677, %v11054_v22  ;;  %v12904_v46 = vld [vmem:[#allocation20_spill] sm:$0xff] }
 0x371   : > { %7756 = verf.f32 %v3733_v24  ;;  %v11071_v47 = vadd.f32 %v10941_v19, %v3193_v48  ;;  %v7735_v31 = vpop.eup %7734  ;;  %v3187_v40 = vadd.f32 %v10907_v45, %v12904_v46  ;;  %v12907_v59 = vand.u32 4294901760, %v10728_v8  ;;  %v12908_v24 = vld [vmem:[#allocation23_spill] sm:$0xff] }
 0x372   : > { %6577 = vmatpush3.xpose.msra.mxu0 %v12902_v58  ;;  %7758 = verf.f32 %v3736_v2  ;;  %v3854_v9 = vadd.f32 1.0, %v7729_v25  ;;  %v3856_v5 = vadd.f32 1.0, %v7731_v55  ;;  %v3181_v21 = vadd.f32 %v10915_v57, %v12908_v24 }
 0x373   : > { %6603 = vmatpush3.xpose.msra.mxu1 %v12836_v0  ;;  %6578 = vmatprep.subr.mxu0 %v12903_v7  ;;  %v3735_v0 = vmul.f32 0.70710677, %v11057_v63  ;;  %7760 = verf.f32 %v3737_v44  ;;  %v7737_v33 = vpop.eup %7736  ;;  %v11081_v19 = vadd.f32 %v10911_v51, %v3187_v40  ;;  %v3751_v45 = vmul.f32 0.70710677, %v11071_v47  ;;  %v12910_v44 = vld [vmem:[#allocation63_spill] sm:$0xff]  ;;  %v12912_v7 = vld [vmem:[#allocation118_spill] sm:$0xff] }
 0x374   : > { %6604 = vmatprep.subr.mxu1 %v12837_v14  ;;  %7762 = verf.f32 %v3753_v41  ;;  %v7739_v14 = vpop.eup %7738  ;;  %v3855_v2 = vadd.f32 1.0, %v7733_v32  ;;  %v12911_v53 = vand.u32 4294901760, %v12910_v44  ;;  %v3858_v48 = vadd.f32 1.0, %v7735_v31  ;;  %v12913_v40 = vld [vmem:[#allocation32_spill] sm:$0xff] }
 0x375   : > { %v7741_v37 = vpop.eup %7740  ;;  %7764 = verf.f32 %v3752_v27  ;;  %v3884_v51 = vadd.f32 1.0, %v7739_v14  ;;  %v3750_v23 = vmul.f32 0.70710677, %v11081_v19  ;;  %v11097_v57 = vadd.f32 %v10919_v26, %v3181_v21 }
 0x376   : > { %6579 = vmatpush3.xpose.msra.mxu0 %v12905_v3  ;;  %v7743_v6 = vpop.eup %7742  ;;  %7766 = verf.f32 %v3735_v0  ;;  %v3175_v32 = vadd.f32 %v10891_v11, %v12912_v7  ;;  %v11105_v0 = vmul.f32 0.5, %v3856_v5  ;;  %v12914_v26 = vand.u32 4294901760, %v10756_v17  ;;  %v12915_v11 = vld [vmem:[#allocation25_spill] sm:$0xff] }
 0x377   : > { %6605 = vmatpush3.xpose.msra.mxu1 %v10411_v12  ;;  %6580 = vmatprep.subr.mxu0 %v12907_v59  ;;  %v3860_v12 = vadd.f32 1.0, %v7737_v33  ;;  %v7745_v30 = vpop.eup %7744  ;;  %7768 = verf.f32 %v3725_v43  ;;  %v3862_v41 = vadd.f32 1.0, %v7743_v6  ;;  %v3948_v46 = vmul.f32 0.5, %v3884_v51  ;;  %v12916_v59 = vld [vmem:[#allocation82_spill] sm:$0xff]  ;;  %v12919_v51 = vld [vmem:[#allocation119_spill] sm:$0xff] }
 0x378   : > { %6606 = vmatprep.subr.mxu1 %v10424_v52  ;;  %v12909_v52 = vand.u32 4294901760, %v10741_v56  ;;  %7770 = verf.f32 %v3751_v45  ;;  %v3857_v56 = vadd.f32 1.0, %v7741_v37  ;;  %v3868_v55 = vadd.f32 1.0, %v7745_v30 }
 0x379   : > { %v7747_v8 = vpop.eup %7746  ;;  %v11099_v58 = vmul.f32 0.5, %v3860_v12  ;;  %v11110_v3 = vmul.f32 0.5, %v3855_v2  ;;  %v11113_v43 = vadd.f32 %v10895_v15, %v3175_v32  ;;  %7772 = verf.f32 %v3750_v23  ;;  %v12923_v32 = vld [vmem:[#allocation44_spill] sm:$0xff]  ;;  %v12955_v15 = vld [vmem:[#allocation95_spill] sm:$0xff] }
 0x37a   : > { %6581 = vmatpush3.xpose.msra.mxu0 %v12909_v52  ;;  %v7749_v25 = vpop.eup %7748  ;;  %v3883_v31 = vadd.f32 1.0, %v7747_v8  ;;  %v12917_v37 = vand.u32 4294901760, %v12916_v59  ;;  %v11118_v6 = vmul.f32 0.5, %v3858_v48  ;;  %v3926_v12 = vmul.f32 0.5, %v3862_v41  ;;  %v12921_v48 = vld [vmem:[#allocation84_spill] sm:$0xff] }
 0x37b   : > { %6607 = vmatpush3.xpose.msra.mxu1 %v10449_v42  ;;  %6582 = vmatprep.subr.mxu0 %v12911_v53  ;;  %v7751_v42 = vpop.eup %7750  ;;  %v3859_v14 = vadd.f32 1.0, %v7749_v25  ;;  %v3749_v17 = vmul.f32 0.70710677, %v11097_v57  ;;  %v11121_v5 = vmul.f32 0.5, %v3857_v56  ;;  %v3932_v21 = vmul.f32 0.5, %v3868_v55  ;;  %v12920_v25 = vld [vmem:[#allocation83_spill] sm:$0xff] }
 0x37c   : > { %6608 = vmatprep.subr.mxu1 %v10460_v35  ;;  %v7753_v27 = vpop.eup %7752  ;;  %v11103_v35 = vmul.f32 0.5, %v3854_v9  ;;  %v3867_v30 = vadd.f32 1.0, %v7751_v42  ;;  %v3169_v52 = vadd.f32 %v10899_v62, %v12919_v51  ;;  %v4014_v44 = vsel %vm10174_vm0, %v3948_v46, 1.0  ;;  %v12926_v59 = vld [vmem:[#allocation116_spill] sm:$0xff] }
 0x37d   : > { %v7755_v33 = vpop.eup %7754  ;;  %v3866_v2 = vadd.f32 1.0, %v7753_v27  ;;  %v3947_v53 = vmul.f32 0.5, %v3883_v31  ;;  %v12922_v41 = vand.u32 4294901760, %v12921_v48  ;;  %v11133_v56 = vmul.f32 0.5, %v3859_v14  ;;  %v12924_v27 = vld [vmem:[#allocation85_spill] sm:$0xff] }
 0x37e   : > { %6583 = vmatpush3.xpose.msra.mxu0 %v12914_v26  ;;  %v7757_v45 = vpop.eup %7756  ;;  %v3882_v23 = vadd.f32 1.0, %v7755_v33  ;;  %v3748_v55 = vmul.f32 0.70710677, %v11113_v43  ;;  %v11137_v62 = vadd.f32 %v10903_v18, %v3169_v52  ;;  %v3992_v46 = vsel %vm10174_vm0, %v3926_v12, 1.0 }
 0x37f   : > { %6609 = vmatpush3.xpose.msra.mxu1 %v12913_v40  ;;  %6584 = vmatprep.subr.mxu0 %v12917_v37  ;;  %v7759_v9 = vpop.eup %7758  ;;  %v3861_v7 = vadd.f32 1.0, %v7757_v45  ;;  %v12925_v40 = vand.u32 4294901760, %v12924_v27  ;;  %v3931_v26 = vmul.f32 0.5, %v3867_v30  ;;  %7774 = verf.f32 %v3749_v17  ;;  %v12927_v37 = vld [vmem:[#allocation54_spill] sm:$0xff] }
 0x380   : > { %6610 = vmatprep.subr.mxu1 %v12915_v11  ;;  %v7761_v8 = vpop.eup %7760  ;;  %v3864_v31 = vadd.f32 1.0, %v7759_v9  ;;  %v3998_v11 = vsel %vm10174_vm0, %v3932_v21, 1.0  ;;  %v3163_v18 = vadd.f32 %v12927_v37, %v12926_v59  ;;  %v4078_v45 = vmul.f32 %v4014_v44, %v10973_v49  ;;  %v12928_v9 = vld [vmem:[#allocation26_spill] sm:$0xff]  ;;  %v12931_v21 = vld [vmem:[#allocation48_spill] sm:$0xff]  ;;  %v12935_v59 = vld [vmem:[#allocation117_spill] sm:$0xff] }
 0x381   : > { %v7763_v42 = vpop.eup %7762  ;;  %v3865_v14 = vadd.f32 1.0, %v7761_v8  ;;  %v3930_v52 = vmul.f32 0.5, %v3866_v2  ;;  %v4013_v12 = vsel %vm10174_vm0, %v3947_v53, 1.0  ;;  %v12929_v30 = vld [vmem:[#allocation98_spill] sm:$0xff]  ;;  %v11155_v8 = vmul.f32 %v3992_v46, %v12880_v34  ;;  %v12932_v2 = vld [vmem:[#allocation28_spill] sm:$0xff] }
 0x382   : > { %6585 = vmatpush3.xpose.msra.mxu0 %v12922_v41  ;;  %v7765_v33 = vpop.eup %7764  ;;  %v3881_v48 = vadd.f32 1.0, %v7763_v42  ;;  %v12930_v17 = vand.u32 4294901760, %v12929_v30  ;;  %v11158_v41 = vadd.f32 %v12931_v21, %v3163_v18  ;;  %7776 = verf.f32 %v3748_v55  ;;  %v12936_v55 = vld [vmem:[#allocation60_spill] sm:$0xff] }
 0x383   : > { %6611 = vmatpush3.xpose.msra.mxu1 %v12920_v25  ;;  %6586 = vmatprep.subr.mxu0 %v12925_v40  ;;  %v7767_v51 = vpop.eup %7766  ;;  %v3946_v25 = vmul.f32 0.5, %v3882_v23  ;;  %v3747_v49 = vmul.f32 0.70710677, %v11137_v62  ;;  %v12933_v23 = vld [vmem:[#allocation67_spill] sm:$0xff]  ;;  %v3928_v42 = vmul.f32 0.5, %v3864_v31  ;;  %v3997_v34 = vsel %vm10174_vm0, %v3931_v26, 1.0 }
 0x384   : > { %6612 = vmatprep.subr.mxu1 %v12923_v32  ;;  %v12934_v44 = vand.u32 4294901760, %v12933_v23  ;;  %v11164_v53 = vpop.eup %7768  ;;  %v4062_v32 = vmul.f32 %v3998_v11, %v10988_v29  ;;  %v3880_v27 = vadd.f32 1.0, %v7765_v33  ;;  %v3863_v46 = vadd.f32 1.0, %v7767_v51  ;;  %v12937_v11 = vld [vmem:[#allocation42_spill] sm:$0xff]  ;;  %v12938_v26 = vld [vmem:[#allocation101_spill] sm:$0xff] }
 0x385   : > { %v7771_v40 = vpop.eup %7770  ;;  %v3157_v37 = vadd.f32 %v12936_v55, %v12935_v59  ;;  %v11171_v18 = vand.u32 4294901760, %v4078_v45  ;;  %v3996_v30 = vsel %vm10174_vm0, %v3930_v52, 1.0  ;;  %v4012_v29 = vsel %vm10174_vm0, %v3946_v25, 1.0 }
 0x386   : > { %6587 = vmatpush3.xpose.msra.mxu0 %v12930_v17  ;;  %v3929_v17 = vmul.f32 0.5, %v3865_v14  ;;  %v3945_v31 = vmul.f32 0.5, %v3881_v48  ;;  %v12939_v33 = vand.u32 4294901760, %v12938_v26  ;;  %v4061_v51 = vmul.f32 %v3997_v34, %v11006_v39 }
 0x387   : > { %6613 = vmatpush3.xpose.msra.mxu1 %v12928_v9  ;;  %6588 = vmatprep.subr.mxu0 %v12934_v44  ;;  %v4077_v9 = vmul.f32 %v4013_v12, %v10993_v1  ;;  %v3746_v21 = vmul.f32 0.70710677, %v11158_v41  ;;  %7778 = verf.f32 %v3747_v49  ;;  %v7773_v1 = vpop.eup %7772  ;;  %v11188_v14 = vmul.f32 0.5, %v3861_v7 }
 0x388   : > { %6614 = vmatprep.subr.mxu1 %v12932_v2  ;;  %v12940_v2 = vld [vmem:[#allocation79_spill] sm:$0xff]  ;;  %v11190_v52 = vand.u32 4294901760, %v4062_v32  ;;  %v3944_v25 = vmul.f32 0.5, %v3880_v27  ;;  %v3879_v48 = vadd.f32 1.0, %v7771_v40  ;;  %v3994_v39 = vsel %vm10174_vm0, %v3928_v42, 1.0 }
 0x389   : > { %v11184_v23 = vadd.f32 %v12940_v2, %v3157_v37  ;;  %v4076_v12 = vmul.f32 %v4012_v29, %v11015_v36  ;;  %v11196_v44 = vsub.f32 %v4078_v45, %v11171_v18  ;;  %v11198_v49 = vand.u32 4294901760, %v4077_v9  ;;  %v12941_v42 = vld [vmem:[#allocation35_spill] sm:$0xff] }
 0x38a   : > { %6589 = vmatpush3.xpose.msra.mxu0 %v12939_v33  ;;  %v4060_v7 = vmul.f32 %v3996_v30, %v11010_v61  ;;  %v3995_v34 = vsel %vm10174_vm0, %v3929_v17, 1.0  ;;  %v4011_v27 = vsel %vm10174_vm0, %v3945_v31, 1.0  ;;  %v11210_v36 = vand.u32 4294901760, %v4061_v51  ;;  %v12944_v30 = vld [vmem:[#allocation34_spill] sm:$0xff] }
 0x38b   : > { %6615 = vmatpush3.xpose.msra.mxu1 %v12937_v11  ;;  %6626 = vmatprep.subr.mxu0 %v11171_v18  ;;  %7780 = verf.f32 %v3746_v21  ;;  %v3745_v45 = vmul.f32 0.70710677, %v11184_v23  ;;  %v3878_v40 = vadd.f32 1.0, %v7773_v1  ;;  %v11219_v59 = vsub.f32 %v4062_v32, %v11190_v52  ;;  %v12947_v1 = vld [vmem:[#allocation13_spill] sm:$0xff] }
 0x38c   : > { %6616 = vmatprep.subr.mxu1 %v10599_v54  ;;  %v11201_v54 = vmul.f32 0.5, %v3863_v46  ;;  %12942 = vst [vmem:[#allocation89_spill] sm:$0xff] %v11210_v36  ;;  %v12943_v46 = vld [vmem:[#allocation37_spill] sm:$0xff]  ;;  %v4010_v55 = vsel %vm10174_vm0, %v3944_v25, 1.0  ;;  %v3943_v37 = vmul.f32 0.5, %v3879_v48  ;;  %v7775_v17 = vpop.eup %7774  ;;  %v11224_v29 = vand.u32 4294901760, %v4076_v12 }
 0x38d   : > { %6591 = vmatmul.mubr.f32.vlgmr.msra.gmra.mxu0 %v10770_v13  ;;  %v4075_v31 = vmul.f32 %v4011_v27, %v11041_v28  ;;  %v11228_v11 = vsub.f32 %v4077_v9, %v11198_v49  ;;  %v12178_v26 = vand.u32 4294901760, %v11196_v44  ;;  %v11232_v33 = vmul.f32 %v3994_v39, %v11028_v60  ;;  %v12948_v9 = vld [vmem:[#allocation41_spill] sm:$0xff]  ;;  %v12949_v48 = vld [vmem:[#allocation91_spill] sm:$0xff] }
 0x38e   : > { %6627 = vmatpush3.xpose.msra.mxu0 %v11190_v52  ;;  %6658 = vmatprep.mubr.f32.mxu0 %v12944_v30  ;;  %12945 = vst [vmem:[#allocation55_spill] sm:$0xff] %v11224_v29  ;;  %v3993_v32 = vsel %vm10174_vm0, %v11201_v54, 1.0  ;;  %v11237_v21 = vand.u32 4294901760, %v4060_v7  ;;  %v4059_v2 = vmul.f32 %v3995_v34, %v11035_v38  ;;  %v11243_v28 = vsub.f32 %v4061_v51, %v11210_v36 }
 0x38f   : > { %6617 = vmatpush3.xpose.msra.mxu1 %v12941_v42  ;;  %6628 = vmatprep.subr.mxu0 %v11198_v49  ;;  %v3744_v25 = vmul.f32 0.70710677, %v12948_v9  ;;  %7782 = verf.f32 %v3745_v45  ;;  %v3942_v60 = vmul.f32 0.5, %v3878_v40  ;;  %v7777_v39 = vpop.eup %7776  ;;  %v3877_v27 = vadd.f32 1.0, %v7775_v17 }
 0x390   : > { %6618 = vmatprep.subr.mxu1 %v12943_v46  ;;  %12946 = vst [vmem:[#allocation69_spill] sm:$0xff] %v11237_v21  ;;  %v4074_v38 = vmul.f32 %v4010_v55, %v11054_v22  ;;  %v4009_v34 = vsel %vm10174_vm0, %v3943_v37, 1.0  ;;  %v11253_v51 = vsub.f32 %v4076_v12, %v11224_v29  ;;  %v11255_v42 = vand.u32 4294901760, %v4075_v31  ;;  %v12953_v55 = vld [vmem:[#allocation81_spill] sm:$0xff] }
 0x391   : > { %v5159_v45 = vsub.f32 %v11196_v44, %v12178_v26  ;;  %v11262_v46 = vand.u32 4294901760, %v11232_v33  ;;  %v11265_v17 = vsub.f32 %v4060_v7, %v11237_v21  ;;  %v11267_v22 = vand.u32 4294901760, %v4059_v2  ;;  %v12954_v12 = vld [vmem:[#allocation93_spill] sm:$0xff] }
 0x392   : > { %6629 = vmatpush3.xpose.msra.mxu0 %v11210_v36  ;;  %12950 = vst [vmem:[#allocation61_spill] sm:$0xff] %v11255_v42  ;;  %v3743_v37 = vmul.f32 0.70710677, %v12953_v55  ;;  %7784 = verf.f32 %v3744_v25  ;;  %v4008_v26 = vsel %vm10174_vm0, %v3942_v60, 1.0  ;;  %v3941_v61 = vmul.f32 0.5, %v3877_v27 }
 0x393   : > { %6619 = vmatpush3.xpose.msra.mxu1 %v12947_v1  ;;  %6630 = vmatprep.subr.mxu0 %v11224_v29  ;;  %12951 = vst [vmem:[#allocation88_spill] sm:$0xff] %v11262_v46  ;;  %12952 = vst [vmem:[#allocation52_spill] sm:$0xff] %v11267_v22  ;;  %v11277_v40 = vand.u32 4294901760, %v4074_v38  ;;  %v4073_v54 = vmul.f32 %v4009_v34, %v11071_v47  ;;  %v11284_v25 = vsub.f32 %v4075_v31, %v11255_v42  ;;  %v12959_v34 = vld [vmem:[#allocation76_spill] sm:$0xff] }
 0x394   : > { %6620 = vmatprep.subr.mxu1 %v12949_v48  ;;  %v3876_v48 = vadd.f32 1.0, %v7777_v39  ;;  %v7779_v7 = vpop.eup %7778  ;;  %v5160_v39 = vand.u32 4294901760, %v5159_v45  ;;  %v12958_v60 = vand.u32 4294901760, %v11228_v11  ;;  %v4057_v27 = vmul.f32 %v3993_v32, %v11057_v63 }
 0x395   : > { %12956 = vst [vmem:[#allocation70_spill] sm:$0xff] %v11277_v40  ;;  %v11293_v47 = vsub.f32 %v4059_v2, %v11267_v22  ;;  %v3742_v36 = vmul.f32 0.70710677, %v12959_v34  ;;  %7786 = verf.f32 %v3743_v37  ;;  %v3875_v45 = vadd.f32 1.0, %v7779_v7 }
 0x396   : > { %6631 = vmatpush3.xpose.msra.mxu0 %v11237_v21  ;;  %v3940_v31 = vmul.f32 0.5, %v3876_v48  ;;  %v4007_v32 = vsel %vm10174_vm0, %v3941_v61, 1.0  ;;  %v11303_v2 = vsub.f32 %v4074_v38, %v11277_v40  ;;  %v11308_v37 = vand.u32 4294901760, %v4073_v54 }
 0x397   : > { %6621 = vmatpush3.xpose.msra.mxu1 %v12954_v12  ;;  %6632 = vmatprep.subr.mxu0 %v11255_v42  ;;  %v12957_v12 = vand.u32 4294901760, %v11219_v59  ;;  %v11317_v61 = vsub.f32 %v11232_v33, %v11262_v46  ;;  %7788 = verf.f32 %v3742_v36  ;;  %v12964_v36 = vand.u32 4294901760, %v11265_v17 }
 0x398   : > { %6622 = vmatprep.subr.mxu1 %v12955_v15  ;;  %v5166_v15 = vsub.f32 %v11228_v11, %v12958_v60  ;;  %v4072_v60 = vmul.f32 %v4008_v26, %v11081_v19  ;;  %v7781_v63 = vpop.eup %7780  ;;  %v12962_v26 = vand.u32 4294901760, %v11253_v51  ;;  %v11342_v42 = vand.u32 4294901760, %v11155_v8 }
 0x399   : > { %v5047_v21 = vsub.f32 %v11219_v59, %v12957_v12  ;;  %v12960_v12 = vld [vmem:[#allocation36_spill] sm:$0xff] }
 0x39a   : > { %6633 = vmatpush3.xpose.msra.mxu0 %v11267_v22  ;;  %v5167_v19 = vand.u32 4294901760, %v5166_v15  ;;  %v5173_v48 = vsub.f32 %v11253_v51, %v12962_v26  ;;  %v4006_v26 = vsel %vm10174_vm0, %v3940_v31, 1.0  ;;  %v11327_v7 = vand.u32 4294901760, %v4072_v60  ;;  %12966 = vst [vmem:[#allocation112_spill] sm:$0xff] %v11342_v42 }
 0x39b   : > { %6623 = vmatpush3.xpose.msra.mxu1 %v12960_v12  ;;  %6634 = vmatprep.subr.mxu0 %v11277_v40  ;;  %v5048_v29 = vand.u32 4294901760, %v5047_v21  ;;  %v12961_v12 = vand.u32 4294901760, %v11243_v28  ;;  %v11319_v21 = vand.u32 4294901760, %v4057_v27  ;;  %v3939_v40 = vmul.f32 0.5, %v3875_v45 }
 0x39c   : > { %6660 = vmatprep.subr.mxu1 %v5160_v39  ;;  %v12963_v39 = vld [vmem:[#allocation78_spill] sm:$0xff]  ;;  %v7783_v33 = vpop.eup %7782  ;;  %v4071_v22 = vmul.f32 %v4007_v32, %v11097_v57  ;;  %v5174_v31 = vand.u32 4294901760, %v5173_v48  ;;  %v12965_v45 = vand.u32 4294901760, %v11284_v25  ;;  %v12967_v57 = vsel %vm10174_vm0, %v11188_v14, 1.0 }
 0x39d   : > { %v5054_v1 = vsub.f32 %v11243_v28, %v12961_v12  ;;  %v3741_v15 = vmul.f32 0.70710677, %v12963_v39  ;;  %v3874_v12 = vadd.f32 1.0, %v7781_v63  ;;  %v11335_v63 = vsub.f32 %v4073_v54, %v11308_v37 }
 0x39e   : > { %6625 = vmatmul.mubr.f32.vlgmr.msra.gmra.mxu1 %v10770_v13  ;;  %6635 = vmatpush3.xpose.msra.mxu0 %v11262_v46  ;;  %v12195_v32 = vand.u32 4294901760, %v11317_v61  ;;  %v11351_v54 = vsub.f32 %v4057_v27, %v11319_v21  ;;  %v11359_v14 = vsub.f32 %v4072_v60, %v11327_v7 }
 0x39f   : > { %6661 = vmatpush3.xpose.msra.mxu1 %v5048_v29  ;;  %6636 = vmatprep.subr.mxu0 %v11308_v37  ;;  %v5055_v38 = vand.u32 4294901760, %v5054_v1  ;;  %v5061_v29 = vsub.f32 %v11265_v17, %v12964_v36  ;;  %v4055_v1 = vmul.f32 %v12967_v57, %v12898_v16  ;;  %7790 = verf.f32 %v3741_v15  ;;  %v7785_v46 = vpop.eup %7784 }
 0x3a0   : > { %6662 = vmatprep.subr.mxu1 %v5167_v19  ;;  %6692 = vmatprep.mubr.f32.mxu1 %v10770_v13  ;;  %v5180_v19 = vsub.f32 %v11284_v25, %v12965_v45  ;;  %v3938_v48 = vmul.f32 0.5, %v3874_v12  ;;  %v3873_v36 = vadd.f32 1.0, %v7783_v33  ;;  %v4070_v45 = vmul.f32 %v4006_v26, %v11113_v43 }
 0x3a1   : > { %v4005_v16 = vsel %vm10174_vm0, %v3939_v40, 1.0  ;;  %v5062_v27 = vand.u32 4294901760, %v5061_v29  ;;  %v11364_v15 = vand.u32 4294901760, %v4071_v22  ;;  %v12969_v43 = vand.u32 4294901760, %v11303_v2 }
 0x3a2   : > { %6637 = vmatpush3.xpose.msra.mxu0 %v11319_v21  ;;  %v5181_v12 = vand.u32 4294901760, %v5180_v19  ;;  %v12970_v40 = vsel %vm10174_vm0, %v11099_v58, 1.0  ;;  %v3989_v29 = vsel %vm10174_vm0, %v11133_v56, 1.0  ;;  %v11382_v19 = vand.u32 4294901760, %v4055_v1  ;;  %v7787_v56 = vpop.eup %7786 }
 0x3a3   : > { %6663 = vmatpush3.xpose.msra.mxu1 %v5055_v38  ;;  %6638 = vmatprep.subr.mxu0 %v11327_v7  ;;  %v12968_v38 = vand.u32 4294901760, %v11293_v47  ;;  %v5187_v26 = vsub.f32 %v11303_v2, %v12969_v43  ;;  %v4054_v60 = vmul.f32 %v12970_v40, %v12871_v10  ;;  %v3872_v43 = vadd.f32 1.0, %v7785_v46 }
 0x3a4   : > { %6664 = vmatprep.subr.mxu1 %v5174_v31  ;;  %v11380_v31 = vsub.f32 %v11155_v8, %v11342_v42  ;;  %12971 = vst [vmem:[#allocation86_spill] sm:$0xff] %v11382_v19  ;;  %v4004_v58 = vsel %vm10174_vm0, %v3938_v48, 1.0  ;;  %v3937_v10 = vmul.f32 0.5, %v3873_v36  ;;  %v11389_v40 = vand.u32 4294901760, %v4070_v45 }
 0x3a5   : > { %v5068_v57 = vsub.f32 %v11293_v47, %v12968_v38  ;;  %v4069_v8 = vmul.f32 %v4005_v16, %v11137_v62  ;;  %v11396_v38 = vsub.f32 %v4071_v22, %v11364_v15  ;;  %v5188_v46 = vand.u32 4294901760, %v5187_v26  ;;  %v7789_v22 = vpop.eup %7788 }
 0x3a6   : > { %6639 = vmatpush3.xpose.msra.mxu0 %v11342_v42  ;;  %v12972_v48 = vand.u32 4294901760, %v11335_v63  ;;  %v3988_v42 = vsel %vm10174_vm0, %v11118_v6, 1.0  ;;  %v11405_v62 = vand.u32 4294901760, %v4054_v60  ;;  %v4053_v16 = vmul.f32 %v3989_v29, %v12887_v50 }
 0x3a7   : > { %6665 = vmatpush3.xpose.msra.mxu1 %v5062_v27  ;;  %6640 = vmatprep.subr.mxu0 %v11364_v15  ;;  %v5069_v33 = vand.u32 4294901760, %v5068_v57  ;;  %v5075_v27 = vsub.f32 %v11317_v61, %v12195_v32  ;;  %v11411_v26 = vsub.f32 %v4055_v1, %v11382_v19  ;;  %v3871_v32 = vadd.f32 1.0, %v7787_v56 }
 0x3a8   : > { %6666 = vmatprep.subr.mxu1 %v5181_v12  ;;  %v5194_v36 = vsub.f32 %v11335_v63, %v12972_v48  ;;  %12973 = vst [vmem:[#allocation57_spill] sm:$0xff] %v11405_v62  ;;  %v3936_v48 = vmul.f32 0.5, %v3872_v43  ;;  %v4003_v12 = vsel %vm10174_vm0, %v3937_v10, 1.0  ;;  %v4068_v6 = vmul.f32 %v4004_v58, %v11158_v41 }
 0x3a9   : > { %v11418_v50 = vsub.f32 %v4070_v45, %v11389_v40  ;;  %v12974_v29 = vand.u32 4294901760, %v11351_v54  ;;  %v11423_v1 = vand.u32 4294901760, %v4069_v8  ;;  %v12976_v56 = vand.u32 4294901760, %v11359_v14 }
 0x3aa   : > { %6641 = vmatpush3.xpose.msra.mxu0 %v11382_v19  ;;  %v5195_v43 = vand.u32 4294901760, %v5194_v36  ;;  %v4052_v19 = vmul.f32 %v3988_v42, %v12869_v4  ;;  %v3987_v41 = vsel %vm10174_vm0, %v11121_v5, 1.0  ;;  %v11434_v45 = vsub.f32 %v4054_v60, %v11405_v62 }
 0x3ab   : > { %6667 = vmatpush3.xpose.msra.mxu1 %v5069_v33  ;;  %6642 = vmatprep.subr.mxu0 %v11389_v40  ;;  %v5076_v33 = vand.u32 4294901760, %v5075_v27  ;;  %v5082_v57 = vsub.f32 %v11351_v54, %v12974_v29  ;;  %12975 = vst [vmem:[#allocation113_spill] sm:$0xff] %v11423_v1  ;;  %v5201_v10 = vsub.f32 %v11359_v14, %v12976_v56  ;;  %v11436_v58 = vand.u32 4294901760, %v4053_v16 }
 0x3ac   : > { %6668 = vmatprep.subr.mxu1 %v5188_v46  ;;  %v3870_v36 = vadd.f32 1.0, %v7789_v22  ;;  %v4002_v29 = vsel %vm10174_vm0, %v3936_v48, 1.0  ;;  %v3935_v56 = vmul.f32 0.5, %v3871_v32  ;;  %v7791_v4 = vpop.eup %7790  ;;  %v11443_v5 = vand.u32 4294901760, %v4068_v6 }
 0x3ad   : > { %12977 = vst [vmem:[#allocation114_spill] sm:$0xff] %v11436_v58  ;;  %v4067_v42 = vmul.f32 %v4003_v12, %v11184_v23  ;;  %v5083_v60 = vand.u32 4294901760, %v5082_v57  ;;  %v11450_v27 = vsub.f32 %v4069_v8, %v11423_v1  ;;  %v5202_v22 = vand.u32 4294901760, %v5201_v10  ;;  %v12981_v12 = vld [vmem:[#allocation106_spill] sm:$0xff] }
 0x3ae   : > { %6643 = vmatpush3.xpose.msra.mxu0 %v11405_v62  ;;  %v12979_v48 = vand.u32 4294901760, %v11396_v38  ;;  %v3986_v62 = vsel %vm10174_vm0, %v11105_v0, 1.0  ;;  %v11459_v23 = vand.u32 4294901760, %v4052_v19  ;;  %v4051_v57 = vmul.f32 %v3987_v41, %v12981_v12 }
 0x3af   : > { %6669 = vmatpush3.xpose.msra.mxu1 %v5076_v33  ;;  %6644 = vmatprep.subr.mxu0 %v11423_v1  ;;  %v12978_v33 = vand.u32 4294901760, %v11380_v31  ;;  %v11465_v8 = vsub.f32 %v4053_v16, %v11436_v58  ;;  %v3934_v10 = vmul.f32 0.5, %v3870_v36  ;;  %v4001_v0 = vsel %vm10174_vm0, %v3935_v56, 1.0  ;;  %v12984_v56 = vld [vmem:[#allocation102_spill] sm:$0xff] }
 0x3b0   : > { %6670 = vmatprep.subr.mxu1 %v5195_v43  ;;  %v5208_v32 = vsub.f32 %v11396_v38, %v12979_v48  ;;  %12980 = vst [vmem:[#allocation65_spill] sm:$0xff] %v11459_v23  ;;  %v3869_v48 = vadd.f32 1.0, %v7791_v4  ;;  %v4066_v43 = vmul.f32 %v4002_v29, %v12948_v9  ;;  %v11471_v1 = vand.u32 4294901760, %v4067_v42 }
 0x3b1   : > { %v5089_v46 = vsub.f32 %v11380_v31, %v12978_v33  ;;  %v11477_v16 = vsub.f32 %v4068_v6, %v11443_v5  ;;  %v12983_v4 = vand.u32 4294901760, %v11418_v50  ;;  %v12204_v29 = vand.u32 4294901760, %v11450_v27 }
 0x3b2   : > { %6645 = vmatpush3.xpose.msra.mxu0 %v11436_v58  ;;  %v5209_v36 = vand.u32 4294901760, %v5208_v32  ;;  %v4050_v33 = vmul.f32 %v3986_v62, %v12984_v56  ;;  %v11488_v58 = vand.u32 4294901760, %v4051_v57  ;;  %v11492_v6 = vsub.f32 %v4052_v19, %v11459_v23 }
 0x3b3   : > { %6671 = vmatpush3.xpose.msra.mxu1 %v5083_v60  ;;  %6646 = vmatprep.subr.mxu0 %v11443_v5  ;;  %v5090_v41 = vand.u32 4294901760, %v5089_v46  ;;  %v12982_v60 = vand.u32 4294901760, %v11411_v26  ;;  %v5215_v9 = vsub.f32 %v11418_v50, %v12983_v4  ;;  %v3985_v46 = vsel %vm10174_vm0, %v11110_v3, 1.0 }
 0x3b4   : > { %6672 = vmatprep.subr.mxu1 %v5202_v22  ;;  %v3853_v22 = vadd.f32 1.0, %v11164_v53  ;;  %12985 = vst [vmem:[#allocation115_spill] sm:$0xff] %v11488_v58  ;;  %12986 = vst [vmem:[#allocation59_spill] sm:$0xff] %v11492_v6  ;;  %v3933_v53 = vmul.f32 0.5, %v3869_v48  ;;  %v11498_v62 = vand.u32 4294901760, %v4066_v43  ;;  %v4065_v3 = vmul.f32 %v4001_v0, %v12953_v55  ;;  %v12989_v0 = vld [vmem:[#allocation103_spill] sm:$0xff] }
 0x3b5   : > { %v5096_v12 = vsub.f32 %v11411_v26, %v12982_v60  ;;  %v4000_v60 = vsel %vm10174_vm0, %v3934_v10, 1.0  ;;  %v11505_v19 = vsub.f32 %v4067_v42, %v11471_v1  ;;  %v5216_v32 = vand.u32 4294901760, %v5215_v9 }
 0x3b6   : > { %6647 = vmatpush3.xpose.msra.mxu0 %v11459_v23  ;;  %12987 = vst [vmem:[#allocation68_spill] sm:$0xff] %v11498_v62  ;;  %v5222_v10 = vsub.f32 %v11450_v27, %v12204_v29  ;;  %v12207_v48 = vand.u32 4294901760, %v11477_v16  ;;  %v3917_v55 = vmul.f32 0.5, %v3853_v22  ;;  %v11520_v9 = vsub.f32 %v4051_v57, %v11488_v58 }
 0x3b7   : > { %6673 = vmatpush3.xpose.msra.mxu1 %v5090_v41  ;;  %6648 = vmatprep.subr.mxu0 %v11471_v1  ;;  %v5097_v4 = vand.u32 4294901760, %v5096_v12  ;;  %v12988_v41 = vand.u32 4294901760, %v11434_v45  ;;  %v4049_v12 = vmul.f32 %v3985_v46, %v12989_v0  ;;  %v4064_v29 = vmul.f32 %v4000_v60, %v12959_v34  ;;  %v12991_v60 = vld [vmem:[#allocation97_spill] sm:$0xff] }
 0x3b8   : > { %6674 = vmatprep.subr.mxu1 %v5209_v36  ;;  %v3984_v36 = vsel %vm10174_vm0, %v11103_v35, 1.0  ;;  %v3999_v35 = vsel %vm10174_vm0, %v3933_v53, 1.0  ;;  %v11526_v22 = vand.u32 4294901760, %v4065_v3  ;;  %v11532_v42 = vsub.f32 %v4066_v43, %v11498_v62 }
 0x3b9   : > { %v5103_v56 = vsub.f32 %v11434_v45, %v12988_v41  ;;  %v11516_v41 = vand.u32 4294901760, %v4050_v33  ;;  %v5223_v57 = vand.u32 4294901760, %v5222_v10  ;;  %v5229_v34 = vsub.f32 %v11477_v16, %v12207_v48 }
 0x3ba   : > { %6649 = vmatpush3.xpose.msra.mxu0 %v11488_v58  ;;  %v4048_v58 = vmul.f32 %v3984_v36, %v12991_v60  ;;  %v3983_v53 = vsel %vm10174_vm0, %v3917_v55, 1.0  ;;  %v11545_v43 = vand.u32 4294901760, %v4049_v12  ;;  %v4063_v36 = vmul.f32 %v3999_v35, %v12963_v39 }
 0x3bb   : > { %6675 = vmatpush3.xpose.msra.mxu1 %v5097_v4  ;;  %6650 = vmatprep.subr.mxu0 %v11498_v62  ;;  %v5104_v46 = vand.u32 4294901760, %v5103_v56  ;;  %v12990_v4 = vand.u32 4294901760, %v11465_v8  ;;  %v11543_v56 = vsub.f32 %v4050_v33, %v11516_v41  ;;  %v12993_v60 = vand.u32 4294901760, %v11492_v6 }
 0x3bc   : > { %6676 = vmatprep.subr.mxu1 %v5216_v32  ;;  %v12208_v32 = vand.u32 4294901760, %v11505_v19  ;;  %v11556_v55 = vsub.f32 %v4065_v3, %v11526_v22  ;;  %v5230_v33 = vand.u32 4294901760, %v5229_v34  ;;  %v11563_v10 = vand.u32 4294901760, %v4048_v58 }
 0x3bd   : > { %v5110_v0 = vsub.f32 %v11465_v8, %v12990_v4  ;;  %12992 = vst [vmem:[#allocation77_spill] sm:$0xff] %v11543_v56  ;;  %v11549_v4 = vand.u32 4294901760, %v4064_v29  ;;  %v5117_v24 = vsub.f32 %v11492_v6, %v12993_v60  ;;  %v4047_v39 = vmul.f32 %v3983_v53, %v12906_v20 }
 0x3be   : > { %6651 = vmatpush3.xpose.msra.mxu0 %v11516_v41  ;;  %v5236_v48 = vsub.f32 %v11505_v19, %v12208_v32  ;;  %v11567_v35 = vsub.f32 %v4049_v12, %v11545_v43  ;;  %v12209_v3 = vand.u32 4294901760, %v11543_v56  ;;  %v11577_v32 = vand.u32 4294901760, %v4063_v36 }
 0x3bf   : > { %6677 = vmatpush3.xpose.msra.mxu1 %v5104_v46  ;;  %6652 = vmatprep.subr.mxu0 %v11526_v22  ;;  %v5111_v46 = vand.u32 4294901760, %v5110_v0  ;;  %v11572_v0 = vsub.f32 %v4064_v29, %v11549_v4  ;;  %v5118_v34 = vand.u32 4294901760, %v5117_v24  ;;  %v12997_v20 = vand.u32 4294901760, %v11532_v42 }
 0x3c0   : > { %6678 = vmatprep.subr.mxu1 %v5223_v57  ;;  %12994 = vst [vmem:[#allocation50_spill] sm:$0xff] %v11567_v35  ;;  %12996 = vst [vmem:[#allocation64_spill] sm:$0xff] %v11577_v32  ;;  %v5237_v57 = vand.u32 4294901760, %v5236_v48  ;;  %v12217_v53 = vand.u32 4294901760, %v11556_v55  ;;  %v11585_v29 = vsub.f32 %v4048_v58, %v11563_v10  ;;  %v11588_v24 = vand.u32 4294901760, %v4047_v39 }
 0x3c1   : > { %v5243_v12 = vsub.f32 %v11532_v42, %v12997_v20  ;;  %v11595_v20 = vsub.f32 %v4063_v36, %v11577_v32 }
 0x3c2   : > { %6653 = vmatpush3.xpose.msra.mxu0 %v11545_v43  ;;  %v5250_v58 = vsub.f32 %v11556_v55, %v12217_v53  ;;  %v13011_v53 = vld [vmem:[#allocation113_spill] sm:$0xff] }
 0x3c3   : > { %6679 = vmatpush3.xpose.msra.mxu1 %v5111_v46  ;;  %6654 = vmatprep.subr.mxu0 %v11549_v4  ;;  %v12995_v46 = vand.u32 4294901760, %v11520_v9  ;;  %12998 = vst [vmem:[#allocation29_spill] sm:$0xff] %v11595_v20 }
 0x3c4   : > { %6680 = vmatprep.subr.mxu1 %v5230_v33  ;;  %v12212_v33 = vand.u32 4294901760, %v11567_v35 }
 0x3c5   : > { %v5124_v60 = vsub.f32 %v11520_v9, %v12995_v46  ;;  %v5131_v46 = vsub.f32 %v11543_v56, %v12209_v3  ;;  %v11605_v3 = vsub.f32 %v4047_v39, %v11588_v24 }
 0x3c6   : > { %6655 = vmatpush3.xpose.msra.mxu0 %v11563_v10 }
 0x3c7   : > { %6681 = vmatpush3.xpose.msra.mxu1 %v5118_v34  ;;  %6656 = vmatprep.subr.mxu0 %v11577_v32  ;;  %v5125_v48 = vand.u32 4294901760, %v5124_v60  ;;  %v5244_v34 = vand.u32 4294901760, %v5243_v12  ;;  %v12216_v60 = vand.u32 4294901760, %v11585_v29  ;;  %v5132_v36 = vand.u32 4294901760, %v5131_v46 }
 0x3c8   : > { %6682 = vmatprep.subr.mxu1 %v5237_v57  ;;  %v12213_v57 = vand.u32 4294901760, %v11572_v0  ;;  %v5138_v12 = vsub.f32 %v11567_v35, %v12212_v33  ;;  %v5251_v32 = vand.u32 4294901760, %v5250_v58  ;;  %v12214_v39 = vand.u32 4294901760, %v11605_v3  ;;  %v12999_v33 = vld [vmem:[#allocation24_spill] sm:$0xff] }
 0x3c9   : > { %v5145_v58 = vsub.f32 %v11585_v29, %v12216_v60  ;;  %v13010_v60 = vld [vmem:[#allocation57_spill] sm:$0xff] }
 0x3ca   : > { %6657 = vmatpush3.xpose.msra.mxu0 %v11588_v24  ;;  %v5139_v46 = vand.u32 4294901760, %v5138_v12 }
 0x3cb   : > { %6683 = vmatpush3.xpose.msra.mxu1 %v5125_v48  ;;  %6694 = vmatprep.subr.mxu0 %v11196_v44  ;;  %v5257_v48 = vsub.f32 %v11572_v0, %v12213_v57 }
 0x3cc   : > { %6684 = vmatprep.subr.mxu1 %v5244_v34  ;;  %v12215_v34 = vand.u32 4294901760, %v11595_v20 }
 0x3cd   : > { %6659 = vmatmul.mubr.f32.vlgmr.msra.gmra.mxu0 %v12944_v30  ;;  %v5258_v57 = vand.u32 4294901760, %v5257_v48 }
 0x3ce   : > { %6695 = vmatpush3.xpose.msra.mxu0 %v11219_v59  ;;  %6726 = vmatprep.mubr.f32.mxu0 %v12999_v33  ;;  %v5264_v30 = vsub.f32 %v11595_v20, %v12215_v34  ;;  %v13009_v34 = vld [vmem:[#allocation86_spill] sm:$0xff] }
 0x3cf   : > { %6685 = vmatpush3.xpose.msra.mxu1 %v5132_v36  ;;  %6696 = vmatprep.subr.mxu0 %v11228_v11  ;;  %v5152_v36 = vsub.f32 %v11605_v3, %v12214_v39  ;;  %v13008_v39 = vld [vmem:[#allocation112_spill] sm:$0xff] }
 0x3d0   : > { %6686 = vmatprep.subr.mxu1 %v5251_v32  ;;  %v5146_v32 = vand.u32 4294901760, %v5145_v58  ;;  %v5265_v12 = vand.u32 4294901760, %v5264_v30  ;;  %v13002_v58 = vld [vmem:[#allocation55_spill] sm:$0xff]  ;;  %v13003_v30 = vld [vmem:[#allocation69_spill] sm:$0xff] }
 0x3d1   : > { %v5153_v48 = vand.u32 4294901760, %v5152_v36  ;;  %v13005_v36 = vld [vmem:[#allocation52_spill] sm:$0xff] }
 0x3d2   : > { %6697 = vmatpush3.xpose.msra.mxu0 %v11243_v28 }
 0x3d3   : > { %6687 = vmatpush3.xpose.msra.mxu1 %v5139_v46  ;;  %6698 = vmatprep.subr.mxu0 %v11253_v51  ;;  %v13001_v46 = vld [vmem:[#allocation89_spill] sm:$0xff] }
 0x3d4   : > { %6688 = vmatprep.subr.mxu1 %v5258_v57  ;;  %v13000_v57 = vld [vmem:[#allocation73_spill] sm:$0xff] }
 0x3d6   : > { %6699 = vmatpush3.xpose.msra.mxu0 %v11265_v17 }
 0x3d7   : > { %6689 = vmatpush3.xpose.msra.mxu1 %v5146_v32  ;;  %6700 = vmatprep.subr.mxu0 %v11284_v25  ;;  %v13004_v32 = vld [vmem:[#allocation61_spill] sm:$0xff] }
 0x3d8   : > { %6690 = vmatprep.subr.mxu1 %v5265_v12  ;;  %v13006_v12 = vld [vmem:[#allocation70_spill] sm:$0xff] }
 0x3da   : > { %6701 = vmatpush3.xpose.msra.mxu0 %v11293_v47 }
 0x3db   : > { %6691 = vmatpush3.xpose.msra.mxu1 %v5153_v48  ;;  %6702 = vmatprep.subr.mxu0 %v11303_v2  ;;  %v13007_v48 = vld [vmem:[#allocation88_spill] sm:$0xff] }
 0x3dc   : > { %6728 = vmatprep.subr.mxu1 %v11171_v18 }
 0x3de   : > { %6693 = vmatmul.mubr.f32.vlgmr.msra.gmra.mxu1 %v10770_v13  ;;  %6703 = vmatpush3.xpose.msra.mxu0 %v11317_v61 }
 0x3df   : > { %6729 = vmatpush3.xpose.msra.mxu1 %v11190_v52  ;;  %6704 = vmatprep.subr.mxu0 %v11335_v63 }
 0x3e0   : > { %6730 = vmatprep.subr.mxu1 %v11198_v49  ;;  %6760 = vmatprep.mubr.f32.mxu1 %v13000_v57 }
 0x3e2   : > { %6705 = vmatpush3.xpose.msra.mxu0 %v11351_v54 }
 0x3e3   : > { %6731 = vmatpush3.xpose.msra.mxu1 %v13001_v46  ;;  %6706 = vmatprep.subr.mxu0 %v11359_v14 }
 0x3e4   : > { %6732 = vmatprep.subr.mxu1 %v13002_v58 }
 0x3e6   : > { %6707 = vmatpush3.xpose.msra.mxu0 %v11380_v31 }
 0x3e7   : > { %6733 = vmatpush3.xpose.msra.mxu1 %v13003_v30  ;;  %6708 = vmatprep.subr.mxu0 %v11396_v38 }
 0x3e8   : > { %6734 = vmatprep.subr.mxu1 %v13004_v32 }
 0x3ea   : > { %6709 = vmatpush3.xpose.msra.mxu0 %v11411_v26 }
 0x3eb   : > { %6735 = vmatpush3.xpose.msra.mxu1 %v13005_v36  ;;  %6710 = vmatprep.subr.mxu0 %v11418_v50 }
 0x3ec   : > { %6736 = vmatprep.subr.mxu1 %v13006_v12 }
 0x3ee   : > { %6711 = vmatpush3.xpose.msra.mxu0 %v11434_v45 }
 0x3ef   : > { %6737 = vmatpush3.xpose.msra.mxu1 %v13007_v48  ;;  %6712 = vmatprep.subr.mxu0 %v11450_v27 }
 0x3f0   : > { %6738 = vmatprep.subr.mxu1 %v11308_v37 }
 0x3f2   : > { %6713 = vmatpush3.xpose.msra.mxu0 %v11465_v8 }
 0x3f3   : > { %6739 = vmatpush3.xpose.msra.mxu1 %v11319_v21  ;;  %6714 = vmatprep.subr.mxu0 %v11477_v16 }
 0x3f4   : > { %6740 = vmatprep.subr.mxu1 %v11327_v7 }
 0x3f6   : > { %6715 = vmatpush3.xpose.msra.mxu0 %v11492_v6  ;;  %v13012_v6 = vld [vmem:[#allocation114_spill] sm:$0xff] }
 0x3f7   : > { %6741 = vmatpush3.xpose.msra.mxu1 %v13008_v39  ;;  %6716 = vmatprep.subr.mxu0 %v11505_v19 }
 0x3f8   : > { %6742 = vmatprep.subr.mxu1 %v11364_v15 }
 0x3fa   : > { %6717 = vmatpush3.xpose.msra.mxu0 %v11520_v9 }
 0x3fb   : > { %6743 = vmatpush3.xpose.msra.mxu1 %v13009_v34  ;;  %6718 = vmatprep.subr.mxu0 %v11532_v42 }
 0x3fc   : > { %6744 = vmatprep.subr.mxu1 %v11389_v40 }
 0x3fe   : > { %6719 = vmatpush3.xpose.msra.mxu0 %v11543_v56  ;;  %v13013_v56 = vld [vmem:[#allocation115_spill] sm:$0xff] }
 0x3ff   : > { %6745 = vmatpush3.xpose.msra.mxu1 %v13010_v60  ;;  %6720 = vmatprep.subr.mxu0 %v11556_v55 }
 0x400   : > { %6746 = vmatprep.subr.mxu1 %v13011_v53 }
 0x402   : > { %6721 = vmatpush3.xpose.msra.mxu0 %v11567_v35  ;;  %v13014_v35 = vand.u32 4294901760, %v11196_v44  ;;  %v13018_v44 = vand.u32 4294901760, %v11253_v51  ;;  %v13023_v51 = vand.u32 4294901760, %v11303_v2  ;;  %v13030_v2 = vand.u32 4294901760, %v11411_v26 }
 0x403   : > { %6747 = vmatpush3.xpose.msra.mxu1 %v13012_v6  ;;  %6722 = vmatprep.subr.mxu0 %v11572_v0 }
 0x404   : > { %6748 = vmatprep.subr.mxu1 %v11443_v5 }
 0x406   : > { %6723 = vmatpush3.xpose.msra.mxu0 %v11585_v29 }
 0x407   : > { %6749 = vmatpush3.xpose.msra.mxu1 %v11459_v23  ;;  %6724 = vmatprep.subr.mxu0 %v11595_v20  ;;  %v13015_v23 = vand.u32 4294901760, %v11219_v59  ;;  %v13016_v20 = vand.u32 4294901760, %v11228_v11  ;;  %v13019_v59 = vand.u32 4294901760, %v11265_v17  ;;  %v13021_v11 = vand.u32 4294901760, %v11284_v25 }
 0x408   : > { %6750 = vmatprep.subr.mxu1 %v11471_v1  ;;  %v13024_v17 = vand.u32 4294901760, %v11317_v61  ;;  %v13025_v25 = vand.u32 4294901760, %v11335_v63  ;;  %v13031_v61 = vand.u32 4294901760, %v11418_v50  ;;  %v13032_v63 = vand.u32 4294901760, %v11434_v45  ;;  %v13041_v50 = vld [vmem:[#allocation77_spill] sm:$0xff] }
 0x409   : > { %v13042_v45 = vand.u32 4294901760, %v13041_v50 }
 0x40a   : > { %6725 = vmatpush3.xpose.msra.mxu0 %v11605_v3 }
 0x40b   : > { %6751 = vmatpush3.xpose.msra.mxu1 %v13013_v56  ;;  %6762 = vmatprep.subr.mxu0 %v13014_v35 }
 0x40c   : > { %6752 = vmatprep.subr.mxu1 %v11498_v62  ;;  %v13017_v62 = vand.u32 4294901760, %v11243_v28  ;;  %v13022_v28 = vand.u32 4294901760, %v11293_v47  ;;  %v13027_v47 = vand.u32 4294901760, %v11359_v14  ;;  %v13034_v14 = vand.u32 4294901760, %v11465_v8 }
 0x40d   : > { %6727 = vmatmul.mubr.f32.vlgmr.msra.gmra.mxu0 %v12999_v33 }
 0x40e   : > { %6763 = vmatpush3.xpose.msra.mxu0 %v13015_v23  ;;  %6794 = vmatprep.mubr.f32.mxu0 %v10770_v13  ;;  %v13020_v23 = vld [vmem:[#allocation64_spill] sm:$0xff] }
 0x40f   : > { %6753 = vmatpush3.xpose.msra.mxu1 %v11516_v41  ;;  %6764 = vmatprep.subr.mxu0 %v13016_v20 }
 0x410   : > { %6754 = vmatprep.subr.mxu1 %v11526_v22 }
 0x412   : > { %6765 = vmatpush3.xpose.msra.mxu0 %v13017_v62  ;;  %v13048_v62 = vand.u32 4294901760, %v11585_v29 }
 0x413   : > { %6755 = vmatpush3.xpose.msra.mxu1 %v11545_v43  ;;  %6766 = vmatprep.subr.mxu0 %v13018_v44 }
 0x414   : > { %6756 = vmatprep.subr.mxu1 %v11549_v4 }
 0x416   : > { %6767 = vmatpush3.xpose.msra.mxu0 %v13019_v59 }
 0x417   : > { %6757 = vmatpush3.xpose.msra.mxu1 %v11563_v10  ;;  %6768 = vmatprep.subr.mxu0 %v13021_v11 }
 0x418   : > { %6758 = vmatprep.subr.mxu1 %v13020_v23 }
 0x41a   : > { %6769 = vmatpush3.xpose.msra.mxu0 %v13022_v28 }
 0x41b   : > { %6759 = vmatpush3.xpose.msra.mxu1 %v11588_v24  ;;  %6770 = vmatprep.subr.mxu0 %v13023_v51 }
 0x41c   : > { %6796 = vmatprep.subr.mxu1 %v11171_v18  ;;  %v13026_v18 = vand.u32 4294901760, %v11351_v54  ;;  %v13033_v54 = vand.u32 4294901760, %v11450_v27  ;;  %v13044_v27 = vld [vmem:[#allocation50_spill] sm:$0xff] }
 0x41d   : > { %v13045_v8 = vand.u32 4294901760, %v13044_v27 }
 0x41e   : > { %6761 = vmatmul.mubr.f32.vlgmr.msra.gmra.mxu1 %v13000_v57  ;;  %6771 = vmatpush3.xpose.msra.mxu0 %v13024_v17  ;;  %v13053_v17 = vlaneseq }
 0x41f   : > { %6797 = vmatpush3.xpose.msra.mxu1 %v11190_v52  ;;  %6772 = vmatprep.subr.mxu0 %v13025_v25  ;;  %v13028_v52 = vand.u32 4294901760, %v11380_v31  ;;  %v13035_v31 = vand.u32 4294901760, %v11477_v16  ;;  %v13047_v16 = vld [vmem:[#allocation65_spill] sm:$0xff] }
 0x420   : > { %6798 = vmatprep.subr.mxu1 %v11198_v49  ;;  %6828 = vmatprep.mubr.f32.mxu1 %v10770_v13  ;;  %v13029_v49 = vand.u32 4294901760, %v11396_v38  ;;  %v13036_v38 = vld [vmem:[#allocation59_spill] sm:$0xff]  ;;  %v5800_v25 = vshrl.u32 %v13053_v17, 7 }
 0x421   : > { %v13037_v26 = vand.u32 4294901760, %v13036_v38 }
 0x422   : > { %6773 = vmatpush3.xpose.msra.mxu0 %v13026_v18 }
 0x423   : > { %6799 = vmatpush3.xpose.msra.mxu1 %v13001_v46  ;;  %6774 = vmatprep.subr.mxu0 %v13027_v47  ;;  %v7947_v46 = vmov 1983009808  }
 0x424   : > { %6800 = vmatprep.subr.mxu1 %v13002_v58  ;;  %v5797_v58 = vunpack.c.l.s4 %v7947_v46 }
 0x426   : > { %6775 = vmatpush3.xpose.msra.mxu0 %v13028_v52  ;;  %v5798_v51 = vunpack.c.0.s8 %v5797_v58 }
 0x427   : > { %6801 = vmatpush3.xpose.msra.mxu1 %v13003_v30  ;;  %6776 = vmatprep.subr.mxu0 %v13029_v49 }
 0x428   : > { %6802 = vmatprep.subr.mxu1 %v13004_v32 }
 0x42a   : > { %6777 = vmatpush3.xpose.msra.mxu0 %v13030_v2 }
 0x42b   : > { %6803 = vmatpush3.xpose.msra.mxu1 %v13005_v36  ;;  %6778 = vmatprep.subr.mxu0 %v13031_v61 }
 0x42c   : > { %6804 = vmatprep.subr.mxu1 %v13006_v12 }
 0x42e   : > { %6779 = vmatpush3.xpose.msra.mxu0 %v13032_v63 }
 0x42f   : > { %6805 = vmatpush3.xpose.msra.mxu1 %v13007_v48  ;;  %6780 = vmatprep.subr.mxu0 %v13033_v54 }
 0x430   : > { %6806 = vmatprep.subr.mxu1 %v11308_v37  ;;  %v13038_v37 = vand.u32 4294901760, %v11505_v19  ;;  %v13049_v19 = vld [vmem:[#allocation29_spill] sm:$0xff] }
 0x432   : > { %6781 = vmatpush3.xpose.msra.mxu0 %v13034_v14 }
 0x433   : > { %6807 = vmatpush3.xpose.msra.mxu1 %v11319_v21  ;;  %6782 = vmatprep.subr.mxu0 %v13035_v31  ;;  %v13039_v21 = vand.u32 4294901760, %v11520_v9  ;;  %v13052_v9 = vld [vmem:[#allocation68_spill] sm:$0xff] }
 0x434   : > { %6808 = vmatprep.subr.mxu1 %v11327_v7  ;;  %v13040_v7 = vand.u32 4294901760, %v11532_v42  ;;  %v13050_v42 = vand.u32 4294901760, %v13049_v19 }
 0x436   : > { %6783 = vmatpush3.xpose.msra.mxu0 %v13037_v26  ;;  %v5801_v26 = vsub.s32 %v5798_v51, %v5800_v25 }
 0x437   : > { %6809 = vmatpush3.xpose.msra.mxu1 %v13008_v39  ;;  %6784 = vmatprep.subr.mxu0 %v13038_v37 }
 0x438   : > { %6810 = vmatprep.subr.mxu1 %v11364_v15  ;;  %v13043_v15 = vand.u32 4294901760, %v11556_v55 }
 0x43a   : > { %6785 = vmatpush3.xpose.msra.mxu0 %v13039_v21 }
 0x43b   : > { %6811 = vmatpush3.xpose.msra.mxu1 %v13009_v34  ;;  %6786 = vmatprep.subr.mxu0 %v13040_v7 }
 0x43c   : > { %6812 = vmatprep.subr.mxu1 %v11389_v40  ;;  %v13046_v40 = vand.u32 4294901760, %v11572_v0 }
 0x43e   : > { %6787 = vmatpush3.xpose.msra.mxu0 %v13042_v45 }
 0x43f   : > { %6813 = vmatpush3.xpose.msra.mxu1 %v13010_v60  ;;  %6788 = vmatprep.subr.mxu0 %v13043_v15 }
 0x440   : > { %6814 = vmatprep.subr.mxu1 %v13011_v53 }
 0x442   : > { %6789 = vmatpush3.xpose.msra.mxu0 %v13045_v8 }
 0x443   : > { %6815 = vmatpush3.xpose.msra.mxu1 %v13012_v6  ;;  %6790 = vmatprep.subr.mxu0 %v13046_v40  ;;  %v13051_v6 = vand.u32 4294901760, %v11605_v3 }
 0x444   : > { %6816 = vmatprep.subr.mxu1 %v11443_v5 }
 0x446   : > { %6791 = vmatpush3.xpose.msra.mxu0 %v13048_v62 }
 0x447   : > { %6817 = vmatpush3.xpose.msra.mxu1 %v13047_v16  ;;  %6792 = vmatprep.subr.mxu0 %v13050_v42 }
 0x448   : > { %6818 = vmatprep.subr.mxu1 %v11471_v1  ;;  %v4183_v1 = vpop.f32.mrf.mxu0 }
 0x44a   : > { %6793 = vmatpush3.xpose.msra.mxu0 %v13051_v6  ;;  %v4185_v5 = vpop.f32.mrf.mxu0 }
 0x44b   : > { %6819 = vmatpush3.xpose.msra.mxu1 %v13013_v56  ;;  %v4415_v56 = vpop.f32.mrf.mxu1 }
 0x44c   : > { %6820 = vmatprep.subr.mxu1 %v13052_v9  ;;  %v4552_v55 = vpop.f32.mrf.mxu0  ;;  %v4416_v39 = vadd.f32 %v4415_v56, %v4183_v1 }
 0x44d   : > { %6795 = vmatmul.mubr.f32.vlgmr.msra.gmra.mxu0 %v10770_v13  ;;  %v4417_v35 = vpop.f32.mrf.mxu1 }
 0x44e   : > { %v4553_v32 = vadd.f32 %v4552_v55, %v4416_v39 }
 0x44f   : > { %6821 = vmatpush3.xpose.msra.mxu1 %v11516_v41  ;;  %v4554_v41 = vpop.f32.mrf.mxu0  ;;  %v4658_v3 = vpop.f32.mrf.mxu1 }
 0x450   : > { %6822 = vmatprep.subr.mxu1 %v11526_v22  ;;  %v4659_v59 = vadd.f32 %v4658_v3, %v4553_v32 }
 0x451   : > { %v4826_v22 = vpop.f32.mrf.mxu0  ;;  %v4660_v0 = vpop.f32.mrf.mxu1 }
 0x452   : > { %v4827_v47 = vadd.f32 %v4826_v22, %v4659_v59 }
 0x453   : > { %6823 = vmatpush3.xpose.msra.mxu1 %v11545_v43  ;;  %v4828_v43 = vpop.f32.mrf.mxu0 }
 0x454   : > { %6824 = vmatprep.subr.mxu1 %v11549_v4 }
 0x457   : > { %6825 = vmatpush3.xpose.msra.mxu1 %v11563_v10 }
 0x458   : > { %6826 = vmatprep.subr.mxu1 %v13020_v23 }
 0x45b   : > { %6827 = vmatpush3.xpose.msra.mxu1 %v11588_v24  ;;  %v4418_v24 = vadd.f32 %v4417_v35, %v4185_v5 }
 0x45d   : > { %v4555_v57 = vadd.f32 %v4554_v41, %v4418_v24 }
 0x45e   : > { %6829 = vmatmul.mubr.f32.vlgmr.msra.gmra.mxu1 %v10770_v13  ;;  %v4930_v53 = vpop.f32.mrf.mxu1 }
 0x45f   : > { %v4661_v36 = vadd.f32 %v4660_v0, %v4555_v57  ;;  %v4931_v63 = vadd.f32 %v4930_v53, %v4827_v47 }
 0x460   : > { %v4932_v29 = vpop.f32.mrf.mxu1 }
 0x461   : > { %v4829_v23 = vadd.f32 %v4828_v43, %v4661_v36 }
 0x463   : > { %v4933_v52 = vadd.f32 %v4932_v29, %v4829_v23 }
 0x465   : > { %v5794_v38 = vcombine.low %v4931_v63, %v4933_v52 }
 0x467   : > { %v5802_v50 = vrot.slane %v5794_v38, %v5801_v26 }
 0x48d   : > { %v5038_v4 = vpop.f32.mrf.mxu0 }
 0x48f   : > { %v5040_v10 = vpop.f32.mrf.mxu0 }
 0x49e   : > { %v5270_v33 = vpop.f32.mrf.mxu1 }
 0x49f   : > { %v5271_v12 = vadd.f32 %v5270_v33, %v5038_v4 }
 0x4a0   : > { %v5272_v60 = vpop.f32.mrf.mxu1 }
 0x4a1   : > { %v5273_v48 = vadd.f32 %v5272_v60, %v5040_v10 }
 0x4cd   : > { %v5407_v20 = vpop.f32.mrf.mxu0 }
 0x4ce   : > { %v5408_v11 = vadd.f32 %v5407_v20, %v5271_v12 }
 0x4cf   : > { %v5409_v34 = vpop.f32.mrf.mxu0 }
 0x4d0   : > { %v5410_v28 = vadd.f32 %v5409_v34, %v5273_v48 }
 0x4de   : > { %v5513_v13 = vpop.f32.mrf.mxu1 }
 0x4df   : > { %v5514_v49 = vadd.f32 %v5513_v13, %v5408_v11 }
 0x4e0   : > { %v5515_v44 = vpop.f32.mrf.mxu1 }
 0x4e1   : > { %v5516_v2 = vadd.f32 %v5515_v44, %v5410_v28 }
 0x50d   : > { %v5681_v30 = vpop.f32.mrf.mxu0 }
 0x50e   : > { %v5682_v54 = vadd.f32 %v5681_v30, %v5514_v49 }
 0x50f   : > { %v5683_v18 = vpop.f32.mrf.mxu0 }
 0x510   : > { %v5684_v14 = vadd.f32 %v5683_v18, %v5516_v2 }
 0x51e   : > { %v5785_v61 = vpop.f32.mrf.mxu1 }
 0x51f   : > { %v5786_v37 = vadd.f32 %v5785_v61, %v5682_v54 }
 0x520   : > { %v5787_v31 = vpop.f32.mrf.mxu1 }
 0x521   : > { %v5788_v21 = vadd.f32 %v5787_v31, %v5684_v14 }
 0x523   : > { %v5795_v7 = vcombine.low %v5786_v37, %v5788_v21 }
 0x525   : > { %v5809_v45 = vrot.slane %v5795_v7, %v5801_v26 }
 0x527   : > { %v5810_v15 = vcombine.low %v5802_v50, %v5809_v45 }
 0x529   : > { %5812 = vst [vmem:[%s248_s13] sm:$0xff] %v5810_v15 }
 0x52a   : > { %7883 = shalt.err (!%p7880_p6)
}
 0x52b   : > { %s7884_s23 = scalar_lea.hbm %s5826_s10, 128  ;;  %s7888_s5 = scalar_lea.hbm %s11834_s4, 256 }
 0x52c   : > { %p7885_p11 = scmp.ne.s32.totalorder %s5826_s10, %s7884_s23  ;;  %p7889_p5 = scmp.lt.s32.totalorder %s5826_s10, %s11834_s4 }
 0x52d   : > { %p7890_p13 = scmp.lt.s32.totalorder %s7888_s5, %s7884_s23 }
 0x52e   : > { %p7886_p0 = pnand %p7885_p11, %p13054_p1 }
 0x52f   : > { %p7891_p10 = por %p7890_p13, %p7889_p5 }
 0x530   : > { %p7887_p2 = pneg %p7886_p0 }
 0x532   : > { %p7892_p3 = pnand %p7891_p10, %p7887_p2 }
 0x534   : > { %7895 = shalt.err (!%p7892_p3)
}
 0x535   : > { %7607 = dma.vmem_to_hbm [thread:$0]  (%p13054_p1), %s5829_s14, 128, %s5826_s10, %s5814_s25  }
 0x536 PF: > { %s5840_s6 = sand.u32 1, %s7926_s15   ;;  %p13055_p7 = scmp.ne.s32.totalorder %s12227_s28, 0 }
 0x537   : > { %s5841_s9 = scalar_lea.sflag [#allocation4], %s5840_s6 }
 0x538   : > { %p7617_p9 = pnand %p5921_p8, %p13055_p7 }
 0x53a   : > { %p7618_p12 = pneg %p7617_p9 }
 0x53c   : > { %7921 = dma.done.wait (%p7618_p12), %s5841_s9, 128  }
 0x53d   : > { %7923 = vsyncadd (%p7618_p12), %s5841_s9, 4294967168  ;;  %p18_p4 = scmp.ge.s32.totalorder %s7999_s21, 4   ;;  %s13056_s15 = smov %s7930_s16 }
 0x53e   : > { %s13057_s16 = smov %s7934_s17  ;;  %s13058_s17 = smov %s8011_s24 }
 0x53f   : > { %s13059_s18 = smov %s7999_s21  ;;  %20 = sbr.rel (!%p18_p4) target bundleno = 6 (0x6), region = 89 }
 0x544   :  { %5846 = vsyncpa [#allocation3], 1 }
 0x545   :  { %5848 = vsyncpa [#allocation3 + $0x1], 1 }
 0x546   :  { %5849 = vsyncpa [#allocation6], 1 }
 0x547   :  { %5850 = vsyncpa [#allocation4], 1 }
 0x548   :  { %5852 = vsyncpa [#allocation4 + $0x1], 1 }

</bundles_post_ra>
